<compile_context>
chip_gen: v7x
topology: tpu7x:2x2x1
jax: 0.10.0
libtpu: 0.0.40
codegen_flags: <defaults>
</compile_context>

<pallas_src>
import jax
import jax.numpy as jnp
from jax.experimental import pallas as pl
from jax.experimental.pallas import tpu as pltpu


def _round_up(x, m):
    return ((x + m - 1) // m) * m


# ---------------------------------------------------------------------------
# Kernel: fused 6-layer MLP on one batch tile, weights resident in VMEM.
# ---------------------------------------------------------------------------
def _generator_kernel(x_ref,
                      w1_ref, b1_ref,
                      w2_ref, b2_ref,
                      w3_ref, b3_ref,
                      w4_ref, b4_ref,
                      w5_ref, b5_ref,
                      w6_ref, b6_ref,
                      o_ref):
    def lrelu(v):                       # LeakyReLU(0.2), f32 on the VPU
        return jnp.where(v > 0, v, 0.2 * v)

    def layer(h_bf16, w_ref, b_ref):
        # bf16 x bf16 -> f32 accumulate on the MXU, bias add + lrelu in f32.
        acc = jnp.dot(h_bf16, w_ref[...], preferred_element_type=jnp.float32)
        return lrelu(acc + b_ref[...])

    h = x_ref[...]                                       # already bf16
    h = layer(h, w1_ref, b1_ref).astype(jnp.bfloat16)
    h = layer(h, w2_ref, b2_ref).astype(jnp.bfloat16)
    h = layer(h, w3_ref, b3_ref).astype(jnp.bfloat16)
    h = layer(h, w4_ref, b4_ref).astype(jnp.bfloat16)
    h = layer(h, w5_ref, b5_ref).astype(jnp.bfloat16)
    h = layer(h, w6_ref, b6_ref)                         # f32 (lrelu, as torch)
    if o_ref.dtype == jnp.bfloat16:
        # bf16 tanh halves EUP occupancy on v6e/v7x when bf16 output is wanted.
        h = h.astype(jnp.bfloat16)
    o_ref[...] = jnp.tanh(h).astype(o_ref.dtype)


# ---------------------------------------------------------------------------
# One-time parameter preparation (hoisted out of the forward pass).
# ---------------------------------------------------------------------------
def prepare_params(params):
    """params: [(w1, b1), ..., (w6, b6)], w_i: (in, out), b_i: (1, out), f32.

    Returns a dict with zero-padded bf16 weights / f32 biases (feature dims
    rounded up to multiples of 128) plus shape metadata.
    """
    in_dim = params[0][0].shape[0]
    in_pad = _round_up(in_dim, 128)

    flat = []
    dims_pad = [in_pad]
    prev_pad = in_pad
    for w, bias in params:
        fi, fo = w.shape
        fo_pad = _round_up(fo, 128)
        wp = jnp.zeros((prev_pad, fo_pad), jnp.bfloat16)
        wp = wp.at[:fi, :fo].set(w.astype(jnp.bfloat16))
        bp = jnp.zeros((1, fo_pad), jnp.float32)
        bp = bp.at[:, :fo].set(bias.astype(jnp.float32))
        flat.extend([wp, bp])
        dims_pad.append(fo_pad)
        prev_pad = fo_pad

    return {
        "flat": flat,
        "in_dim": in_dim,
        "in_pad": in_pad,
        "out_dim": params[-1][0].shape[1],
        "out_pad": prev_pad,
        "dims_pad": dims_pad,
    }


# ---------------------------------------------------------------------------
# Wrapper
# ---------------------------------------------------------------------------
def generator_forward(data, condition, color, prepared, *,
                      batch_tile=512, out_dtype=jnp.float32):
    """Pallas equivalent of Generator.forward(data, condition, color).

    data:      (B, ...) noise, flattened to (B, 100)
    condition: (B, 2)  (any dtype, cast to float like `.float()` in torch)
    color:     (B, 2)
    prepared:  output of prepare_params()
    out_dtype: jnp.float32 (torch-equivalent) or jnp.bfloat16 (halves the
               dominant HBM writeback when downstream accepts bf16).
    """
    flat = prepared["flat"]
    in_dim, in_pad = prepared["in_dim"], prepared["in_pad"]
    out_dim, out_pad = prepared["out_dim"], prepared["out_pad"]
    dims_pad = prepared["dims_pad"]

    b = data.shape[0]
    x = jnp.concatenate(
        [data.reshape(b, -1).astype(jnp.float32),
         condition.astype(jnp.float32),
         color.astype(jnp.float32)],
        axis=1)
    assert x.shape[1] == in_dim, (x.shape, in_dim)
    # bf16 input tile: halves input DMA; matmul consumes bf16 anyway.
    x = jnp.pad(x, ((0, 0), (0, in_pad - in_dim))).astype(jnp.bfloat16)

    # --- batch tiling: multiple of 16 (bf16 sublanes); aim for >=2 grid steps
    #     so the "parallel" batch axis shards across both v7x TensorCores.
    half = _round_up(max(1, -(-b // 2)), 16)          # ceil(b/2) rounded to 16
    tb = max(16, min(batch_tile, half))
    b_pad = _round_up(b, tb)
    if b_pad != b:
        x = jnp.pad(x, ((0, b_pad - b), (0, 0)))
    grid = (b_pad // tb,)

    # --- BlockSpecs: x/out batch-tiled (double-buffered by default), constant
    #     weights/biases single-buffered and resident across all grid steps.
    in_specs = [pl.BlockSpec((tb, in_pad), lambda i: (i, 0))]
    for t in flat:
        in_specs.append(pl.BlockSpec(t.shape, lambda i: (0, 0),
                                     pipeline_mode=pl.Buffered(1)))
    out_spec = pl.BlockSpec((tb, out_pad), lambda i: (i, 0))

    # --- VMEM budget: 1x weights (single-buffered) + double-buffered io tiles
    #     + in-flight f32 activations; cap at 48 MiB (headroom under v7x 64 MiB)
    out_itemsize = jnp.dtype(out_dtype).itemsize
    weight_bytes = sum(t.size * t.dtype.itemsize for t in flat)
    io_bytes = 2 * tb * in_pad * 2 + 2 * tb * out_pad * out_itemsize
    act_bytes = (tb * out_pad + 2 * tb * max(dims_pad[:-1])) * 4
    vmem_limit = int(min(
        max((weight_bytes + io_bytes + act_bytes) * 1.3 + (4 << 20), 16 << 20),
        48 << 20))

    out_full = pl.pallas_call(
        _generator_kernel,
        out_shape=jax.ShapeDtypeStruct((b_pad, out_pad), out_dtype),
        grid=grid,
        in_specs=in_specs,
        out_specs=out_spec,
        compiler_params=pltpu.CompilerParams(
            dimension_semantics=("parallel",),
            vmem_limit_bytes=vmem_limit),
    )(x, *flat)

    return out_full[:b, :out_dim]


# ---------------------------------------------------------------------------
# Deterministic parameter init (nn.Linear-shaped; synthetic values)
# ---------------------------------------------------------------------------
def init_generator_params(key, out_layer):
    dims = [100 + 2 + 2,
            out_layer,
            out_layer * 2,
            out_layer * 4,
            out_layer * 8,
            out_layer * 16,
            784 * 3]
    params = []
    for i in range(6):
        fan_in, fan_out = dims[i], dims[i + 1]
        key, kw, kb = jax.random.split(key, 3)
        bound = 1.0 / jnp.sqrt(float(fan_in))
        # stored as (in, out) -- transpose of torch's (out, in)
        w = jax.random.uniform(kw, (fan_in, fan_out), jnp.float32,
                               minval=-bound, maxval=bound)
        bias = jax.random.uniform(kb, (1, fan_out), jnp.float32,
                                  minval=-bound, maxval=bound)
        params.append((w, bias))
    return params


# ---------------------------------------------------------------------------
# Pure-JAX reference (same bf16-in / f32-accumulate numerics as the kernel)
# ---------------------------------------------------------------------------
def generator_ref(data, condition, color, params):
    b = data.shape[0]
    x = jnp.concatenate(
        [data.reshape(b, -1).astype(jnp.float32),
         condition.astype(jnp.float32),
         color.astype(jnp.float32)],
        axis=1)
    h = x.astype(jnp.bfloat16)
    for li, (w, bias) in enumerate(params):
        acc = jnp.dot(h, w.astype(jnp.bfloat16),
                      preferred_element_type=jnp.float32) + bias
        acc = jnp.where(acc > 0, acc, 0.2 * acc)     # leakyrelu after EVERY layer
        h = acc if li == len(params) - 1 else acc.astype(jnp.bfloat16)
    return jnp.tanh(h)


if __name__ == "__main__":
    key = jax.random.PRNGKey(0)
    k_params, k_data, k_cond, k_color = jax.random.split(key, 4)

    OUT_LAYER = 32     # small config for the synthetic test
    BATCH = 2

    params = init_generator_params(k_params, OUT_LAYER)
    prepared = prepare_params(params)          # one-time pad + bf16 cast

    data = jax.random.normal(k_data, (BATCH, 100), jnp.float32)            # noise
    condition = jax.random.randint(k_cond, (BATCH, 2), 0, 2).astype(jnp.int32)
    color = jax.random.uniform(k_color, (BATCH, 2), jnp.float32)

    out = generator_forward(data, condition, color, prepared)
    out = jax.block_until_ready(out)

    ref = generator_ref(data, condition, color, params)
    assert out.shape == (BATCH, 784 * 3), out.shape
    assert bool(jnp.all(jnp.isfinite(out))), "non-finite output"
    # bf16 matmul inputs => loosened tolerance vs the pure-JAX reference
    assert jnp.allclose(out, ref, atol=1e-2, rtol=1e-2), "mismatch vs reference"

    print("KERNEL_OK")
</pallas_src>

<mosaic_0001>
module attributes {stable_mosaic.version = 11 : i64} {
  func.func @_generator_kernel(%arg0: i32, %arg1: memref<16x128xbf16, #tpu.memory_space<vmem>>, %arg2: memref<128x128xbf16, #tpu.memory_space<vmem>>, %arg3: memref<1x128xf32, #tpu.memory_space<vmem>>, %arg4: memref<128x128xbf16, #tpu.memory_space<vmem>>, %arg5: memref<1x128xf32, #tpu.memory_space<vmem>>, %arg6: memref<128x128xbf16, #tpu.memory_space<vmem>>, %arg7: memref<1x128xf32, #tpu.memory_space<vmem>>, %arg8: memref<128x256xbf16, #tpu.memory_space<vmem>>, %arg9: memref<1x256xf32, #tpu.memory_space<vmem>>, %arg10: memref<256x512xbf16, #tpu.memory_space<vmem>>, %arg11: memref<1x512xf32, #tpu.memory_space<vmem>>, %arg12: memref<512x2432xbf16, #tpu.memory_space<vmem>>, %arg13: memref<1x2432xf32, #tpu.memory_space<vmem>>, %arg14: memref<16x2432xf32, #tpu.memory_space<vmem>>) attributes {dimension_semantics = [#tpu.dimension_semantics<parallel>], iteration_bounds = array<i64: 1>, scalar_prefetch = 0 : i64, scratch_operands = 0 : i64, tpu.core_type = #tpu.core_type<tc>, window_params = [{transform_indices = @transform_0, window_bounds = array<i64: 16, 128>}, {pipeline_mode = #tpu.pipeline_mode<synchronous>, transform_indices = @transform_1, window_bounds = array<i64: 128, 128>}, {pipeline_mode = #tpu.pipeline_mode<synchronous>, transform_indices = @transform_2, window_bounds = array<i64: 1, 128>}, {pipeline_mode = #tpu.pipeline_mode<synchronous>, transform_indices = @transform_3, window_bounds = array<i64: 128, 128>}, {pipeline_mode = #tpu.pipeline_mode<synchronous>, transform_indices = @transform_4, window_bounds = array<i64: 1, 128>}, {pipeline_mode = #tpu.pipeline_mode<synchronous>, transform_indices = @transform_5, window_bounds = array<i64: 128, 128>}, {pipeline_mode = #tpu.pipeline_mode<synchronous>, transform_indices = @transform_6, window_bounds = array<i64: 1, 128>}, {pipeline_mode = #tpu.pipeline_mode<synchronous>, transform_indices = @transform_7, window_bounds = array<i64: 128, 256>}, {pipeline_mode = #tpu.pipeline_mode<synchronous>, transform_indices = @transform_8, window_bounds = array<i64: 1, 256>}, {pipeline_mode = #tpu.pipeline_mode<synchronous>, transform_indices = @transform_9, window_bounds = array<i64: 256, 512>}, {pipeline_mode = #tpu.pipeline_mode<synchronous>, transform_indices = @transform_10, window_bounds = array<i64: 1, 512>}, {pipeline_mode = #tpu.pipeline_mode<synchronous>, transform_indices = @transform_11, window_bounds = array<i64: 512, 2432>}, {pipeline_mode = #tpu.pipeline_mode<synchronous>, transform_indices = @transform_12, window_bounds = array<i64: 1, 2432>}, {transform_indices = @transform_13, window_bounds = array<i64: 16, 2432>}]} {
    %c0 = arith.constant 0 : index
    %c0_0 = arith.constant 0 : index
    %0 = vector.load %arg1[%c0, %c0_0] : memref<16x128xbf16, #tpu.memory_space<vmem>>, vector<16x128xbf16>
    %c0_1 = arith.constant 0 : index
    %c0_2 = arith.constant 0 : index
    %1 = vector.load %arg2[%c0_1, %c0_2] : memref<128x128xbf16, #tpu.memory_space<vmem>>, vector<128x128xbf16>
    %cst = arith.constant dense<0.000000e+00> : vector<16x128xf32>
    %2 = tpu.matmul %0, %1, %cst {dimension_numbers = #tpu.dot_dimension_numbers<[1], [0], [0], [1], [0, 0, 1, 1], [], []>} : vector<16x128xbf16>, vector<128x128xbf16>, vector<16x128xf32> -> vector<16x128xf32>
    %c0_3 = arith.constant 0 : index
    %c0_4 = arith.constant 0 : index
    %3 = vector.load %arg3[%c0_3, %c0_4] : memref<1x128xf32, #tpu.memory_space<vmem>>, vector<1x128xf32>
    %4 = vector.broadcast %3 : vector<1x128xf32> to vector<16x128xf32>
    %5 = arith.addf %2, %4 : vector<16x128xf32>
    %cst_5 = arith.constant 0.000000e+00 : f32
    %6 = vector.broadcast %cst_5 : f32 to vector<16x128xf32>
    %7 = arith.cmpf ogt, %5, %6 : vector<16x128xf32>
    %cst_6 = arith.constant 2.000000e-01 : f32
    %8 = vector.broadcast %cst_6 : f32 to vector<16x128xf32>
    %9 = arith.mulf %8, %5 : vector<16x128xf32>
    %10 = arith.select %7, %5, %9 : vector<16x128xi1>, vector<16x128xf32>
    %11 = arith.truncf %10 : vector<16x128xf32> to vector<16x128xbf16>
    %c0_7 = arith.constant 0 : index
    %c0_8 = arith.constant 0 : index
    %12 = vector.load %arg4[%c0_7, %c0_8] : memref<128x128xbf16, #tpu.memory_space<vmem>>, vector<128x128xbf16>
    %cst_9 = arith.constant dense<0.000000e+00> : vector<16x128xf32>
    %13 = tpu.matmul %11, %12, %cst_9 {dimension_numbers = #tpu.dot_dimension_numbers<[1], [0], [0], [1], [0, 0, 1, 1], [], []>} : vector<16x128xbf16>, vector<128x128xbf16>, vector<16x128xf32> -> vector<16x128xf32>
    %c0_10 = arith.constant 0 : index
    %c0_11 = arith.constant 0 : index
    %14 = vector.load %arg5[%c0_10, %c0_11] : memref<1x128xf32, #tpu.memory_space<vmem>>, vector<1x128xf32>
    %15 = vector.broadcast %14 : vector<1x128xf32> to vector<16x128xf32>
    %16 = arith.addf %13, %15 : vector<16x128xf32>
    %cst_12 = arith.constant 0.000000e+00 : f32
    %17 = vector.broadcast %cst_12 : f32 to vector<16x128xf32>
    %18 = arith.cmpf ogt, %16, %17 : vector<16x128xf32>
    %cst_13 = arith.constant 2.000000e-01 : f32
    %19 = vector.broadcast %cst_13 : f32 to vector<16x128xf32>
    %20 = arith.mulf %19, %16 : vector<16x128xf32>
    %21 = arith.select %18, %16, %20 : vector<16x128xi1>, vector<16x128xf32>
    %22 = arith.truncf %21 : vector<16x128xf32> to vector<16x128xbf16>
    %c0_14 = arith.constant 0 : index
    %c0_15 = arith.constant 0 : index
    %23 = vector.load %arg6[%c0_14, %c0_15] : memref<128x128xbf16, #tpu.memory_space<vmem>>, vector<128x128xbf16>
    %cst_16 = arith.constant dense<0.000000e+00> : vector<16x128xf32>
    %24 = tpu.matmul %22, %23, %cst_16 {dimension_numbers = #tpu.dot_dimension_numbers<[1], [0], [0], [1], [0, 0, 1, 1], [], []>} : vector<16x128xbf16>, vector<128x128xbf16>, vector<16x128xf32> -> vector<16x128xf32>
    %c0_17 = arith.constant 0 : index
    %c0_18 = arith.constant 0 : index
    %25 = vector.load %arg7[%c0_17, %c0_18] : memref<1x128xf32, #tpu.memory_space<vmem>>, vector<1x128xf32>
    %26 = vector.broadcast %25 : vector<1x128xf32> to vector<16x128xf32>
    %27 = arith.addf %24, %26 : vector<16x128xf32>
    %cst_19 = arith.constant 0.000000e+00 : f32
    %28 = vector.broadcast %cst_19 : f32 to vector<16x128xf32>
    %29 = arith.cmpf ogt, %27, %28 : vector<16x128xf32>
    %cst_20 = arith.constant 2.000000e-01 : f32
    %30 = vector.broadcast %cst_20 : f32 to vector<16x128xf32>
    %31 = arith.mulf %30, %27 : vector<16x128xf32>
    %32 = arith.select %29, %27, %31 : vector<16x128xi1>, vector<16x128xf32>
    %33 = arith.truncf %32 : vector<16x128xf32> to vector<16x128xbf16>
    %c0_21 = arith.constant 0 : index
    %c0_22 = arith.constant 0 : index
    %34 = vector.load %arg8[%c0_21, %c0_22] : memref<128x256xbf16, #tpu.memory_space<vmem>>, vector<128x256xbf16>
    %cst_23 = arith.constant dense<0.000000e+00> : vector<16x256xf32>
    %35 = tpu.matmul %33, %34, %cst_23 {dimension_numbers = #tpu.dot_dimension_numbers<[1], [0], [0], [1], [0, 0, 1, 1], [], []>} : vector<16x128xbf16>, vector<128x256xbf16>, vector<16x256xf32> -> vector<16x256xf32>
    %c0_24 = arith.constant 0 : index
    %c0_25 = arith.constant 0 : index
    %36 = vector.load %arg9[%c0_24, %c0_25] : memref<1x256xf32, #tpu.memory_space<vmem>>, vector<1x256xf32>
    %37 = vector.broadcast %36 : vector<1x256xf32> to vector<16x256xf32>
    %38 = arith.addf %35, %37 : vector<16x256xf32>
    %cst_26 = arith.constant 0.000000e+00 : f32
    %39 = vector.broadcast %cst_26 : f32 to vector<16x256xf32>
    %40 = arith.cmpf ogt, %38, %39 : vector<16x256xf32>
    %cst_27 = arith.constant 2.000000e-01 : f32
    %41 = vector.broadcast %cst_27 : f32 to vector<16x256xf32>
    %42 = arith.mulf %41, %38 : vector<16x256xf32>
    %43 = arith.select %40, %38, %42 : vector<16x256xi1>, vector<16x256xf32>
    %44 = arith.truncf %43 : vector<16x256xf32> to vector<16x256xbf16>
    %c0_28 = arith.constant 0 : index
    %c0_29 = arith.constant 0 : index
    %45 = vector.load %arg10[%c0_28, %c0_29] : memref<256x512xbf16, #tpu.memory_space<vmem>>, vector<256x512xbf16>
    %cst_30 = arith.constant dense<0.000000e+00> : vector<16x512xf32>
    %46 = tpu.matmul %44, %45, %cst_30 {dimension_numbers = #tpu.dot_dimension_numbers<[1], [0], [0], [1], [0, 0, 1, 1], [], []>} : vector<16x256xbf16>, vector<256x512xbf16>, vector<16x512xf32> -> vector<16x512xf32>
    %c0_31 = arith.constant 0 : index
    %c0_32 = arith.constant 0 : index
    %47 = vector.load %arg11[%c0_31, %c0_32] : memref<1x512xf32, #tpu.memory_space<vmem>>, vector<1x512xf32>
    %48 = vector.broadcast %47 : vector<1x512xf32> to vector<16x512xf32>
    %49 = arith.addf %46, %48 : vector<16x512xf32>
    %cst_33 = arith.constant 0.000000e+00 : f32
    %50 = vector.broadcast %cst_33 : f32 to vector<16x512xf32>
    %51 = arith.cmpf ogt, %49, %50 : vector<16x512xf32>
    %cst_34 = arith.constant 2.000000e-01 : f32
    %52 = vector.broadcast %cst_34 : f32 to vector<16x512xf32>
    %53 = arith.mulf %52, %49 : vector<16x512xf32>
    %54 = arith.select %51, %49, %53 : vector<16x512xi1>, vector<16x512xf32>
    %55 = arith.truncf %54 : vector<16x512xf32> to vector<16x512xbf16>
    %c0_35 = arith.constant 0 : index
    %c0_36 = arith.constant 0 : index
    %56 = vector.load %arg12[%c0_35, %c0_36] : memref<512x2432xbf16, #tpu.memory_space<vmem>>, vector<512x2432xbf16>
    %cst_37 = arith.constant dense<0.000000e+00> : vector<16x2432xf32>
    %57 = tpu.matmul %55, %56, %cst_37 {dimension_numbers = #tpu.dot_dimension_numbers<[1], [0], [0], [1], [0, 0, 1, 1], [], []>} : vector<16x512xbf16>, vector<512x2432xbf16>, vector<16x2432xf32> -> vector<16x2432xf32>
    %c0_38 = arith.constant 0 : index
    %c0_39 = arith.constant 0 : index
    %58 = vector.load %arg13[%c0_38, %c0_39] : memref<1x2432xf32, #tpu.memory_space<vmem>>, vector<1x2432xf32>
    %59 = vector.broadcast %58 : vector<1x2432xf32> to vector<16x2432xf32>
    %60 = arith.addf %57, %59 : vector<16x2432xf32>
    %cst_40 = arith.constant 0.000000e+00 : f32
    %61 = vector.broadcast %cst_40 : f32 to vector<16x2432xf32>
    %62 = arith.cmpf ogt, %60, %61 : vector<16x2432xf32>
    %cst_41 = arith.constant 2.000000e-01 : f32
    %63 = vector.broadcast %cst_41 : f32 to vector<16x2432xf32>
    %64 = arith.mulf %63, %60 : vector<16x2432xf32>
    %65 = arith.select %62, %60, %64 : vector<16x2432xi1>, vector<16x2432xf32>
    %66 = math.tanh %65 : vector<16x2432xf32>
    %c0_42 = arith.constant 0 : index
    %c0_43 = arith.constant 0 : index
    %67 = vector.load %arg14[%c0_42, %c0_43] : memref<16x2432xf32, #tpu.memory_space<vmem>>, vector<16x2432xf32>
    tpu.vector_store %arg14[%c0_42, %c0_43], %66 {strides = array<i32>} : memref<16x2432xf32, #tpu.memory_space<vmem>>, vector<16x2432xf32>,
    return
  }
  func.func @transform_0(%arg0: i32) -> (i32, i32) {
    %c0_i32 = arith.constant 0 : i32
    %c0_i32_0 = arith.constant 0 : i32
    return %arg0, %c0_i32 : i32, i32
  }
  func.func @transform_1(%arg0: i32) -> (i32, i32) {
    %c0_i32 = arith.constant 0 : i32
    %c0_i32_0 = arith.constant 0 : i32
    %c0_i32_1 = arith.constant 0 : i32
    return %c0_i32, %c0_i32_0 : i32, i32
  }
  func.func @transform_2(%arg0: i32) -> (i32, i32) {
    %c0_i32 = arith.constant 0 : i32
    %c0_i32_0 = arith.constant 0 : i32
    %c0_i32_1 = arith.constant 0 : i32
    return %c0_i32, %c0_i32_0 : i32, i32
  }
  func.func @transform_3(%arg0: i32) -> (i32, i32) {
    %c0_i32 = arith.constant 0 : i32
    %c0_i32_0 = arith.constant 0 : i32
    %c0_i32_1 = arith.constant 0 : i32
    return %c0_i32, %c0_i32_0 : i32, i32
  }
  func.func @transform_4(%arg0: i32) -> (i32, i32) {
    %c0_i32 = arith.constant 0 : i32
    %c0_i32_0 = arith.constant 0 : i32
    %c0_i32_1 = arith.constant 0 : i32
    return %c0_i32, %c0_i32_0 : i32, i32
  }
  func.func @transform_5(%arg0: i32) -> (i32, i32) {
    %c0_i32 = arith.constant 0 : i32
    %c0_i32_0 = arith.constant 0 : i32
    %c0_i32_1 = arith.constant 0 : i32
    return %c0_i32, %c0_i32_0 : i32, i32
  }
  func.func @transform_6(%arg0: i32) -> (i32, i32) {
    %c0_i32 = arith.constant 0 : i32
    %c0_i32_0 = arith.constant 0 : i32
    %c0_i32_1 = arith.constant 0 : i32
    return %c0_i32, %c0_i32_0 : i32, i32
  }
  func.func @transform_7(%arg0: i32) -> (i32, i32) {
    %c0_i32 = arith.constant 0 : i32
    %c0_i32_0 = arith.constant 0 : i32
    %c0_i32_1 = arith.constant 0 : i32
    return %c0_i32, %c0_i32_0 : i32, i32
  }
  func.func @transform_8(%arg0: i32) -> (i32, i32) {
    %c0_i32 = arith.constant 0 : i32
    %c0_i32_0 = arith.constant 0 : i32
    %c0_i32_1 = arith.constant 0 : i32
    return %c0_i32, %c0_i32_0 : i32, i32
  }
  func.func @transform_9(%arg0: i32) -> (i32, i32) {
    %c0_i32 = arith.constant 0 : i32
    %c0_i32_0 = arith.constant 0 : i32
    %c0_i32_1 = arith.constant 0 : i32
    return %c0_i32, %c0_i32_0 : i32, i32
  }
  func.func @transform_10(%arg0: i32) -> (i32, i32) {
    %c0_i32 = arith.constant 0 : i32
    %c0_i32_0 = arith.constant 0 : i32
    %c0_i32_1 = arith.constant 0 : i32
    return %c0_i32, %c0_i32_0 : i32, i32
  }
  func.func @transform_11(%arg0: i32) -> (i32, i32) {
    %c0_i32 = arith.constant 0 : i32
    %c0_i32_0 = arith.constant 0 : i32
    %c0_i32_1 = arith.constant 0 : i32
    return %c0_i32, %c0_i32_0 : i32, i32
  }
  func.func @transform_12(%arg0: i32) -> (i32, i32) {
    %c0_i32 = arith.constant 0 : i32
    %c0_i32_0 = arith.constant 0 : i32
    %c0_i32_1 = arith.constant 0 : i32
    return %c0_i32, %c0_i32_0 : i32, i32
  }
  func.func @transform_13(%arg0: i32) -> (i32, i32) {
    %c0_i32 = arith.constant 0 : i32
    %c0_i32_0 = arith.constant 0 : i32
    return %arg0, %c0_i32 : i32, i32
  }
}

</mosaic_0001>

<bundles_post_ra>
// kernel: tpu_custom_call.1
= control target key start
LH: loop header
LB: loop body
LE: loop exit
PB: predicated region body
PF: predicated region fallthrough
CT: control target
= control target key end

     0   :  { %18 = vsyncpa [#allocation3], 0  ;;  %s8976_s0 = inlined_call_operand.hbm [shape: bf16[16,128], index: 0, kind: input, shape index: {}]   ;;  %s8977_s1 = inlined_call_operand.hbm [shape: bf16[128,128], index: 1, kind: input, shape index: {}]   ;;  %s8978_s2 = inlined_call_operand.hbm [shape: f32[1,128], index: 2, kind: input, shape index: {}]   ;;  %s8979_s3 = inlined_call_operand.hbm [shape: bf16[128,128], index: 3, kind: input, shape index: {}]   ;;  %s8980_s4 = inlined_call_operand.hbm [shape: f32[1,128], index: 4, kind: input, shape index: {}]   ;;  %s8981_s5 = inlined_call_operand.hbm [shape: bf16[128,128], index: 5, kind: input, shape index: {}]   ;;  %s8982_s6 = inlined_call_operand.hbm [shape: f32[1,128], index: 6, kind: input, shape index: {}]   ;;  %s8983_s7 = inlined_call_operand.hbm [shape: bf16[128,256], index: 7, kind: input, shape index: {}]   ;;  %s8984_s8 = inlined_call_operand.hbm [shape: f32[1,256], index: 8, kind: input, shape index: {}]   ;;  %s8985_s9 = inlined_call_operand.hbm [shape: bf16[256,512], index: 9, kind: input, shape index: {}]   ;;  %s8986_s10 = inlined_call_operand.hbm [shape: f32[1,512], index: 10, kind: input, shape index: {}]   ;;  %s8987_s11 = inlined_call_operand.hbm [shape: bf16[512,2432], index: 11, kind: input, shape index: {}]   ;;  %s8988_s12 = inlined_call_operand.hbm [shape: f32[1,2432], index: 12, kind: input, shape index: {}]   ;;  %s8989_s13 = inlined_call_operand.hbm [shape: f32[16,2432], index: 13, kind: output, shape index: {}]  }
   0x1   :  { %19 = vsyncpa [#allocation6], 0 }
   0x2   :  { %20 = vsyncpa [#allocation9], 0 }
   0x3   :  { %21 = vsyncpa [#allocation12], 0 }
   0x4   :  { %22 = vsyncpa [#allocation15], 0 }
   0x5   :  { %23 = vsyncpa [#allocation18], 0 }
   0x6   :  { %24 = vsyncpa [#allocation21], 0 }
   0x7   :  { %25 = vsyncpa [#allocation4], 0  ;;  %s8529_s25 = smov [#allocation5]   ;;  %s8530_s27 = smov [#allocation8]  }
   0x8   :  { %s43_s26 = sshll.u32 %s8529_s25, 4  ;;  %s65_s28 = sshll.u32 %s8530_s27, 4  ;;  %s44_s26 = int_to_ptr.vmem [resolvable:$true] %s43_s26  ;;  %s8626_s28 = int_to_ptr.vmem [resolvable:$true] %s65_s28 }
   0x9   :  { %s8205_s14 = scalar_lea.hbm %s8977_s1, 1024 }
   0xa   :  { %p8206_p0 = scmp.ne.s32.totalorder %s8977_s1, %s8205_s14  ;;  %p8209_p1 = scmp.lt.u32.totalorder %s8205_s14, %s8977_s1 }
   0xc   :  { %p8211_p2 = pnand %p8209_p1, %p8206_p0 }
   0xe   :  { %8214 = shalt.err (!%p8211_p2)
}
   0xf   :  { %s8215_s19 = scalar_lea.vmem %s44_s26, 1024  ;;  %p8220_p4 = scmp.lt.s32.totalorder %s44_s26, %s44_s26 }
  0x10   :  { %p8216_p3 = scmp.ne.s32.totalorder %s44_s26, %s8215_s19  ;;  %p8221_p5 = scmp.lt.s32.totalorder %s8215_s19, %s8215_s19 }
  0x12   :  { %p8222_p6 = por %p8221_p5, %p8220_p4 }
  0x14   :  { %p8223_p7 = pnand %p8222_p6, %p8216_p3 }
  0x16   :  { %8226 = shalt.err (!%p8223_p7)
}
  0x17   :  { %s8531_s20 = smov 64   ;;  %s8532_s21 = smov 4  }
  0x18   :  { %49 = dma.hbm_to_vmem [thread:$0]  %s8977_s1, 1024, %s44_s26, [#allocation6], %s8531_s20, %s8531_s20, %s8532_s21  }
  0x19   :  { %s8227_s27 = scalar_lea.hbm %s8979_s3, 1024 }
  0x1a   :  { %p8228_p8 = scmp.ne.s32.totalorder %s8979_s3, %s8227_s27  ;;  %p8231_p9 = scmp.lt.u32.totalorder %s8227_s27, %s8979_s3 }
  0x1c   :  { %p8233_p10 = pnand %p8231_p9, %p8228_p8 }
  0x1e   :  { %8236 = shalt.err (!%p8233_p10)
}
  0x1f   :  { %s8237_s16 = scalar_lea.vmem %s8626_s28, 1024  ;;  %p8242_p12 = scmp.lt.s32.totalorder %s8626_s28, %s8626_s28 }
  0x20   :  { %p8238_p11 = scmp.ne.s32.totalorder %s8626_s28, %s8237_s16  ;;  %p8243_p13 = scmp.lt.s32.totalorder %s8237_s16, %s8237_s16 }
  0x22   :  { %p8244_p0 = por %p8243_p13, %p8242_p12 }
  0x24   :  { %p8245_p1 = pnand %p8244_p0, %p8238_p11 }
  0x26   :  { %8248 = shalt.err (!%p8245_p1)
}
  0x27   :  { %71 = dma.hbm_to_vmem [thread:$0]  %s8979_s3, 1024, %s8626_s28, [#allocation9], %s8531_s20, %s8531_s20, %s8532_s21  }
  0x28   :  { %s8533_s17 = smov [#allocation11]   ;;  %s8534_s19 = smov [#allocation14]  }
  0x29   :  { %s87_s18 = sshll.u32 %s8533_s17, 4  ;;  %s109_s22 = sshll.u32 %s8534_s19, 4  ;;  %s88_s18 = int_to_ptr.vmem [resolvable:$true] %s87_s18  ;;  %s8663_s22 = int_to_ptr.vmem [resolvable:$true] %s109_s22 }
  0x2a   :  { %s8249_s25 = scalar_lea.hbm %s8981_s5, 1024 }
  0x2b   :  { %p8250_p2 = scmp.ne.s32.totalorder %s8981_s5, %s8249_s25  ;;  %p8253_p3 = scmp.lt.u32.totalorder %s8249_s25, %s8981_s5 }
  0x2d   :  { %p8255_p4 = pnand %p8253_p3, %p8250_p2 }
  0x2f   :  { %8258 = shalt.err (!%p8255_p4)
}
  0x30   :  { %s8259_s3 = scalar_lea.vmem %s88_s18, 1024  ;;  %p8264_p6 = scmp.lt.s32.totalorder %s88_s18, %s88_s18 }
  0x31   :  { %p8260_p5 = scmp.ne.s32.totalorder %s88_s18, %s8259_s3  ;;  %p8265_p7 = scmp.lt.s32.totalorder %s8259_s3, %s8259_s3 }
  0x33   :  { %p8266_p8 = por %p8265_p7, %p8264_p6 }
  0x35   :  { %p8267_p9 = pnand %p8266_p8, %p8260_p5 }
  0x37   :  { %8270 = shalt.err (!%p8267_p9)
}
  0x38   :  { %93 = dma.hbm_to_vmem [thread:$0]  %s8981_s5, 1024, %s88_s18, [#allocation12], %s8531_s20, %s8531_s20, %s8532_s21  }
  0x39   :  { %s8271_s26 = scalar_lea.hbm %s8983_s7, 2048 }
  0x3a   :  { %p8272_p10 = scmp.ne.s32.totalorder %s8983_s7, %s8271_s26  ;;  %p8275_p11 = scmp.lt.u32.totalorder %s8271_s26, %s8983_s7 }
  0x3c   :  { %p8277_p12 = pnand %p8275_p11, %p8272_p10 }
  0x3e   :  { %8280 = shalt.err (!%p8277_p12)
}
  0x3f   :  { %s8281_s25 = scalar_lea.vmem %s8663_s22, 2048  ;;  %p8286_p0 = scmp.lt.s32.totalorder %s8663_s22, %s8663_s22 }
  0x40   :  { %p8282_p13 = scmp.ne.s32.totalorder %s8663_s22, %s8281_s25  ;;  %p8287_p1 = scmp.lt.s32.totalorder %s8281_s25, %s8281_s25 }
  0x42   :  { %p8288_p2 = por %p8287_p1, %p8286_p0 }
  0x44   :  { %p8289_p3 = pnand %p8288_p2, %p8282_p13 }
  0x46   :  { %8292 = shalt.err (!%p8289_p3)
}
  0x47   :  { %s8535_s5 = smov 128   ;;  %s8536_s18 = smov 8  }
  0x48   :  { %115 = dma.hbm_to_vmem [thread:$0]  %s8983_s7, 2048, %s8663_s22, [#allocation15], %s8535_s5, %s8535_s5, %s8536_s18  }
  0x49   :  { %s8537_s30 = smov [#allocation17]   ;;  %s8293_s15 = scalar_lea.hbm %s8985_s9, 8192 }
  0x4a   :  { %s131_s14 = sshll.u32 %s8537_s30, 4  ;;  %p8294_p4 = scmp.ne.s32.totalorder %s8985_s9, %s8293_s15  ;;  %s132_s14 = int_to_ptr.vmem [resolvable:$true] %s131_s14 }
  0x4b   :  { %p8297_p5 = scmp.lt.u32.totalorder %s8293_s15, %s8985_s9 }
  0x4d   :  { %p8299_p6 = pnand %p8297_p5, %p8294_p4 }
  0x4f   :  { %8302 = shalt.err (!%p8299_p6)
}
  0x50   :  { %s8303_s19 = scalar_lea.vmem %s132_s14, 8192  ;;  %p8308_p8 = scmp.lt.s32.totalorder %s132_s14, %s132_s14 }
  0x51   :  { %p8304_p7 = scmp.ne.s32.totalorder %s132_s14, %s8303_s19  ;;  %p8309_p9 = scmp.lt.s32.totalorder %s8303_s19, %s8303_s19 }
  0x53   :  { %p8310_p10 = por %p8309_p9, %p8308_p8 }
  0x55   :  { %p8311_p11 = pnand %p8310_p10, %p8304_p7 }
  0x57   :  { %8314 = shalt.err (!%p8311_p11)
}
  0x58   :  { %s8538_s7 = smov 256   ;;  %s8539_s22 = smov 16  }
  0x59   :  { %137 = dma.hbm_to_vmem [thread:$0]  %s8985_s9, 8192, %s132_s14, [#allocation18], %s8538_s7, %s8538_s7, %s8539_s22  }
  0x5a   :  { %s8540_s25 = smov [#allocation20]   ;;  %s8315_s29 = scalar_lea.hbm %s8987_s11, 77824 }
  0x5b   :  { %s153_s5 = sshll.u32 %s8540_s25, 4  ;;  %p8316_p12 = scmp.ne.s32.totalorder %s8987_s11, %s8315_s29  ;;  %s154_s5 = int_to_ptr.vmem [resolvable:$true] %s153_s5 }
  0x5c   :  { %p8319_p13 = scmp.lt.u32.totalorder %s8315_s29, %s8987_s11 }
  0x5e   :  { %p8321_p0 = pnand %p8319_p13, %p8316_p12 }
  0x60   :  { %8324 = shalt.err (!%p8321_p0)
}
  0x61   :  { %s8325_s16 = scalar_lea.vmem %s154_s5, 77824  ;;  %p8330_p2 = scmp.lt.s32.totalorder %s154_s5, %s154_s5 }
  0x62   :  { %p8326_p1 = scmp.ne.s32.totalorder %s154_s5, %s8325_s16  ;;  %p8331_p3 = scmp.lt.s32.totalorder %s8325_s16, %s8325_s16 }
  0x64   :  { %p8332_p4 = por %p8331_p3, %p8330_p2 }
  0x66   :  { %p8333_p5 = pnand %p8332_p4, %p8326_p1 }
  0x68   :  { %8336 = shalt.err (!%p8333_p5)
}
  0x69   :  { %s8541_s9 = smov 1216   ;;  %s8542_s14 = smov 76  }
  0x6a   :  { %159 = dma.hbm_to_vmem [thread:$0]  %s8987_s11, 77824, %s154_s5, [#allocation21], %s8541_s9, %s8541_s9, %s8542_s14  }
  0x6b   :  { %s8543_s17 = smov [#allocation2]   ;;  %s8544_s7 = smov [#allocation7]  }
  0x6c   :  { %s31_s19 = sshll.u32 %s8543_s17, 4  ;;  %s56_s22 = sshll.u32 %s8544_s7, 4  ;;  %s32_s19 = int_to_ptr.vmem [resolvable:$true] %s31_s19  ;;  %s57_s22 = int_to_ptr.vmem [resolvable:$true] %s56_s22 }
  0x6d   :  { %s8337_s25 = scalar_lea.hbm %s8976_s0, 128 }
  0x6e   :  { %p8338_p6 = scmp.ne.s32.totalorder %s8976_s0, %s8337_s25  ;;  %p8341_p7 = scmp.lt.u32.totalorder %s8337_s25, %s8976_s0 }
  0x70   :  { %p8343_p8 = pnand %p8341_p7, %p8338_p6 }
  0x72   :  { %8346 = shalt.err (!%p8343_p8)
}
  0x73   :  { %s8347_s11 = scalar_lea.vmem %s32_s19, 128  ;;  %p8352_p10 = scmp.lt.s32.totalorder %s32_s19, %s32_s19 }
  0x74   :  { %p8348_p9 = scmp.ne.s32.totalorder %s32_s19, %s8347_s11  ;;  %p8353_p11 = scmp.lt.s32.totalorder %s8347_s11, %s8347_s11 }
  0x76   :  { %p8354_p12 = por %p8353_p11, %p8352_p10 }
  0x78   :  { %p8355_p13 = pnand %p8354_p12, %p8348_p9 }
  0x7a   :  { %8358 = shalt.err (!%p8355_p13)
}
  0x7b   :  { %37 = dma.hbm_to_vmem [thread:$0]  %s8976_s0, 128, %s32_s19, [#allocation3], %s8531_s20, %s8531_s20, %s8532_s21  }
  0x7c   :  { %s8359_s16 = scalar_lea.hbm %s8978_s2, 16 }
  0x7d   :  { %p8360_p0 = scmp.ne.s32.totalorder %s8978_s2, %s8359_s16  ;;  %p8363_p1 = scmp.lt.u32.totalorder %s8359_s16, %s8978_s2 }
  0x7f   :  { %p8365_p2 = pnand %p8363_p1, %p8360_p0 }
  0x81   :  { %8368 = shalt.err (!%p8365_p2)
}
  0x82   :  { %s8369_s17 = scalar_lea.vmem %s57_s22, 16  ;;  %s8373_s7 = scalar_lea.vmem %s57_s22, 32 }
  0x83   :  { %p8370_p3 = scmp.ne.s32.totalorder %s57_s22, %s8369_s17  ;;  %p8374_p4 = scmp.lt.s32.totalorder %s57_s22, %s57_s22 }
  0x84   :  { %p8375_p5 = scmp.lt.s32.totalorder %s8373_s7, %s8369_s17 }
  0x86   :  { %p8376_p6 = por %p8375_p5, %p8374_p4 }
  0x88   :  { %p8377_p7 = pnand %p8376_p6, %p8370_p3 }
  0x8a   :  { %8380 = shalt.err (!%p8377_p7)
}
  0x8b   :  { %59 = dma.hbm_to_vmem [thread:$0]  %s8978_s2, 16, %s57_s22, [#allocation6]  }
  0x8c   :  { %s8545_s21 = smov [#allocation10]   ;;  %s8546_s23 = smov [#allocation13]  }
  0x8d   :  { %s78_s19 = sshll.u32 %s8545_s21, 4  ;;  %s100_s24 = sshll.u32 %s8546_s23, 4  ;;  %s79_s19 = int_to_ptr.vmem [resolvable:$true] %s78_s19  ;;  %s101_s24 = int_to_ptr.vmem [resolvable:$true] %s100_s24 }
  0x8e   :  { %s8381_s27 = scalar_lea.hbm %s8980_s4, 16 }
  0x8f   :  { %p8382_p8 = scmp.ne.s32.totalorder %s8980_s4, %s8381_s27  ;;  %p8385_p9 = scmp.lt.u32.totalorder %s8381_s27, %s8980_s4 }
  0x91   :  { %p8387_p10 = pnand %p8385_p9, %p8382_p8 }
  0x93   :  { %8390 = shalt.err (!%p8387_p10)
}
  0x94   :  { %s8391_s2 = scalar_lea.vmem %s79_s19, 16  ;;  %s8395_s22 = scalar_lea.vmem %s79_s19, 32 }
  0x95   :  { %p8392_p11 = scmp.ne.s32.totalorder %s79_s19, %s8391_s2  ;;  %p8396_p12 = scmp.lt.s32.totalorder %s79_s19, %s79_s19 }
  0x96   :  { %p8397_p13 = scmp.lt.s32.totalorder %s8395_s22, %s8391_s2 }
  0x98   :  { %p8398_p0 = por %p8397_p13, %p8396_p12 }
  0x9a   :  { %p8399_p1 = pnand %p8398_p0, %p8392_p11 }
  0x9c   :  { %8402 = shalt.err (!%p8399_p1)
}
  0x9d   :  { %81 = dma.hbm_to_vmem [thread:$0]  %s8980_s4, 16, %s79_s19, [#allocation9]  }
  0x9e   :  { %s8403_s9 = scalar_lea.hbm %s8982_s6, 16 }
  0x9f   :  { %p8404_p2 = scmp.ne.s32.totalorder %s8982_s6, %s8403_s9  ;;  %p8407_p3 = scmp.lt.u32.totalorder %s8403_s9, %s8982_s6 }
  0xa1   :  { %p8409_p4 = pnand %p8407_p3, %p8404_p2 }
  0xa3   :  { %8412 = shalt.err (!%p8409_p4)
}
  0xa4   :  { %s8413_s7 = scalar_lea.vmem %s101_s24, 16  ;;  %s8417_s0 = scalar_lea.vmem %s101_s24, 32 }
  0xa5   :  { %p8414_p5 = scmp.ne.s32.totalorder %s101_s24, %s8413_s7  ;;  %p8418_p6 = scmp.lt.s32.totalorder %s101_s24, %s101_s24 }
  0xa6   :  { %p8419_p7 = scmp.lt.s32.totalorder %s8417_s0, %s8413_s7 }
  0xa8   :  { %p8420_p8 = por %p8419_p7, %p8418_p6 }
  0xaa   :  { %p8421_p9 = pnand %p8420_p8, %p8414_p5 }
  0xac   :  { %8424 = shalt.err (!%p8421_p9)
}
  0xad   :  { %103 = dma.hbm_to_vmem [thread:$0]  %s8982_s6, 16, %s101_s24, [#allocation12]  }
  0xae   :  { %s8547_s21 = smov [#allocation16]   ;;  %s8548_s23 = smov [#allocation19]  }
  0xaf   :  { %s122_s19 = sshll.u32 %s8547_s21, 4  ;;  %s144_s25 = sshll.u32 %s8548_s23, 4  ;;  %s123_s19 = int_to_ptr.vmem [resolvable:$true] %s122_s19  ;;  %s145_s25 = int_to_ptr.vmem [resolvable:$true] %s144_s25 }
  0xb0   :  { %s8425_s29 = scalar_lea.hbm %s8984_s8, 32 }
  0xb1   :  { %p8426_p10 = scmp.ne.s32.totalorder %s8984_s8, %s8425_s29  ;;  %p8429_p11 = scmp.lt.u32.totalorder %s8425_s29, %s8984_s8 }
  0xb3   :  { %p8431_p12 = pnand %p8429_p11, %p8426_p10 }
  0xb5   :  { %8434 = shalt.err (!%p8431_p12)
}
  0xb6   :  { %s8435_s6 = scalar_lea.vmem %s123_s19, 32  ;;  %p8440_p0 = scmp.lt.s32.totalorder %s123_s19, %s123_s19 }
  0xb7   :  { %p8436_p13 = scmp.ne.s32.totalorder %s123_s19, %s8435_s6  ;;  %p8441_p1 = scmp.lt.s32.totalorder %s8435_s6, %s8435_s6 }
  0xb9   :  { %p8442_p2 = por %p8441_p1, %p8440_p0 }
  0xbb   :  { %p8443_p3 = pnand %p8442_p2, %p8436_p13 }
  0xbd   :  { %8446 = shalt.err (!%p8443_p3)
}
  0xbe   :  { %125 = dma.hbm_to_vmem [thread:$0]  %s8984_s8, 32, %s123_s19, [#allocation15]  }
  0xbf   :  { %s8447_s15 = scalar_lea.hbm %s8986_s10, 64 }
  0xc0   :  { %p8448_p4 = scmp.ne.s32.totalorder %s8986_s10, %s8447_s15  ;;  %p8451_p5 = scmp.lt.u32.totalorder %s8447_s15, %s8986_s10 }
  0xc2   :  { %p8453_p6 = pnand %p8451_p5, %p8448_p4 }
  0xc4   :  { %8456 = shalt.err (!%p8453_p6)
}
  0xc5   :  { %s8457_s26 = scalar_lea.vmem %s145_s25, 64  ;;  %p8462_p8 = scmp.lt.s32.totalorder %s145_s25, %s145_s25 }
  0xc6   :  { %p8458_p7 = scmp.ne.s32.totalorder %s145_s25, %s8457_s26  ;;  %p8463_p9 = scmp.lt.s32.totalorder %s8457_s26, %s8457_s26 }
  0xc8   :  { %p8464_p10 = por %p8463_p9, %p8462_p8 }
  0xca   :  { %p8465_p11 = pnand %p8464_p10, %p8458_p7 }
  0xcc   :  { %8468 = shalt.err (!%p8465_p11)
}
  0xcd   :  { %147 = dma.hbm_to_vmem [thread:$0]  %s8986_s10, 64, %s145_s25, [#allocation18]  }
  0xce   :  { %s8549_s7 = smov [#allocation22]   ;;  %s8469_s21 = scalar_lea.hbm %s8988_s12, 304 }
  0xcf   :  { %s166_s0 = sshll.u32 %s8549_s7, 4  ;;  %p8470_p12 = scmp.ne.s32.totalorder %s8988_s12, %s8469_s21  ;;  %s167_s0 = int_to_ptr.vmem [resolvable:$true] %s166_s0 }
  0xd0   :  { %p8473_p13 = scmp.lt.u32.totalorder %s8469_s21, %s8988_s12 }
  0xd2   :  { %p8475_p0 = pnand %p8473_p13, %p8470_p12 }
  0xd4   :  { %8478 = shalt.err (!%p8475_p0)
}
  0xd5   :  { %s8479_s29 = scalar_lea.vmem %s167_s0, 304  ;;  %s8483_s10 = scalar_lea.vmem %s167_s0, 320 }
  0xd6   :  { %p8480_p1 = scmp.ne.s32.totalorder %s167_s0, %s8479_s29  ;;  %p8484_p2 = scmp.lt.s32.totalorder %s167_s0, %s167_s0 }
  0xd7   :  { %p8485_p3 = scmp.lt.s32.totalorder %s8483_s10, %s8479_s29 }
  0xd9   :  { %p8486_p4 = por %p8485_p3, %p8484_p2 }
  0xdb   :  { %p8487_p5 = pnand %p8486_p4, %p8480_p1 }
  0xdd   :  { %8490 = shalt.err (!%p8487_p5)
}
  0xde   :  { %169 = dma.hbm_to_vmem [thread:$0]  %s8988_s12, 304, %s167_s0, [#allocation21]  }
  0xdf   :  { %8513 = dma.done.wait [#allocation3], 128  }
  0xe0   :  { %8514 = vsyncadd [#allocation3], 4294967168 }
  0xe1   :  { %8515 = dma.done.wait [#allocation6], 1040  }
  0xe2   :  { %8516 = vsyncadd [#allocation6], 4294966256 }
  0xe3   :  { %8517 = dma.done.wait [#allocation9], 1040  }
  0xe4   :  { %8518 = vsyncadd [#allocation9], 4294966256 }
  0xe5   :  { %8519 = dma.done.wait [#allocation12], 1040  }
  0xe6   :  { %8520 = vsyncadd [#allocation12], 4294966256 }
  0xe7   :  { %8521 = dma.done.wait [#allocation15], 2080  }
  0xe8   :  { %8522 = vsyncadd [#allocation15], 4294965216 }
  0xe9   :  { %8523 = dma.done.wait [#allocation18], 8256  }
  0xea   :  { %8524 = vsyncadd [#allocation18], 4294959040 }
  0xeb   :  { %8525 = dma.done.wait [#allocation21], 78128  }
  0xec   :  { %8526 = vsyncadd [#allocation21], 4294889168  ;;  %v8550_v0 = vmov 0.0   ;;  %vm8551_vm0 = vmmov 0   ;;  %v7088_v1 = vld [vmem:[#allocation5] sm:$0xff]   ;;  %v7089_v2 = vld [vmem:[#allocation5 + $0x8] sm:$0xff]  }
  0xed   :  { %6929 = vmatprep.subr.bf16.mxu1 %v8550_v0  ;;  %6945 = vmatprep.mubr.msk.bf16.mxu1 %vm8551_vm0, %v8550_v0  ;;  %v7090_v3 = vld [vmem:[#allocation5 + $0x10] sm:$0xff]   ;;  %v7091_v4 = vld [vmem:[#allocation5 + $0x18] sm:$0xff]   ;;  %v7092_v5 = vld [vmem:[#allocation5 + $0x20] sm:$0xff]   ;;  %s8553_s12 = smov [#allocation23]  }
  0xee   :  { %6969 = vmatprep.subr.bf16.mxu0 %v8550_v0  ;;  %6985 = vmatprep.mubr.msk.bf16.mxu0 %vm8551_vm0, %v8550_v0  ;;  %v7093_v6 = vld [vmem:[#allocation5 + $0x28] sm:$0xff]   ;;  %v7094_v7 = vld [vmem:[#allocation5 + $0x30] sm:$0xff]   ;;  %v7095_v8 = vld [vmem:[#allocation5 + $0x38] sm:$0xff]   ;;  %s6124_s11 = sshll.u32 %s8553_s12, 4  ;;  %s6125_s11 = int_to_ptr.vmem [resolvable:$true] %s6124_s11 }
  0xef   :  { %6930 = vmatpush3.bf16.msra.mxu1 %v7088_v1  ;;  %v7096_v9 = vld [vmem:[#allocation2] sm:$0xff]   ;;  %v7097_v10 = vld [vmem:[#allocation8] sm:$0xff]   ;;  %v7098_v11 = vld [vmem:[#allocation8 + $0x8] sm:$0xff]   ;;  %s8491_s5 = scalar_lea.vmem %s6125_s11, 4864  ;;  %p8496_p7 = scmp.lt.s32.totalorder %s6125_s11, %s6125_s11 }
  0xf0   :  { %6931 = vmatprep.subr.bf16.mxu1 %v8550_v0  ;;  %v7099_v12 = vld [vmem:[#allocation8 + $0x10] sm:$0xff]   ;;  %v7100_v13 = vld [vmem:[#allocation8 + $0x18] sm:$0xff]   ;;  %v7101_v14 = vld [vmem:[#allocation8 + $0x20] sm:$0xff]   ;;  %p8492_p6 = scmp.ne.s32.totalorder %s6125_s11, %s8491_s5  ;;  %p8497_p8 = scmp.lt.s32.totalorder %s8491_s5, %s8491_s5 }
  0xf1   :  { %v7102_v15 = vld [vmem:[#allocation8 + $0x28] sm:$0xff]   ;;  %v7103_v16 = vld [vmem:[#allocation8 + $0x30] sm:$0xff]   ;;  %v7104_v17 = vld [vmem:[#allocation8 + $0x38] sm:$0xff]  }
  0xf2   :  { %v7105_v18 = vld [vmem:[#allocation11] sm:$0xff]   ;;  %v7106_v19 = vld [vmem:[#allocation11 + $0x8] sm:$0xff]   ;;  %v7107_v20 = vld [vmem:[#allocation11 + $0x10] sm:$0xff]   ;;  %p8498_p9 = por %p8497_p8, %p8496_p7 }
  0xf3   :  { %6932 = vmatpush3.bf16.msra.mxu1 %v7089_v2  ;;  %6970 = vmatpush3.bf16.msra.mxu0 %v7105_v18  ;;  %v7108_v21 = vld [vmem:[#allocation11 + $0x18] sm:$0xff]   ;;  %v7109_v22 = vld [vmem:[#allocation11 + $0x20] sm:$0xff]   ;;  %v7110_v23 = vld [vmem:[#allocation11 + $0x28] sm:$0xff]   ;;  %v8552_v2 = vmov 0  }
  0xf4   :  { %6933 = vmatprep.subr.bf16.mxu1 %v8550_v0  ;;  %6971 = vmatprep.subr.bf16.mxu0 %v8550_v0  ;;  %v6142_v24 = vld [vmem:[#allocation7] ss:$0 sm:$0xff]  ;;  %v7111_v36 = vld [vmem:[#allocation11 + $0x30] sm:$0xff]   ;;  %v7113_v38 = vld [vmem:[#allocation14] ss:$8 sps:$4 sm:$0xff]   ;;  %p8499_p10 = pnand %p8498_p9, %p8492_p6 }
  0xf5   :  { %v7112_v37 = vld [vmem:[#allocation11 + $0x38] sm:$0xff]   ;;  %v7115_v39 = vld [vmem:[#allocation14 + $0x4] ss:$8 sps:$4 sm:$0xff]   ;;  %v7119_v43 = vld [vmem:[#allocation14 + $0x20] ss:$8 sps:$4 sm:$0xff]  }
  0xf6   :  { %v7118_v40 = vld [vmem:[#allocation14 + $0x14] ss:$8 sps:$4 sm:$0xff]   ;;  %v7116_v41 = vld [vmem:[#allocation14 + $0x10] ss:$8 sps:$4 sm:$0xff]   ;;  %v7121_v42 = vld [vmem:[#allocation14 + $0x24] ss:$8 sps:$4 sm:$0xff]  }
  0xf7   :  { %6934 = vmatpush3.bf16.msra.mxu1 %v7090_v3  ;;  %6972 = vmatpush3.bf16.msra.mxu0 %v7106_v19  ;;  %v7124_v44 = vld [vmem:[#allocation14 + $0x34] ss:$8 sps:$4 sm:$0xff]   ;;  %v7122_v45 = vld [vmem:[#allocation14 + $0x30] ss:$8 sps:$4 sm:$0xff]   ;;  %v7127_v46 = vld [vmem:[#allocation14 + $0x44] ss:$8 sps:$4 sm:$0xff]  }
  0xf8   :  { %6935 = vmatprep.subr.bf16.mxu1 %v8550_v0  ;;  %6973 = vmatprep.subr.bf16.mxu0 %v8550_v0  ;;  %v7125_v47 = vld [vmem:[#allocation14 + $0x40] ss:$8 sps:$4 sm:$0xff]   ;;  %v7130_v48 = vld [vmem:[#allocation14 + $0x54] ss:$8 sps:$4 sm:$0xff]   ;;  %v7128_v49 = vld [vmem:[#allocation14 + $0x50] ss:$8 sps:$4 sm:$0xff]  }
  0xf9   :  { %v6152_v50 = vld [vmem:[#allocation10] ss:$0 sm:$0xff]  ;;  %v7133_v62 = vld [vmem:[#allocation14 + $0x64] ss:$8 sps:$4 sm:$0xff]   ;;  %v7131_v63 = vld [vmem:[#allocation14 + $0x60] ss:$8 sps:$4 sm:$0xff]  }
  0xfa   :  { %v7134_v1 = vld [vmem:[#allocation14 + $0x70] ss:$8 sps:$4 sm:$0xff]  }
  0xfb   :  { %6936 = vmatpush3.bf16.msra.mxu1 %v7091_v4  ;;  %6974 = vmatpush3.bf16.msra.mxu0 %v7107_v20  ;;  %v7137_v3 = vld [vmem:[#allocation17] ss:$16 sps:$4 sm:$0xff]   ;;  %v7139_v4 = vld [vmem:[#allocation17 + $0x4] ss:$16 sps:$4 sm:$0xff]  }
  0xfc   :  { %6937 = vmatprep.subr.bf16.mxu1 %v8550_v0  ;;  %6975 = vmatprep.subr.bf16.mxu0 %v8550_v0  ;;  %v7181_v18 = vld [vmem:[#allocation17 + $0xe4] ss:$16 sps:$4 sm:$0xff]   ;;  %v7179_v19 = vld [vmem:[#allocation17 + $0xe0] ss:$16 sps:$4 sm:$0xff]  }
  0xfd   :  { %v7187_v20 = vld [vmem:[#allocation17 + $0x104] ss:$16 sps:$4 sm:$0xff]  }
  0xff   :  { %6938 = vmatpush3.bf16.msra.mxu1 %v7092_v5  ;;  %6976 = vmatpush3.bf16.msra.mxu0 %v7108_v21  ;;  %v7142_v5 = vld [vmem:[#allocation17 + $0xc] ss:$16 sps:$4 sm:$0xff]   ;;  %v7185_v21 = vld [vmem:[#allocation17 + $0x100] ss:$16 sps:$4 sm:$0xff]  }
 0x100   :  { %6939 = vmatprep.subr.bf16.mxu1 %v8550_v0  ;;  %6977 = vmatprep.subr.bf16.mxu0 %v8550_v0 }
 0x103   :  { %6940 = vmatpush3.bf16.msra.mxu1 %v7093_v6  ;;  %6978 = vmatpush3.bf16.msra.mxu0 %v7109_v22  ;;  %v7145_v6 = vld [vmem:[#allocation17 + $0x24] ss:$16 sps:$4 sm:$0xff]  }
 0x104   :  { %6941 = vmatprep.subr.bf16.mxu1 %v8550_v0  ;;  %6979 = vmatprep.subr.bf16.mxu0 %v8550_v0  ;;  %v7193_v22 = vld [vmem:[#allocation17 + $0x124] ss:$16 sps:$4 sm:$0xff]  }
 0x107   :  { %6942 = vmatpush3.bf16.msra.mxu1 %v7094_v7  ;;  %6980 = vmatpush3.bf16.msra.mxu0 %v7110_v23  ;;  %v7143_v7 = vld [vmem:[#allocation17 + $0x20] ss:$16 sps:$4 sm:$0xff]  }
 0x108   :  { %6943 = vmatprep.subr.bf16.mxu1 %v8550_v0  ;;  %6981 = vmatprep.subr.bf16.mxu0 %v8550_v0  ;;  %v7191_v23 = vld [vmem:[#allocation17 + $0x120] ss:$16 sps:$4 sm:$0xff]  }
 0x10b   :  { %6944 = vmatpush3.bf16.msra.mxu1 %v7095_v8  ;;  %6982 = vmatpush3.bf16.msra.mxu0 %v7111_v36  ;;  %v7151_v8 = vld [vmem:[#allocation17 + $0x44] ss:$16 sps:$4 sm:$0xff]  }
 0x10c   :  { %6949 = vmatprep.subr.bf16.mxu1 %v8550_v0  ;;  %6983 = vmatprep.subr.bf16.mxu0 %v8550_v0 }
 0x10e   :  { %6946 = vmatmul.mubr.bf16.vlgmr.msra.gmra.mrb[0].mxu1 %v7096_v9  ;;  %v7149_v9 = vld [vmem:[#allocation17 + $0x40] ss:$16 sps:$4 sm:$0xff]  }
 0x10f   :  { %6950 = vmatpush3.bf16.msra.mxu1 %v7097_v10  ;;  %6965 = vmatprep.mubr.msk.bf16.mxu1 %vm8551_vm0, %v8550_v0  ;;  %v7157_v10 = vld [vmem:[#allocation17 + $0x64] ss:$16 sps:$4 sm:$0xff]  }
 0x110   :  { %6951 = vmatprep.subr.bf16.mxu1 %v8550_v0  ;;  %6984 = vmatpush3.bf16.msra.mxu0 %v7112_v37 }
 0x111   :  { %1146 = vmatprep.subr.bf16.mxu0 %v7139_v4  ;;  %v7220_v4 = vld [vmem:[#allocation17 + $0x1ac] ss:$16 sps:$4 sm:$0xff]  }
 0x113   :  { %6952 = vmatpush3.bf16.msra.mxu1 %v7098_v11  ;;  %v7155_v11 = vld [vmem:[#allocation17 + $0x60] ss:$16 sps:$4 sm:$0xff]  }
 0x114   :  { %6953 = vmatprep.subr.bf16.mxu1 %v8550_v0 }
 0x117   :  { %6954 = vmatpush3.bf16.msra.mxu1 %v7099_v12  ;;  %v7163_v12 = vld [vmem:[#allocation17 + $0x84] ss:$16 sps:$4 sm:$0xff]  }
 0x118   :  { %6955 = vmatprep.subr.bf16.mxu1 %v8550_v0 }
 0x11b   :  { %6956 = vmatpush3.bf16.msra.mxu1 %v7100_v13  ;;  %v7161_v13 = vld [vmem:[#allocation17 + $0x80] ss:$16 sps:$4 sm:$0xff]  }
 0x11c   :  { %6957 = vmatprep.subr.bf16.mxu1 %v8550_v0 }
 0x11f   :  { %6958 = vmatpush3.bf16.msra.mxu1 %v7101_v14  ;;  %v7169_v14 = vld [vmem:[#allocation17 + $0xa4] ss:$16 sps:$4 sm:$0xff]  }
 0x120   :  { %6959 = vmatprep.subr.bf16.mxu1 %v8550_v0 }
 0x123   :  { %6960 = vmatpush3.bf16.msra.mxu1 %v7102_v15  ;;  %v7167_v15 = vld [vmem:[#allocation17 + $0xa0] ss:$16 sps:$4 sm:$0xff]  }
 0x124   :  { %6961 = vmatprep.subr.bf16.mxu1 %v8550_v0 }
 0x127   :  { %6962 = vmatpush3.bf16.msra.mxu1 %v7103_v16  ;;  %v7175_v16 = vld [vmem:[#allocation17 + $0xc4] ss:$16 sps:$4 sm:$0xff]  }
 0x128   :  { %6963 = vmatprep.subr.bf16.mxu1 %v8550_v0  ;;  %v7136_v0 = vld [vmem:[#allocation14 + $0x74] ss:$8 sps:$4 sm:$0xff]  }
 0x12b   :  { %6964 = vmatpush3.bf16.msra.mxu1 %v7104_v17  ;;  %v7173_v17 = vld [vmem:[#allocation17 + $0xc0] ss:$16 sps:$4 sm:$0xff]  }
 0x12c   :  { %683 = vmatprep.subr.bf16.mxu1 %v7115_v39 }
 0x1e1   :  { %v323_v25 = vpop.f32.mrb[0].mxu1 }
 0x1e2   :  { %v324_v26 = vadd.f32 %v6142_v24, %v323_v25  ;;  %v6947_v27 = vpop.f32.mrb[1].mxu1  ;;  %v7197_v25 = vld [vmem:[#allocation17 + $0x140] ss:$16 sps:$4 sm:$0xff]  }
 0x1e3   :  { %v326_v28 = vpop.f32.mrb[2].mxu1  ;;  %v7203_v27 = vld [vmem:[#allocation17 + $0x160] ss:$16 sps:$4 sm:$0xff]  }
 0x1e4   :  { %vm330_vm1 = vcmp.gt.f32.partialorder %v324_v26, 0.0  ;;  %v332_v29 = vmul.f32 0.2, %v324_v26  ;;  %v327_v30 = vadd.f32 %v6142_v24, %v326_v28  ;;  %v6948_v31 = vpop.f32.mrb[3].mxu1  ;;  %v7199_v24 = vld [vmem:[#allocation17 + $0x144] ss:$16 sps:$4 sm:$0xff]  }
 0x1e5   :  { %v7211_v28 = vld [vmem:[#allocation17 + $0x184] ss:$16 sps:$4 sm:$0xff]  }
 0x1e6   :  { %vm331_vm2 = vcmp.gt.f32.partialorder %v327_v30, 0.0  ;;  %v333_v32 = vmul.f32 0.2, %v327_v30  ;;  %v334_v33 = vsel %vm330_vm1, %v324_v26, %v332_v29  ;;  %v7205_v26 = vld [vmem:[#allocation17 + $0x164] ss:$16 sps:$4 sm:$0xff]  }
 0x1e7   :  { %v7209_v29 = vld [vmem:[#allocation17 + $0x180] ss:$16 sps:$4 sm:$0xff]  }
 0x1e8   :  { %v335_v34 = vsel %vm331_vm2, %v327_v30, %v333_v32  ;;  %v6161_v30 = vld [vmem:[#allocation13] ss:$0 sm:$0xff] }
 0x1e9   :  { %v336_v35 = vpack.c.bf16 %v335_v34, %v334_v33 }
 0x1eb   :  { %6966 = vmatmul.mubr.bf16.vlgmr.msra.gmra.mrb[4].mxu1 %v336_v35 }
 0x1ec   :  { %684 = vmatpush1.bf16.msra.mxu1 %v7113_v38  ;;  %715 = vmatprep.mubr.bf16.mxu1 %v8552_v2  ;;  %v7212_v2 = vld [vmem:[#allocation17 + $0x188] ss:$16 sps:$4 sm:$0xff]  }
 0x1ed   :  { %685 = vmatprep.subr.bf16.mxu1 %v7118_v40 }
 0x1f0   :  { %686 = vmatpush1.bf16.msra.mxu1 %v7116_v41  ;;  %v7140_v41 = vld [vmem:[#allocation17 + $0x8] ss:$16 sps:$4 sm:$0xff]  }
 0x1f1   :  { %687 = vmatprep.subr.bf16.mxu1 %v7121_v42 }
 0x1f4   :  { %688 = vmatpush1.bf16.msra.mxu1 %v7119_v43  ;;  %v7148_v43 = vld [vmem:[#allocation17 + $0x2c] ss:$16 sps:$4 sm:$0xff]  }
 0x1f5   :  { %689 = vmatprep.subr.bf16.mxu1 %v7124_v44  ;;  %v7146_v44 = vld [vmem:[#allocation17 + $0x28] ss:$16 sps:$4 sm:$0xff]  }
 0x1f8   :  { %690 = vmatpush1.bf16.msra.mxu1 %v7122_v45  ;;  %v7154_v45 = vld [vmem:[#allocation17 + $0x4c] ss:$16 sps:$4 sm:$0xff]  }
 0x1f9   :  { %691 = vmatprep.subr.bf16.mxu1 %v7127_v46  ;;  %v7152_v46 = vld [vmem:[#allocation17 + $0x48] ss:$16 sps:$4 sm:$0xff]  }
 0x1fc   :  { %692 = vmatpush1.bf16.msra.mxu1 %v7125_v47  ;;  %v7160_v47 = vld [vmem:[#allocation17 + $0x6c] ss:$16 sps:$4 sm:$0xff]  }
 0x1fd   :  { %693 = vmatprep.subr.bf16.mxu1 %v7130_v48  ;;  %v7158_v48 = vld [vmem:[#allocation17 + $0x68] ss:$16 sps:$4 sm:$0xff]  }
 0x200   :  { %694 = vmatpush1.bf16.msra.mxu1 %v7128_v49  ;;  %v7166_v49 = vld [vmem:[#allocation17 + $0x8c] ss:$16 sps:$4 sm:$0xff]  }
 0x201   :  { %695 = vmatprep.subr.bf16.mxu1 %v7133_v62  ;;  %v7200_v62 = vld [vmem:[#allocation17 + $0x148] ss:$16 sps:$4 sm:$0xff]  }
 0x204   :  { %696 = vmatpush1.bf16.msra.mxu1 %v7131_v63  ;;  %v7208_v63 = vld [vmem:[#allocation17 + $0x16c] ss:$16 sps:$4 sm:$0xff]  }
 0x205   :  { %697 = vmatprep.subr.bf16.mxu1 %v7136_v0  ;;  %v7206_v0 = vld [vmem:[#allocation17 + $0x168] ss:$16 sps:$4 sm:$0xff]  }
 0x208   :  { %698 = vmatpush1.bf16.msra.mxu1 %v7134_v1  ;;  %v7214_v1 = vld [vmem:[#allocation17 + $0x18c] ss:$16 sps:$4 sm:$0xff]  }
 0x209   :  { %1189 = vmatprep.subr.bf16.mxu1 %v7142_v5  ;;  %v7215_v5 = vld [vmem:[#allocation17 + $0x1a0] ss:$16 sps:$4 sm:$0xff]  }
 0x2be   :  { %v442_v51 = vpop.f32.mrb[4].mxu1 }
 0x2bf   :  { %v443_v52 = vadd.f32 %v6152_v50, %v442_v51  ;;  %v6967_v53 = vpop.f32.mrb[5].mxu1  ;;  %v7172_v51 = vld [vmem:[#allocation17 + $0xac] ss:$16 sps:$4 sm:$0xff]  }
 0x2c0   :  { %v445_v54 = vpop.f32.mrb[6].mxu1  ;;  %v7178_v53 = vld [vmem:[#allocation17 + $0xcc] ss:$16 sps:$4 sm:$0xff]  }
 0x2c1   :  { %v451_v55 = vmul.f32 0.2, %v443_v52  ;;  %v446_v56 = vadd.f32 %v6152_v50, %v445_v54  ;;  %v6968_v57 = vpop.f32.mrb[7].mxu1  ;;  %vm449_vm3 = vcmp.gt.f32.partialorder %v443_v52, 0.0  ;;  %v7164_v50 = vld [vmem:[#allocation17 + $0x88] ss:$16 sps:$4 sm:$0xff]  }
 0x2c2   :  { %v7176_v54 = vld [vmem:[#allocation17 + $0xc8] ss:$16 sps:$4 sm:$0xff]   ;;  %v7190_v57 = vld [vmem:[#allocation17 + $0x10c] ss:$16 sps:$4 sm:$0xff]  }
 0x2c3   :  { %vm450_vm4 = vcmp.gt.f32.partialorder %v446_v56, 0.0  ;;  %v452_v58 = vmul.f32 0.2, %v446_v56  ;;  %v453_v59 = vsel %vm449_vm3, %v443_v52, %v451_v55  ;;  %v7170_v52 = vld [vmem:[#allocation17 + $0xa8] ss:$16 sps:$4 sm:$0xff]  }
 0x2c4   :  { %v7184_v55 = vld [vmem:[#allocation17 + $0xec] ss:$16 sps:$4 sm:$0xff]  }
 0x2c5   :  { %v454_v60 = vsel %vm450_vm4, %v446_v56, %v452_v58  ;;  %v7182_v56 = vld [vmem:[#allocation17 + $0xe8] ss:$16 sps:$4 sm:$0xff]  }
 0x2c6   :  { %v455_v61 = vpack.c.bf16 %v454_v60, %v453_v59  ;;  %v7188_v58 = vld [vmem:[#allocation17 + $0x108] ss:$16 sps:$4 sm:$0xff]   ;;  %v7196_v59 = vld [vmem:[#allocation17 + $0x12c] ss:$16 sps:$4 sm:$0xff]  }
 0x2c7   :  { %v7194_v60 = vld [vmem:[#allocation17 + $0x128] ss:$16 sps:$4 sm:$0xff]  }
 0x2c8   :  { %6986 = vmatmul.mubr.bf16.vlgmr.msra.gmra.mrb[0].mxu0 %v455_v61  ;;  %v7202_v61 = vld [vmem:[#allocation17 + $0x14c] ss:$16 sps:$4 sm:$0xff]  }
 0x2c9   :  { %1147 = vmatpush1.bf16.msra.mxu0 %v7137_v3  ;;  %v7217_v3 = vld [vmem:[#allocation17 + $0x1a4] ss:$16 sps:$4 sm:$0xff]  }
 0x2ca   :  { %1148 = vmatprep.subr.bf16.mxu0 %v7145_v6  ;;  %v7218_v6 = vld [vmem:[#allocation17 + $0x1a8] ss:$16 sps:$4 sm:$0xff]  }
 0x2cd   :  { %1149 = vmatpush1.bf16.msra.mxu0 %v7143_v7  ;;  %v7223_v7 = vld [vmem:[#allocation17 + $0x1c4] ss:$16 sps:$4 sm:$0xff]  }
 0x2ce   :  { %1150 = vmatprep.subr.bf16.mxu0 %v7151_v8  ;;  %v7226_v8 = vld [vmem:[#allocation17 + $0x1cc] ss:$16 sps:$4 sm:$0xff]  }
 0x2d1   :  { %1151 = vmatpush1.bf16.msra.mxu0 %v7149_v9  ;;  %v7221_v9 = vld [vmem:[#allocation17 + $0x1c0] ss:$16 sps:$4 sm:$0xff]  }
 0x2d2   :  { %1152 = vmatprep.subr.bf16.mxu0 %v7157_v10  ;;  %v7224_v10 = vld [vmem:[#allocation17 + $0x1c8] ss:$16 sps:$4 sm:$0xff]  }
 0x2d5   :  { %1153 = vmatpush1.bf16.msra.mxu0 %v7155_v11  ;;  %v7229_v11 = vld [vmem:[#allocation17 + $0x1e4] ss:$16 sps:$4 sm:$0xff]  }
 0x2d6   :  { %1154 = vmatprep.subr.bf16.mxu0 %v7163_v12  ;;  %v7232_v12 = vld [vmem:[#allocation17 + $0x1ec] ss:$16 sps:$4 sm:$0xff]  }
 0x2d9   :  { %1155 = vmatpush1.bf16.msra.mxu0 %v7161_v13  ;;  %v7227_v13 = vld [vmem:[#allocation17 + $0x1e0] ss:$16 sps:$4 sm:$0xff]  }
 0x2da   :  { %1156 = vmatprep.subr.bf16.mxu0 %v7169_v14  ;;  %v7230_v14 = vld [vmem:[#allocation17 + $0x1e8] ss:$16 sps:$4 sm:$0xff]  }
 0x2dd   :  { %1157 = vmatpush1.bf16.msra.mxu0 %v7167_v15  ;;  %v7235_v15 = vld [vmem:[#allocation20 + $0x4] ss:$76 sps:$4 sm:$0xff]  }
 0x2de   :  { %1158 = vmatprep.subr.bf16.mxu0 %v7175_v16  ;;  %v7238_v16 = vld [vmem:[#allocation20 + $0xc] ss:$76 sps:$4 sm:$0xff]  }
 0x2e1   :  { %1159 = vmatpush1.bf16.msra.mxu0 %v7173_v17  ;;  %v593_v17 = vlaneseq }
 0x2e2   :  { %1160 = vmatprep.subr.bf16.mxu0 %v7181_v18 }
 0x2e3   :  { %v8838_v18 = vshrl.u32 %v593_v17, 7  ;;  %v7298_v17 = vld [vmem:[#allocation20 + $0x5fc] ss:$76 sps:$4 sm:$0xff]  }
 0x2e5   :  { %1161 = vmatpush1.bf16.msra.mxu0 %v7179_v19  ;;  %v8841_v19 = vsub.s32 0, %v8838_v18 }
 0x2e6   :  { %1162 = vmatprep.subr.bf16.mxu0 %v7187_v20  ;;  %v591_v20 = vld [vmem:[#allocation16] sm:$0x3] }
 0x2e9   :  { %1163 = vmatpush1.bf16.msra.mxu0 %v7185_v21  ;;  %v8844_v21 = vsub.s32 1, %v8838_v18 }
 0x2ea   :  { %1164 = vmatprep.subr.bf16.mxu0 %v7193_v22  ;;  %v596_v22 = vrot.slane %v591_v20, %v8841_v19 }
 0x2ed   :  { %1165 = vmatpush1.bf16.msra.mxu0 %v7191_v23  ;;  %v600_v23 = vrot.slane %v591_v20, %v8844_v21  ;;  %v7293_v20 = vld [vmem:[#allocation20 + $0x5f0] ss:$76 sps:$4 sm:$0xff]  }
 0x2ee   :  { %1166 = vmatprep.subr.bf16.mxu0 %v7199_v24 }
 0x2f1   :  { %1167 = vmatpush1.bf16.msra.mxu0 %v7197_v25 }
 0x2f2   :  { %1168 = vmatprep.subr.bf16.mxu0 %v7205_v26 }
 0x2f5   :  { %1169 = vmatpush1.bf16.msra.mxu0 %v7203_v27 }
 0x2f6   :  { %1170 = vmatprep.subr.bf16.mxu0 %v7211_v28 }
 0x2f9   :  { %1171 = vmatpush1.bf16.msra.mxu0 %v7209_v29 }
 0x2fa   :  { %1172 = vmatprep.subr.bf16.mxu0 %v7217_v3  ;;  %v7272_v3 = vld [vmem:[#allocation20 + $0x398] ss:$76 sps:$4 sm:$0xff]  }
 0x2fd   :  { %1173 = vmatpush1.bf16.msra.mxu0 %v7215_v5  ;;  %v7280_v5 = vld [vmem:[#allocation20 + $0x434] ss:$76 sps:$4 sm:$0xff]  }
 0x2fe   :  { %1174 = vmatprep.subr.bf16.mxu0 %v7223_v7  ;;  %v7278_v7 = vld [vmem:[#allocation20 + $0x430] ss:$76 sps:$4 sm:$0xff]  }
 0x301   :  { %1175 = vmatpush1.bf16.msra.mxu0 %v7221_v9  ;;  %v7286_v9 = vld [vmem:[#allocation20 + $0x4cc] ss:$76 sps:$4 sm:$0xff]  }
 0x302   :  { %1176 = vmatprep.subr.bf16.mxu0 %v7229_v11  ;;  %v7284_v11 = vld [vmem:[#allocation20 + $0x4c8] ss:$76 sps:$4 sm:$0xff]  }
 0x305   :  { %1177 = vmatpush1.bf16.msra.mxu0 %v7227_v13  ;;  %v7292_v13 = vld [vmem:[#allocation20 + $0x564] ss:$76 sps:$4 sm:$0xff]  }
 0x306   :  { %5073 = vmatprep.subr.bf16.mxu0 %v7235_v15  ;;  %v7290_v15 = vld [vmem:[#allocation20 + $0x560] ss:$76 sps:$4 sm:$0xff]  }
 0x39b   :  { %v561_v31 = vpop.f32.mrb[0].mxu0 }
 0x39c   :  { %v562_v32 = vadd.f32 %v6161_v30, %v561_v31  ;;  %v6987_v33 = vpop.f32.mrb[1].mxu0 }
 0x39d   :  { %v564_v34 = vpop.f32.mrb[2].mxu0 }
 0x39e   :  { %v570_v35 = vmul.f32 0.2, %v562_v32  ;;  %v565_v36 = vadd.f32 %v6161_v30, %v564_v34  ;;  %v6988_v37 = vpop.f32.mrb[3].mxu0  ;;  %vm568_vm5 = vcmp.gt.f32.partialorder %v562_v32, 0.0 }
 0x3a0   :  { %vm569_vm6 = vcmp.gt.f32.partialorder %v565_v36, 0.0  ;;  %v571_v38 = vmul.f32 0.2, %v565_v36  ;;  %v572_v39 = vsel %vm568_vm5, %v562_v32, %v570_v35 }
 0x3a2   :  { %v573_v40 = vsel %vm569_vm6, %v565_v36, %v571_v38 }
 0x3a3   :  { %v574_v42 = vpack.c.bf16 %v573_v40, %v572_v39 }
 0x3a5   :  { %716 = vmatmul.mubr.bf16.vlgmr.msra.gmra.mrb[8].mxu1 %v574_v42  ;;  %v7233_v42 = vld [vmem:[#allocation20] ss:$76 sps:$4 sm:$0xff]  }
 0x3a6   :  { %1190 = vmatpush1.bf16.msra.mxu1 %v7140_v41 }
 0x3a7   :  { %1191 = vmatprep.subr.bf16.mxu1 %v7148_v43  ;;  %v7236_v43 = vld [vmem:[#allocation20 + $0x8] ss:$76 sps:$4 sm:$0xff]  }
 0x3aa   :  { %1192 = vmatpush1.bf16.msra.mxu1 %v7146_v44  ;;  %v7241_v44 = vld [vmem:[#allocation20 + $0x9c] ss:$76 sps:$4 sm:$0xff]  }
 0x3ab   :  { %1193 = vmatprep.subr.bf16.mxu1 %v7154_v45  ;;  %v7244_v45 = vld [vmem:[#allocation20 + $0xa4] ss:$76 sps:$4 sm:$0xff]  }
 0x3ae   :  { %1194 = vmatpush1.bf16.msra.mxu1 %v7152_v46  ;;  %v7239_v46 = vld [vmem:[#allocation20 + $0x98] ss:$76 sps:$4 sm:$0xff]  }
 0x3af   :  { %1195 = vmatprep.subr.bf16.mxu1 %v7160_v47  ;;  %v7242_v47 = vld [vmem:[#allocation20 + $0xa0] ss:$76 sps:$4 sm:$0xff]  }
 0x3b2   :  { %1196 = vmatpush1.bf16.msra.mxu1 %v7158_v48  ;;  %v7247_v48 = vld [vmem:[#allocation20 + $0x134] ss:$76 sps:$4 sm:$0xff]  }
 0x3b3   :  { %1197 = vmatprep.subr.bf16.mxu1 %v7166_v49  ;;  %v7250_v49 = vld [vmem:[#allocation20 + $0x13c] ss:$76 sps:$4 sm:$0xff]  }
 0x3b6   :  { %1198 = vmatpush1.bf16.msra.mxu1 %v7164_v50  ;;  %v7245_v50 = vld [vmem:[#allocation20 + $0x130] ss:$76 sps:$4 sm:$0xff]  }
 0x3b7   :  { %1199 = vmatprep.subr.bf16.mxu1 %v7172_v51  ;;  %v7248_v51 = vld [vmem:[#allocation20 + $0x138] ss:$76 sps:$4 sm:$0xff]  }
 0x3ba   :  { %1200 = vmatpush1.bf16.msra.mxu1 %v7170_v52  ;;  %v7253_v52 = vld [vmem:[#allocation20 + $0x1cc] ss:$76 sps:$4 sm:$0xff]  }
 0x3bb   :  { %1201 = vmatprep.subr.bf16.mxu1 %v7178_v53  ;;  %v7256_v53 = vld [vmem:[#allocation20 + $0x1d4] ss:$76 sps:$4 sm:$0xff]  }
 0x3be   :  { %1202 = vmatpush1.bf16.msra.mxu1 %v7176_v54  ;;  %v7251_v54 = vld [vmem:[#allocation20 + $0x1c8] ss:$76 sps:$4 sm:$0xff]  }
 0x3bf   :  { %1203 = vmatprep.subr.bf16.mxu1 %v7184_v55  ;;  %v7254_v55 = vld [vmem:[#allocation20 + $0x1d0] ss:$76 sps:$4 sm:$0xff]  }
 0x3c2   :  { %1204 = vmatpush1.bf16.msra.mxu1 %v7182_v56  ;;  %v7259_v56 = vld [vmem:[#allocation20 + $0x264] ss:$76 sps:$4 sm:$0xff]  }
 0x3c3   :  { %1205 = vmatprep.subr.bf16.mxu1 %v7190_v57  ;;  %v7262_v57 = vld [vmem:[#allocation20 + $0x26c] ss:$76 sps:$4 sm:$0xff]  }
 0x3c6   :  { %1206 = vmatpush1.bf16.msra.mxu1 %v7188_v58  ;;  %v7257_v58 = vld [vmem:[#allocation20 + $0x260] ss:$76 sps:$4 sm:$0xff]  }
 0x3c7   :  { %1207 = vmatprep.subr.bf16.mxu1 %v7196_v59  ;;  %v7260_v59 = vld [vmem:[#allocation20 + $0x268] ss:$76 sps:$4 sm:$0xff]  }
 0x3ca   :  { %1208 = vmatpush1.bf16.msra.mxu1 %v7194_v60  ;;  %v7265_v60 = vld [vmem:[#allocation20 + $0x2fc] ss:$76 sps:$4 sm:$0xff]  }
 0x3cb   :  { %1209 = vmatprep.subr.bf16.mxu1 %v7202_v61  ;;  %v7268_v61 = vld [vmem:[#allocation20 + $0x304] ss:$76 sps:$4 sm:$0xff]  }
 0x3ce   :  { %1210 = vmatpush1.bf16.msra.mxu1 %v7200_v62  ;;  %v7263_v62 = vld [vmem:[#allocation20 + $0x2f8] ss:$76 sps:$4 sm:$0xff]  }
 0x3cf   :  { %1211 = vmatprep.subr.bf16.mxu1 %v7208_v63  ;;  %v7266_v63 = vld [vmem:[#allocation20 + $0x300] ss:$76 sps:$4 sm:$0xff]  }
 0x3d2   :  { %1212 = vmatpush1.bf16.msra.mxu1 %v7206_v0  ;;  %v7271_v0 = vld [vmem:[#allocation20 + $0x394] ss:$76 sps:$4 sm:$0xff]  }
 0x3d3   :  { %1213 = vmatprep.subr.bf16.mxu1 %v7214_v1  ;;  %v7274_v1 = vld [vmem:[#allocation20 + $0x39c] ss:$76 sps:$4 sm:$0xff]  }
 0x3d6   :  { %1214 = vmatpush1.bf16.msra.mxu1 %v7212_v2  ;;  %v7269_v2 = vld [vmem:[#allocation20 + $0x390] ss:$76 sps:$4 sm:$0xff]  }
 0x3d7   :  { %1215 = vmatprep.subr.bf16.mxu1 %v7220_v4  ;;  %v7277_v4 = vld [vmem:[#allocation20 + $0x42c] ss:$76 sps:$4 sm:$0xff]  }
 0x3da   :  { %1216 = vmatpush1.bf16.msra.mxu1 %v7218_v6  ;;  %v7275_v6 = vld [vmem:[#allocation20 + $0x428] ss:$76 sps:$4 sm:$0xff]  }
 0x3db   :  { %1217 = vmatprep.subr.bf16.mxu1 %v7226_v8  ;;  %v7283_v8 = vld [vmem:[#allocation20 + $0x4c4] ss:$76 sps:$4 sm:$0xff]  }
 0x3de   :  { %1218 = vmatpush1.bf16.msra.mxu1 %v7224_v10  ;;  %v7281_v10 = vld [vmem:[#allocation20 + $0x4c0] ss:$76 sps:$4 sm:$0xff]  }
 0x3df   :  { %1219 = vmatprep.subr.bf16.mxu1 %v7232_v12  ;;  %v7289_v12 = vld [vmem:[#allocation20 + $0x55c] ss:$76 sps:$4 sm:$0xff]  }
 0x3e2   :  { %1220 = vmatpush1.bf16.msra.mxu1 %v7230_v14  ;;  %v7287_v14 = vld [vmem:[#allocation20 + $0x558] ss:$76 sps:$4 sm:$0xff]  }
 0x3e3   :  { %5159 = vmatprep.subr.bf16.mxu1 %v7238_v16  ;;  %v7295_v16 = vld [vmem:[#allocation20 + $0x5f4] ss:$76 sps:$4 sm:$0xff]  }
 0x478   :  { %v717_v24 = vpop.f32.mrb[8].mxu1 }
 0x479   :  { %v718_v25 = vadd.f32 %v717_v24, %v596_v22  ;;  %v719_v26 = vpop.f32.mrb[9].mxu1  ;;  %v7304_v24 = vld [vmem:[#allocation20 + $0x694] ss:$76 sps:$4 sm:$0xff]  }
 0x47a   :  { %v720_v27 = vadd.f32 %v719_v26, %v600_v23  ;;  %v721_v28 = vpop.f32.mrb[10].mxu1  ;;  %v7302_v26 = vld [vmem:[#allocation20 + $0x690] ss:$76 sps:$4 sm:$0xff]  }
 0x47b   :  { %v730_v29 = vmul.f32 0.2, %v718_v25  ;;  %v722_v30 = vadd.f32 %v721_v28, %v596_v22  ;;  %v723_v31 = vpop.f32.mrb[11].mxu1  ;;  %vm726_vm7 = vcmp.gt.f32.partialorder %v718_v25, 0.0  ;;  %v7296_v22 = vld [vmem:[#allocation20 + $0x5f8] ss:$76 sps:$4 sm:$0xff]  }
 0x47c   :  { %v731_v32 = vmul.f32 0.2, %v720_v27  ;;  %v724_v33 = vadd.f32 %v723_v31, %v600_v23  ;;  %vm727_vm8 = vcmp.gt.f32.partialorder %v720_v27, 0.0  ;;  %v7301_v23 = vld [vmem:[#allocation20 + $0x68c] ss:$76 sps:$4 sm:$0xff]  }
 0x47d   :  { %vm728_vm9 = vcmp.gt.f32.partialorder %v722_v30, 0.0  ;;  %v732_v34 = vmul.f32 0.2, %v722_v30  ;;  %v734_v36 = vsel %vm726_vm7, %v718_v25, %v730_v29  ;;  %v7299_v25 = vld [vmem:[#allocation20 + $0x688] ss:$76 sps:$4 sm:$0xff]  }
 0x47e   :  { %vm729_vm10 = vcmp.gt.f32.partialorder %v724_v33, 0.0  ;;  %v733_v35 = vmul.f32 0.2, %v724_v33  ;;  %v735_v39 = vsel %vm727_vm8, %v720_v27, %v731_v32  ;;  %v7307_v27 = vld [vmem:[#allocation20 + $0x724] ss:$76 sps:$4 sm:$0xff]  }
 0x47f   :  { %v736_v37 = vsel %vm728_vm9, %v722_v30, %v732_v34  ;;  %v7310_v28 = vld [vmem:[#allocation20 + $0x72c] ss:$76 sps:$4 sm:$0xff]   ;;  %v7308_v30 = vld [vmem:[#allocation20 + $0x728] ss:$76 sps:$4 sm:$0xff]   ;;  %v7316_v32 = vld [vmem:[#allocation20 + $0x7c4] ss:$76 sps:$4 sm:$0xff]  }
 0x480   :  { %v738_v38 = vpack.c.bf16 %v736_v37, %v734_v36  ;;  %v737_v40 = vsel %vm729_vm10, %v724_v33, %v733_v35  ;;  %v7305_v29 = vld [vmem:[#allocation20 + $0x720] ss:$76 sps:$4 sm:$0xff]   ;;  %v7313_v31 = vld [vmem:[#allocation20 + $0x7bc] ss:$76 sps:$4 sm:$0xff]   ;;  %v7311_v33 = vld [vmem:[#allocation20 + $0x7b8] ss:$76 sps:$4 sm:$0xff]  }
 0x481   :  { %v739_v41 = vpack.c.bf16 %v737_v40, %v735_v39  ;;  %v7314_v34 = vld [vmem:[#allocation20 + $0x7c0] ss:$76 sps:$4 sm:$0xff]   ;;  %v7322_v36 = vld [vmem:[#allocation20 + $0x85c] ss:$76 sps:$4 sm:$0xff]  }
 0x482   :  { %v7319_v35 = vld [vmem:[#allocation20 + $0x854] ss:$76 sps:$4 sm:$0xff]   ;;  %v7317_v37 = vld [vmem:[#allocation20 + $0x850] ss:$76 sps:$4 sm:$0xff]   ;;  %v7325_v39 = vld [vmem:[#allocation20 + $0x8ec] ss:$76 sps:$4 sm:$0xff]  }
 0x483   :  { %1178 = vmatprep.mubr.bf16.mxu0 %v739_v41  ;;  %1221 = vmatprep.mubr.bf16.mxu1 %v739_v41  ;;  %v7328_v40 = vld [vmem:[#allocation20 + $0x8f4] ss:$76 sps:$4 sm:$0xff]  }
 0x484   :  { %1179 = vmatmul.mubr.bf16.vlgmr.msra.gmra.mrb[4].mxu0 %v738_v38  ;;  %1222 = vmatmul.mubr.bf16.vlgmr.msra.gmra.mrb[12].mxu1 %v738_v38  ;;  %v7320_v38 = vld [vmem:[#allocation20 + $0x858] ss:$76 sps:$4 sm:$0xff]   ;;  %v7323_v41 = vld [vmem:[#allocation20 + $0x8e8] ss:$76 sps:$4 sm:$0xff]  }
 0x485   :  { %5074 = vmatpush1.bf16.msra.mxu0 %v7233_v42  ;;  %5160 = vmatpush1.bf16.msra.mxu1 %v7236_v43  ;;  %v7326_v42 = vld [vmem:[#allocation20 + $0x8f0] ss:$76 sps:$4 sm:$0xff]  }
 0x486   :  { %5075 = vmatprep.subr.bf16.mxu0 %v7241_v44  ;;  %5161 = vmatprep.subr.bf16.mxu1 %v7244_v45  ;;  %v7331_v43 = vld [vmem:[#allocation20 + $0x984] ss:$76 sps:$4 sm:$0xff]   ;;  %v7334_v44 = vld [vmem:[#allocation20 + $0x98c] ss:$76 sps:$4 sm:$0xff]   ;;  %v8849_v45 = vsub.s32 2, %v8838_v18 }
 0x489   :  { %5076 = vmatpush1.bf16.msra.mxu0 %v7239_v46  ;;  %5162 = vmatpush1.bf16.msra.mxu1 %v7242_v47  ;;  %v804_v46 = vld [vmem:[#allocation19] sm:$0xf]  ;;  %v8852_v47 = vsub.s32 3, %v8838_v18 }
 0x48a   :  { %5077 = vmatprep.subr.bf16.mxu0 %v7247_v48  ;;  %5163 = vmatprep.subr.bf16.mxu1 %v7250_v49  ;;  %v809_v48 = vrot.slane %v804_v46, %v8841_v19  ;;  %v817_v49 = vrot.slane %v804_v46, %v8849_v45 }
 0x48d   :  { %5078 = vmatpush1.bf16.msra.mxu0 %v7245_v50  ;;  %5164 = vmatpush1.bf16.msra.mxu1 %v7248_v51  ;;  %v813_v50 = vrot.slane %v804_v46, %v8844_v21  ;;  %v821_v51 = vrot.slane %v804_v46, %v8852_v47  ;;  %v7361_v46 = vld [vmem:[#allocation20 + $0xc7c] ss:$76 sps:$4 sm:$0xff]  }
 0x48e   :  { %5079 = vmatprep.subr.bf16.mxu0 %v7253_v52  ;;  %5165 = vmatprep.subr.bf16.mxu1 %v7256_v53 }
 0x491   :  { %5080 = vmatpush1.bf16.msra.mxu0 %v7251_v54  ;;  %5166 = vmatpush1.bf16.msra.mxu1 %v7254_v55 }
 0x492   :  { %5081 = vmatprep.subr.bf16.mxu0 %v7259_v56  ;;  %5167 = vmatprep.subr.bf16.mxu1 %v7262_v57 }
 0x495   :  { %5082 = vmatpush1.bf16.msra.mxu0 %v7257_v58  ;;  %5168 = vmatpush1.bf16.msra.mxu1 %v7260_v59 }
 0x496   :  { %5083 = vmatprep.subr.bf16.mxu0 %v7265_v60  ;;  %5169 = vmatprep.subr.bf16.mxu1 %v7268_v61 }
 0x499   :  { %5084 = vmatpush1.bf16.msra.mxu0 %v7263_v62  ;;  %5170 = vmatpush1.bf16.msra.mxu1 %v7266_v63 }
 0x49a   :  { %5085 = vmatprep.subr.bf16.mxu0 %v7271_v0  ;;  %5171 = vmatprep.subr.bf16.mxu1 %v7274_v1 }
 0x49d   :  { %5086 = vmatpush1.bf16.msra.mxu0 %v7269_v2  ;;  %5172 = vmatpush1.bf16.msra.mxu1 %v7272_v3 }
 0x49e   :  { %5087 = vmatprep.subr.bf16.mxu0 %v7277_v4  ;;  %5173 = vmatprep.subr.bf16.mxu1 %v7280_v5 }
 0x4a1   :  { %5088 = vmatpush1.bf16.msra.mxu0 %v7275_v6  ;;  %5174 = vmatpush1.bf16.msra.mxu1 %v7278_v7 }
 0x4a2   :  { %5089 = vmatprep.subr.bf16.mxu0 %v7283_v8  ;;  %5175 = vmatprep.subr.bf16.mxu1 %v7286_v9 }
 0x4a5   :  { %5090 = vmatpush1.bf16.msra.mxu0 %v7281_v10  ;;  %5176 = vmatpush1.bf16.msra.mxu1 %v7284_v11 }
 0x4a6   :  { %5091 = vmatprep.subr.bf16.mxu0 %v7289_v12  ;;  %5177 = vmatprep.subr.bf16.mxu1 %v7292_v13 }
 0x4a9   :  { %5092 = vmatpush1.bf16.msra.mxu0 %v7287_v14  ;;  %5178 = vmatpush1.bf16.msra.mxu1 %v7290_v15 }
 0x4aa   :  { %5093 = vmatprep.subr.bf16.mxu0 %v7295_v16  ;;  %5179 = vmatprep.subr.bf16.mxu1 %v7298_v17 }
 0x4ad   :  { %5094 = vmatpush1.bf16.msra.mxu0 %v7293_v20  ;;  %5180 = vmatpush1.bf16.msra.mxu1 %v7296_v22 }
 0x4ae   :  { %5095 = vmatprep.subr.bf16.mxu0 %v7301_v23  ;;  %5181 = vmatprep.subr.bf16.mxu1 %v7304_v24 }
 0x4b1   :  { %5096 = vmatpush1.bf16.msra.mxu0 %v7299_v25  ;;  %5182 = vmatpush1.bf16.msra.mxu1 %v7302_v26 }
 0x4b2   :  { %5097 = vmatprep.subr.bf16.mxu0 %v7307_v27  ;;  %5183 = vmatprep.subr.bf16.mxu1 %v7310_v28  ;;  %v7329_v27 = vld [vmem:[#allocation20 + $0x980] ss:$76 sps:$4 sm:$0xff]   ;;  %v7332_v28 = vld [vmem:[#allocation20 + $0x988] ss:$76 sps:$4 sm:$0xff]  }
 0x4b5   :  { %5098 = vmatpush1.bf16.msra.mxu0 %v7305_v29  ;;  %5184 = vmatpush1.bf16.msra.mxu1 %v7308_v30  ;;  %v7337_v29 = vld [vmem:[#allocation20 + $0xa1c] ss:$76 sps:$4 sm:$0xff]   ;;  %v7340_v30 = vld [vmem:[#allocation20 + $0xa24] ss:$76 sps:$4 sm:$0xff]  }
 0x4b6   :  { %5099 = vmatprep.subr.bf16.mxu0 %v7313_v31  ;;  %5185 = vmatprep.subr.bf16.mxu1 %v7316_v32  ;;  %v7335_v31 = vld [vmem:[#allocation20 + $0xa18] ss:$76 sps:$4 sm:$0xff]   ;;  %v7338_v32 = vld [vmem:[#allocation20 + $0xa20] ss:$76 sps:$4 sm:$0xff]  }
 0x4b9   :  { %5100 = vmatpush1.bf16.msra.mxu0 %v7311_v33  ;;  %5186 = vmatpush1.bf16.msra.mxu1 %v7314_v34  ;;  %v7343_v33 = vld [vmem:[#allocation20 + $0xab4] ss:$76 sps:$4 sm:$0xff]   ;;  %v7346_v34 = vld [vmem:[#allocation20 + $0xabc] ss:$76 sps:$4 sm:$0xff]  }
 0x4ba   :  { %5101 = vmatprep.subr.bf16.mxu0 %v7319_v35  ;;  %5187 = vmatprep.subr.bf16.mxu1 %v7322_v36  ;;  %v7341_v35 = vld [vmem:[#allocation20 + $0xab0] ss:$76 sps:$4 sm:$0xff]   ;;  %v7344_v36 = vld [vmem:[#allocation20 + $0xab8] ss:$76 sps:$4 sm:$0xff]  }
 0x4bd   :  { %5102 = vmatpush1.bf16.msra.mxu0 %v7317_v37  ;;  %5188 = vmatpush1.bf16.msra.mxu1 %v7320_v38  ;;  %v7349_v37 = vld [vmem:[#allocation20 + $0xb4c] ss:$76 sps:$4 sm:$0xff]   ;;  %v7352_v38 = vld [vmem:[#allocation20 + $0xb54] ss:$76 sps:$4 sm:$0xff]  }
 0x4be   :  { %5103 = vmatprep.subr.bf16.mxu0 %v7325_v39  ;;  %5189 = vmatprep.subr.bf16.mxu1 %v7328_v40  ;;  %v7347_v39 = vld [vmem:[#allocation20 + $0xb48] ss:$76 sps:$4 sm:$0xff]   ;;  %v7350_v40 = vld [vmem:[#allocation20 + $0xb50] ss:$76 sps:$4 sm:$0xff]  }
 0x4c1   :  { %5104 = vmatpush1.bf16.msra.mxu0 %v7323_v41  ;;  %5190 = vmatpush1.bf16.msra.mxu1 %v7326_v42  ;;  %v7355_v41 = vld [vmem:[#allocation20 + $0xbe4] ss:$76 sps:$4 sm:$0xff]   ;;  %v7358_v42 = vld [vmem:[#allocation20 + $0xbec] ss:$76 sps:$4 sm:$0xff]  }
 0x4c2   :  { %5116 = vmatprep.subr.bf16.mxu0 %v7331_v43  ;;  %5202 = vmatprep.subr.bf16.mxu1 %v7334_v44  ;;  %v7353_v43 = vld [vmem:[#allocation20 + $0xbe0] ss:$76 sps:$4 sm:$0xff]   ;;  %v7356_v44 = vld [vmem:[#allocation20 + $0xbe8] ss:$76 sps:$4 sm:$0xff]  }
 0x557   :  { %v1180_v52 = vpop.f32.mrb[4].mxu0  ;;  %v1223_v53 = vpop.f32.mrb[12].mxu1 }
 0x558   :  { %v1181_v54 = vadd.f32 %v1180_v52, %v809_v48  ;;  %v1224_v55 = vadd.f32 %v1223_v53, %v817_v49  ;;  %v1182_v56 = vpop.f32.mrb[5].mxu0  ;;  %v1225_v57 = vpop.f32.mrb[13].mxu1  ;;  %v7370_v52 = vld [vmem:[#allocation20 + $0xd1c] ss:$76 sps:$4 sm:$0xff]  }
 0x559   :  { %v1183_v58 = vadd.f32 %v1182_v56, %v813_v50  ;;  %v1226_v59 = vadd.f32 %v1225_v57, %v821_v51  ;;  %v1184_v60 = vpop.f32.mrb[6].mxu0  ;;  %v1227_v61 = vpop.f32.mrb[14].mxu1  ;;  %v7365_v53 = vld [vmem:[#allocation20 + $0xd10] ss:$76 sps:$4 sm:$0xff]   ;;  %v7376_v56 = vld [vmem:[#allocation20 + $0xdb4] ss:$76 sps:$4 sm:$0xff]  }
 0x55a   :  { %vm1232_vm11 = vcmp.gt.f32.partialorder %v1181_v54, 0.0  ;;  %v1240_v62 = vmul.f32 0.2, %v1181_v54  ;;  %vm1234_vm12 = vcmp.gt.f32.partialorder %v1224_v55, 0.0  ;;  %v1242_v63 = vmul.f32 0.2, %v1224_v55 }
 0x55b   :  { %vm1233_vm13 = vcmp.gt.f32.partialorder %v1183_v58, 0.0  ;;  %v1241_v0 = vmul.f32 0.2, %v1183_v58  ;;  %vm1235_vm14 = vcmp.gt.f32.partialorder %v1226_v59, 0.0  ;;  %v1243_v1 = vmul.f32 0.2, %v1226_v59 }
 0x55c   :  { %v1185_v2 = vadd.f32 %v1184_v60, %v809_v48  ;;  %v1228_v3 = vadd.f32 %v1227_v61, %v817_v49  ;;  %v1186_v4 = vpop.f32.mrb[7].mxu0  ;;  %v1229_v5 = vpop.f32.mrb[15].mxu1  ;;  %v1248_v6 = vsel %vm1232_vm11, %v1181_v54, %v1240_v62  ;;  %v1250_v7 = vsel %vm1234_vm12, %v1224_v55, %v1242_v63  ;;  %v7364_v48 = vld [vmem:[#allocation20 + $0xc84] ss:$76 sps:$4 sm:$0xff]   ;;  %v7373_v55 = vld [vmem:[#allocation20 + $0xdac] ss:$76 sps:$4 sm:$0xff]  }
 0x55d   :  { %v1187_v8 = vadd.f32 %v1186_v4, %v813_v50  ;;  %v1230_v9 = vadd.f32 %v1229_v5, %v821_v51  ;;  %v1249_v14 = vsel %vm1233_vm13, %v1183_v58, %v1241_v0  ;;  %v1251_v15 = vsel %vm1235_vm14, %v1226_v59, %v1243_v1  ;;  %v7359_v49 = vld [vmem:[#allocation20 + $0xc78] ss:$76 sps:$4 sm:$0xff]   ;;  %v7362_v50 = vld [vmem:[#allocation20 + $0xc80] ss:$76 sps:$4 sm:$0xff]   ;;  %v7371_v57 = vld [vmem:[#allocation20 + $0xda8] ss:$76 sps:$4 sm:$0xff]  }
 0x55e   :  { %vm1236_vm15 = vcmp.gt.f32.partialorder %v1185_v2, 0.0  ;;  %v1244_v10 = vmul.f32 0.2, %v1185_v2  ;;  %vm1238_vm0 = vcmp.gt.f32.partialorder %v1228_v3, 0.0  ;;  %v1246_v11 = vmul.f32 0.2, %v1228_v3 }
 0x55f   :  { %vm1237_vm1 = vcmp.gt.f32.partialorder %v1187_v8, 0.0  ;;  %v1245_v12 = vmul.f32 0.2, %v1187_v8  ;;  %vm1239_vm2 = vcmp.gt.f32.partialorder %v1230_v9, 0.0  ;;  %v1247_v13 = vmul.f32 0.2, %v1230_v9 }
 0x560   :  { %v1252_v16 = vsel %vm1236_vm15, %v1185_v2, %v1244_v10  ;;  %v1254_v17 = vsel %vm1238_vm0, %v1228_v3, %v1246_v11  ;;  %v7367_v51 = vld [vmem:[#allocation20 + $0xd14] ss:$76 sps:$4 sm:$0xff]   ;;  %v7368_v54 = vld [vmem:[#allocation20 + $0xd18] ss:$76 sps:$4 sm:$0xff]   ;;  %v7374_v58 = vld [vmem:[#allocation20 + $0xdb0] ss:$76 sps:$4 sm:$0xff]  }
 0x561   :  { %v8860_v20 = vpack.c.bf16 %v1252_v16, %v1248_v6  ;;  %v8862_v22 = vpack.c.bf16 %v1254_v17, %v1250_v7  ;;  %v1253_v23 = vsel %vm1237_vm1, %v1187_v8, %v1245_v12  ;;  %v1255_v24 = vsel %vm1239_vm2, %v1230_v9, %v1247_v13  ;;  %v7379_v59 = vld [vmem:[#allocation20 + $0xe44] ss:$76 sps:$4 sm:$0xff]   ;;  %v7382_v60 = vld [vmem:[#allocation20 + $0xe4c] ss:$76 sps:$4 sm:$0xff]   ;;  %v7380_v62 = vld [vmem:[#allocation20 + $0xe48] ss:$76 sps:$4 sm:$0xff]  }
 0x562   :  { %v8864_v25 = vpack.c.bf16 %v1253_v23, %v1249_v14  ;;  %v8866_v26 = vpack.c.bf16 %v1255_v24, %v1251_v15  ;;  %v7377_v61 = vld [vmem:[#allocation20 + $0xe40] ss:$76 sps:$4 sm:$0xff]   ;;  %v7385_v63 = vld [vmem:[#allocation20 + $0xedc] ss:$76 sps:$4 sm:$0xff]   ;;  %v7388_v0 = vld [vmem:[#allocation20 + $0xee4] ss:$76 sps:$4 sm:$0xff]  }
 0x563   :  { %v7383_v1 = vld [vmem:[#allocation20 + $0xed8] ss:$76 sps:$4 sm:$0xff]   ;;  %v7386_v2 = vld [vmem:[#allocation20 + $0xee0] ss:$76 sps:$4 sm:$0xff]   ;;  %v7394_v4 = vld [vmem:[#allocation20 + $0xf7c] ss:$76 sps:$4 sm:$0xff]  }
 0x564   :  { %5105 = vmatprep.mubr.bf16.mxu0 %v8864_v25  ;;  %5191 = vmatprep.mubr.bf16.mxu1 %v8864_v25  ;;  %v7391_v3 = vld [vmem:[#allocation20 + $0xf74] ss:$76 sps:$4 sm:$0xff]   ;;  %v7389_v5 = vld [vmem:[#allocation20 + $0xf70] ss:$76 sps:$4 sm:$0xff]   ;;  %v7392_v6 = vld [vmem:[#allocation20 + $0xf78] ss:$76 sps:$4 sm:$0xff]  }
 0x565   :  { %5106 = vmatmul.mubr.bf16.vlgmr.msra.gmra.mrb[8].mxu0 %v8860_v20  ;;  %5192 = vmatmul.mubr.bf16.vlgmr.msra.gmra.mrb[16].mxu1 %v8860_v20  ;;  %v7397_v7 = vld [vmem:[#allocation20 + $0x100c] ss:$76 sps:$4 sm:$0xff]   ;;  %v7400_v8 = vld [vmem:[#allocation20 + $0x1014] ss:$76 sps:$4 sm:$0xff]   ;;  %v7398_v10 = vld [vmem:[#allocation20 + $0x1010] ss:$76 sps:$4 sm:$0xff]  }
 0x566   :  { %5117 = vmatpush1.bf16.msra.mxu0 %v7329_v27  ;;  %5203 = vmatpush1.bf16.msra.mxu1 %v7332_v28  ;;  %v7395_v9 = vld [vmem:[#allocation20 + $0x1008] ss:$76 sps:$4 sm:$0xff]   ;;  %v7403_v11 = vld [vmem:[#allocation20 + $0x10a4] ss:$76 sps:$4 sm:$0xff]   ;;  %v7406_v12 = vld [vmem:[#allocation20 + $0x10ac] ss:$76 sps:$4 sm:$0xff]  }
 0x567   :  { %5148 = vmatprep.mubr.bf16.mxu0 %v8866_v26  ;;  %5234 = vmatprep.mubr.bf16.mxu1 %v8866_v26  ;;  %v7401_v13 = vld [vmem:[#allocation20 + $0x10a0] ss:$76 sps:$4 sm:$0xff]   ;;  %v7404_v14 = vld [vmem:[#allocation20 + $0x10a8] ss:$76 sps:$4 sm:$0xff]   ;;  %v7412_v16 = vld [vmem:[#allocation20 + $0x1144] ss:$76 sps:$4 sm:$0xff]  }
 0x568   :  { %5118 = vmatprep.subr.bf16.mxu0 %v7337_v29  ;;  %5204 = vmatprep.subr.bf16.mxu1 %v7340_v30  ;;  %v7409_v15 = vld [vmem:[#allocation20 + $0x113c] ss:$76 sps:$4 sm:$0xff]   ;;  %v7407_v17 = vld [vmem:[#allocation20 + $0x1138] ss:$76 sps:$4 sm:$0xff]   ;;  %v7410_v23 = vld [vmem:[#allocation20 + $0x1140] ss:$76 sps:$4 sm:$0xff]  }
 0x569   :  { %v7415_v24 = vld [vmem:[#allocation20 + $0x11d4] ss:$76 sps:$4 sm:$0xff]   ;;  %v7418_v27 = vld [vmem:[#allocation20 + $0x11dc] ss:$76 sps:$4 sm:$0xff]   ;;  %v7416_v29 = vld [vmem:[#allocation20 + $0x11d8] ss:$76 sps:$4 sm:$0xff]  }
 0x56a   :  { %5119 = vmatpush1.bf16.msra.mxu0 %v7335_v31  ;;  %5205 = vmatpush1.bf16.msra.mxu1 %v7338_v32  ;;  %v7413_v28 = vld [vmem:[#allocation20 + $0x11d0] ss:$76 sps:$4 sm:$0xff]   ;;  %v7421_v30 = vld [vmem:[#allocation20 + $0x126c] ss:$76 sps:$4 sm:$0xff]   ;;  %v7424_v31 = vld [vmem:[#allocation20 + $0x1274] ss:$76 sps:$4 sm:$0xff]  }
 0x56b   :  { %5120 = vmatprep.subr.bf16.mxu0 %v7343_v33  ;;  %5206 = vmatprep.subr.bf16.mxu1 %v7346_v34  ;;  %v7419_v32 = vld [vmem:[#allocation20 + $0x1268] ss:$76 sps:$4 sm:$0xff]   ;;  %v7422_v33 = vld [vmem:[#allocation20 + $0x1270] ss:$76 sps:$4 sm:$0xff]  }
 0x56c   :  { %v7427_v34 = vld [vmem:[#allocation20 + $0x14] ss:$76 sps:$4 sm:$0xff]  }
 0x56e   :  { %5121 = vmatpush1.bf16.msra.mxu0 %v7341_v35  ;;  %5207 = vmatpush1.bf16.msra.mxu1 %v7344_v36  ;;  %v7430_v35 = vld [vmem:[#allocation20 + $0x1c] ss:$76 sps:$4 sm:$0xff]  }
 0x56f   :  { %5122 = vmatprep.subr.bf16.mxu0 %v7349_v37  ;;  %5208 = vmatprep.subr.bf16.mxu1 %v7352_v38  ;;  %v7425_v36 = vld [vmem:[#allocation20 + $0x10] ss:$76 sps:$4 sm:$0xff]   ;;  %v7428_v37 = vld [vmem:[#allocation20 + $0x18] ss:$76 sps:$4 sm:$0xff]  }
 0x570   :  { %v7433_v38 = vld [vmem:[#allocation20 + $0xac] ss:$76 sps:$4 sm:$0xff]  }
 0x572   :  { %5123 = vmatpush1.bf16.msra.mxu0 %v7347_v39  ;;  %5209 = vmatpush1.bf16.msra.mxu1 %v7350_v40  ;;  %v7436_v39 = vld [vmem:[#allocation20 + $0xb4] ss:$76 sps:$4 sm:$0xff]  }
 0x573   :  { %5124 = vmatprep.subr.bf16.mxu0 %v7355_v41  ;;  %5210 = vmatprep.subr.bf16.mxu1 %v7358_v42  ;;  %v7431_v40 = vld [vmem:[#allocation20 + $0xa8] ss:$76 sps:$4 sm:$0xff]   ;;  %v7434_v41 = vld [vmem:[#allocation20 + $0xb0] ss:$76 sps:$4 sm:$0xff]  }
 0x574   :  { %v7439_v42 = vld [vmem:[#allocation20 + $0x144] ss:$76 sps:$4 sm:$0xff]  }
 0x576   :  { %5125 = vmatpush1.bf16.msra.mxu0 %v7353_v43  ;;  %5211 = vmatpush1.bf16.msra.mxu1 %v7356_v44  ;;  %v7442_v43 = vld [vmem:[#allocation20 + $0x14c] ss:$76 sps:$4 sm:$0xff]  }
 0x577   :  { %5126 = vmatprep.subr.bf16.mxu0 %v7361_v46  ;;  %5212 = vmatprep.subr.bf16.mxu1 %v7364_v48  ;;  %v7437_v44 = vld [vmem:[#allocation20 + $0x140] ss:$76 sps:$4 sm:$0xff]   ;;  %v7440_v46 = vld [vmem:[#allocation20 + $0x148] ss:$76 sps:$4 sm:$0xff]  }
 0x578   :  { %v7445_v48 = vld [vmem:[#allocation20 + $0x1dc] ss:$76 sps:$4 sm:$0xff]  }
 0x57a   :  { %5127 = vmatpush1.bf16.msra.mxu0 %v7359_v49  ;;  %5213 = vmatpush1.bf16.msra.mxu1 %v7362_v50  ;;  %v7448_v49 = vld [vmem:[#allocation20 + $0x1e4] ss:$76 sps:$4 sm:$0xff]  }
 0x57b   :  { %5128 = vmatprep.subr.bf16.mxu0 %v7367_v51  ;;  %5214 = vmatprep.subr.bf16.mxu1 %v7370_v52  ;;  %v7443_v50 = vld [vmem:[#allocation20 + $0x1d8] ss:$76 sps:$4 sm:$0xff]   ;;  %v7446_v51 = vld [vmem:[#allocation20 + $0x1e0] ss:$76 sps:$4 sm:$0xff]  }
 0x57c   :  { %v7451_v52 = vld [vmem:[#allocation20 + $0x274] ss:$76 sps:$4 sm:$0xff]  }
 0x57e   :  { %5129 = vmatpush1.bf16.msra.mxu0 %v7365_v53  ;;  %5215 = vmatpush1.bf16.msra.mxu1 %v7368_v54  ;;  %v7454_v53 = vld [vmem:[#allocation20 + $0x27c] ss:$76 sps:$4 sm:$0xff]  }
 0x57f   :  { %5130 = vmatprep.subr.bf16.mxu0 %v7373_v55  ;;  %5216 = vmatprep.subr.bf16.mxu1 %v7376_v56  ;;  %v7449_v54 = vld [vmem:[#allocation20 + $0x270] ss:$76 sps:$4 sm:$0xff]   ;;  %v7452_v55 = vld [vmem:[#allocation20 + $0x278] ss:$76 sps:$4 sm:$0xff]  }
 0x580   :  { %v7457_v56 = vld [vmem:[#allocation20 + $0x30c] ss:$76 sps:$4 sm:$0xff]  }
 0x582   :  { %5131 = vmatpush1.bf16.msra.mxu0 %v7371_v57  ;;  %5217 = vmatpush1.bf16.msra.mxu1 %v7374_v58  ;;  %v7460_v57 = vld [vmem:[#allocation20 + $0x314] ss:$76 sps:$4 sm:$0xff]  }
 0x583   :  { %5132 = vmatprep.subr.bf16.mxu0 %v7379_v59  ;;  %5218 = vmatprep.subr.bf16.mxu1 %v7382_v60  ;;  %v7455_v58 = vld [vmem:[#allocation20 + $0x308] ss:$76 sps:$4 sm:$0xff]   ;;  %v7458_v59 = vld [vmem:[#allocation20 + $0x310] ss:$76 sps:$4 sm:$0xff]  }
 0x584   :  { %v7463_v60 = vld [vmem:[#allocation20 + $0x3a4] ss:$76 sps:$4 sm:$0xff]  }
 0x586   :  { %5133 = vmatpush1.bf16.msra.mxu0 %v7377_v61  ;;  %5219 = vmatpush1.bf16.msra.mxu1 %v7380_v62  ;;  %v7466_v61 = vld [vmem:[#allocation20 + $0x3ac] ss:$76 sps:$4 sm:$0xff]  }
 0x587   :  { %5134 = vmatprep.subr.bf16.mxu0 %v7385_v63  ;;  %5220 = vmatprep.subr.bf16.mxu1 %v7388_v0  ;;  %v7461_v62 = vld [vmem:[#allocation20 + $0x3a0] ss:$76 sps:$4 sm:$0xff]   ;;  %v7464_v63 = vld [vmem:[#allocation20 + $0x3a8] ss:$76 sps:$4 sm:$0xff]  }
 0x588   :  { %v7469_v0 = vld [vmem:[#allocation20 + $0x43c] ss:$76 sps:$4 sm:$0xff]  }
 0x58a   :  { %5135 = vmatpush1.bf16.msra.mxu0 %v7383_v1  ;;  %5221 = vmatpush1.bf16.msra.mxu1 %v7386_v2  ;;  %v7472_v1 = vld [vmem:[#allocation20 + $0x444] ss:$76 sps:$4 sm:$0xff]  }
 0x58b   :  { %5136 = vmatprep.subr.bf16.mxu0 %v7391_v3  ;;  %5222 = vmatprep.subr.bf16.mxu1 %v7394_v4  ;;  %v7467_v2 = vld [vmem:[#allocation20 + $0x438] ss:$76 sps:$4 sm:$0xff]   ;;  %v7470_v3 = vld [vmem:[#allocation20 + $0x440] ss:$76 sps:$4 sm:$0xff]  }
 0x58c   :  { %v7475_v4 = vld [vmem:[#allocation20 + $0x4d4] ss:$76 sps:$4 sm:$0xff]  }
 0x58e   :  { %5137 = vmatpush1.bf16.msra.mxu0 %v7389_v5  ;;  %5223 = vmatpush1.bf16.msra.mxu1 %v7392_v6  ;;  %v7478_v5 = vld [vmem:[#allocation20 + $0x4dc] ss:$76 sps:$4 sm:$0xff]  }
 0x58f   :  { %5138 = vmatprep.subr.bf16.mxu0 %v7397_v7  ;;  %5224 = vmatprep.subr.bf16.mxu1 %v7400_v8  ;;  %v7473_v6 = vld [vmem:[#allocation20 + $0x4d0] ss:$76 sps:$4 sm:$0xff]   ;;  %v7476_v7 = vld [vmem:[#allocation20 + $0x4d8] ss:$76 sps:$4 sm:$0xff]  }
 0x590   :  { %v7481_v8 = vld [vmem:[#allocation20 + $0x56c] ss:$76 sps:$4 sm:$0xff]  }
 0x592   :  { %5139 = vmatpush1.bf16.msra.mxu0 %v7395_v9  ;;  %5225 = vmatpush1.bf16.msra.mxu1 %v7398_v10  ;;  %v7484_v9 = vld [vmem:[#allocation20 + $0x574] ss:$76 sps:$4 sm:$0xff]  }
 0x593   :  { %5140 = vmatprep.subr.bf16.mxu0 %v7403_v11  ;;  %5226 = vmatprep.subr.bf16.mxu1 %v7406_v12  ;;  %v7479_v10 = vld [vmem:[#allocation20 + $0x568] ss:$76 sps:$4 sm:$0xff]   ;;  %v7482_v11 = vld [vmem:[#allocation20 + $0x570] ss:$76 sps:$4 sm:$0xff]  }
 0x594   :  { %v7487_v12 = vld [vmem:[#allocation20 + $0x604] ss:$76 sps:$4 sm:$0xff]  }
 0x596   :  { %5141 = vmatpush1.bf16.msra.mxu0 %v7401_v13  ;;  %5227 = vmatpush1.bf16.msra.mxu1 %v7404_v14  ;;  %v7490_v13 = vld [vmem:[#allocation20 + $0x60c] ss:$76 sps:$4 sm:$0xff]  }
 0x597   :  { %5142 = vmatprep.subr.bf16.mxu0 %v7409_v15  ;;  %5228 = vmatprep.subr.bf16.mxu1 %v7412_v16  ;;  %v7485_v14 = vld [vmem:[#allocation20 + $0x600] ss:$76 sps:$4 sm:$0xff]   ;;  %v7488_v15 = vld [vmem:[#allocation20 + $0x608] ss:$76 sps:$4 sm:$0xff]  }
 0x598   :  { %v7493_v16 = vld [vmem:[#allocation20 + $0x69c] ss:$76 sps:$4 sm:$0xff]  }
 0x59a   :  { %5143 = vmatpush1.bf16.msra.mxu0 %v7407_v17  ;;  %5229 = vmatpush1.bf16.msra.mxu1 %v7410_v23  ;;  %v7496_v17 = vld [vmem:[#allocation20 + $0x6a4] ss:$76 sps:$4 sm:$0xff]  }
 0x59b   :  { %5144 = vmatprep.subr.bf16.mxu0 %v7415_v24  ;;  %5230 = vmatprep.subr.bf16.mxu1 %v7418_v27  ;;  %v7491_v23 = vld [vmem:[#allocation20 + $0x698] ss:$76 sps:$4 sm:$0xff]   ;;  %v7494_v24 = vld [vmem:[#allocation20 + $0x6a0] ss:$76 sps:$4 sm:$0xff]  }
 0x59c   :  { %v7499_v27 = vld [vmem:[#allocation20 + $0x734] ss:$76 sps:$4 sm:$0xff]  }
 0x59e   :  { %5145 = vmatpush1.bf16.msra.mxu0 %v7413_v28  ;;  %5231 = vmatpush1.bf16.msra.mxu1 %v7416_v29  ;;  %v7502_v28 = vld [vmem:[#allocation20 + $0x73c] ss:$76 sps:$4 sm:$0xff]  }
 0x59f   :  { %5146 = vmatprep.subr.bf16.mxu0 %v7421_v30  ;;  %5232 = vmatprep.subr.bf16.mxu1 %v7424_v31  ;;  %v7497_v29 = vld [vmem:[#allocation20 + $0x730] ss:$76 sps:$4 sm:$0xff]   ;;  %v7500_v30 = vld [vmem:[#allocation20 + $0x738] ss:$76 sps:$4 sm:$0xff]  }
 0x5a0   :  { %v7505_v31 = vld [vmem:[#allocation20 + $0x7cc] ss:$76 sps:$4 sm:$0xff]  }
 0x5a2   :  { %5147 = vmatpush1.bf16.msra.mxu0 %v7419_v32  ;;  %5233 = vmatpush1.bf16.msra.mxu1 %v7422_v33  ;;  %v7508_v32 = vld [vmem:[#allocation20 + $0x7d4] ss:$76 sps:$4 sm:$0xff]  }
 0x5a3   :  { %5245 = vmatprep.subr.bf16.mxu0 %v7427_v34  ;;  %5331 = vmatprep.subr.bf16.mxu1 %v7430_v35  ;;  %v7503_v33 = vld [vmem:[#allocation20 + $0x7c8] ss:$76 sps:$4 sm:$0xff]   ;;  %v7506_v34 = vld [vmem:[#allocation20 + $0x7d0] ss:$76 sps:$4 sm:$0xff]  }
 0x5a4   :  { %v7511_v35 = vld [vmem:[#allocation20 + $0x864] ss:$76 sps:$4 sm:$0xff]  }
 0x5a5   :  { %5149 = vmatmul.mubr.bf16.vlgmr.msra.gmra.mrb[8].mxu0 %v8862_v22  ;;  %5235 = vmatmul.mubr.bf16.vlgmr.msra.gmra.mrb[16].mxu1 %v8862_v22 }
 0x5a6   :  { %5246 = vmatpush1.bf16.msra.mxu0 %v7425_v36  ;;  %5277 = vmatprep.mubr.bf16.mxu0 %v8864_v25  ;;  %v7514_v36 = vld [vmem:[#allocation20 + $0x86c] ss:$76 sps:$4 sm:$0xff]  }
 0x5a7   :  { %5332 = vmatpush1.bf16.msra.mxu1 %v7428_v37  ;;  %5363 = vmatprep.mubr.bf16.mxu1 %v8864_v25  ;;  %v7509_v37 = vld [vmem:[#allocation20 + $0x860] ss:$76 sps:$4 sm:$0xff]  }
 0x5a8   :  { %5247 = vmatprep.subr.bf16.mxu0 %v7433_v38  ;;  %5333 = vmatprep.subr.bf16.mxu1 %v7436_v39  ;;  %v7512_v38 = vld [vmem:[#allocation20 + $0x868] ss:$76 sps:$4 sm:$0xff]  }
 0x5a9   :  { %v7517_v39 = vld [vmem:[#allocation20 + $0x8fc] ss:$76 sps:$4 sm:$0xff]  }
 0x5aa   :  { %5248 = vmatpush1.bf16.msra.mxu0 %v7431_v40  ;;  %v7520_v40 = vld [vmem:[#allocation20 + $0x904] ss:$76 sps:$4 sm:$0xff]  }
 0x5ab   :  { %5334 = vmatpush1.bf16.msra.mxu1 %v7434_v41  ;;  %5249 = vmatprep.subr.bf16.mxu0 %v7439_v42  ;;  %v7515_v41 = vld [vmem:[#allocation20 + $0x8f8] ss:$76 sps:$4 sm:$0xff]   ;;  %v7518_v42 = vld [vmem:[#allocation20 + $0x900] ss:$76 sps:$4 sm:$0xff]  }
 0x5ac   :  { %5335 = vmatprep.subr.bf16.mxu1 %v7442_v43  ;;  %v7523_v43 = vld [vmem:[#allocation20 + $0x994] ss:$76 sps:$4 sm:$0xff]  }
 0x5ae   :  { %5250 = vmatpush1.bf16.msra.mxu0 %v7437_v44  ;;  %v7526_v44 = vld [vmem:[#allocation20 + $0x99c] ss:$76 sps:$4 sm:$0xff]  }
 0x5af   :  { %5336 = vmatpush1.bf16.msra.mxu1 %v7440_v46  ;;  %5251 = vmatprep.subr.bf16.mxu0 %v7445_v48  ;;  %v7521_v46 = vld [vmem:[#allocation20 + $0x990] ss:$76 sps:$4 sm:$0xff]   ;;  %v7524_v48 = vld [vmem:[#allocation20 + $0x998] ss:$76 sps:$4 sm:$0xff]  }
 0x5b0   :  { %5337 = vmatprep.subr.bf16.mxu1 %v7448_v49  ;;  %v7529_v49 = vld [vmem:[#allocation20 + $0xa2c] ss:$76 sps:$4 sm:$0xff]  }
 0x5b2   :  { %5252 = vmatpush1.bf16.msra.mxu0 %v7443_v50  ;;  %v7532_v50 = vld [vmem:[#allocation20 + $0xa34] ss:$76 sps:$4 sm:$0xff]  }
 0x5b3   :  { %5338 = vmatpush1.bf16.msra.mxu1 %v7446_v51  ;;  %5253 = vmatprep.subr.bf16.mxu0 %v7451_v52  ;;  %v7527_v51 = vld [vmem:[#allocation20 + $0xa28] ss:$76 sps:$4 sm:$0xff]   ;;  %v7530_v52 = vld [vmem:[#allocation20 + $0xa30] ss:$76 sps:$4 sm:$0xff]  }
 0x5b4   :  { %5339 = vmatprep.subr.bf16.mxu1 %v7454_v53  ;;  %v7535_v53 = vld [vmem:[#allocation20 + $0xac4] ss:$76 sps:$4 sm:$0xff]  }
 0x5b6   :  { %5254 = vmatpush1.bf16.msra.mxu0 %v7449_v54  ;;  %v7538_v54 = vld [vmem:[#allocation20 + $0xacc] ss:$76 sps:$4 sm:$0xff]  }
 0x5b7   :  { %5340 = vmatpush1.bf16.msra.mxu1 %v7452_v55  ;;  %5255 = vmatprep.subr.bf16.mxu0 %v7457_v56  ;;  %v7533_v55 = vld [vmem:[#allocation20 + $0xac0] ss:$76 sps:$4 sm:$0xff]   ;;  %v7536_v56 = vld [vmem:[#allocation20 + $0xac8] ss:$76 sps:$4 sm:$0xff]  }
 0x5b8   :  { %5341 = vmatprep.subr.bf16.mxu1 %v7460_v57  ;;  %v7541_v57 = vld [vmem:[#allocation20 + $0xb5c] ss:$76 sps:$4 sm:$0xff]  }
 0x5ba   :  { %5256 = vmatpush1.bf16.msra.mxu0 %v7455_v58  ;;  %v7544_v58 = vld [vmem:[#allocation20 + $0xb64] ss:$76 sps:$4 sm:$0xff]  }
 0x5bb   :  { %5342 = vmatpush1.bf16.msra.mxu1 %v7458_v59  ;;  %5257 = vmatprep.subr.bf16.mxu0 %v7463_v60  ;;  %v7539_v59 = vld [vmem:[#allocation20 + $0xb58] ss:$76 sps:$4 sm:$0xff]   ;;  %v7542_v60 = vld [vmem:[#allocation20 + $0xb60] ss:$76 sps:$4 sm:$0xff]  }
 0x5bc   :  { %5343 = vmatprep.subr.bf16.mxu1 %v7466_v61  ;;  %v7547_v61 = vld [vmem:[#allocation20 + $0xbf4] ss:$76 sps:$4 sm:$0xff]  }
 0x5be   :  { %5258 = vmatpush1.bf16.msra.mxu0 %v7461_v62  ;;  %v7550_v62 = vld [vmem:[#allocation20 + $0xbfc] ss:$76 sps:$4 sm:$0xff]  }
 0x5bf   :  { %5344 = vmatpush1.bf16.msra.mxu1 %v7464_v63  ;;  %5259 = vmatprep.subr.bf16.mxu0 %v7469_v0  ;;  %v7545_v63 = vld [vmem:[#allocation20 + $0xbf0] ss:$76 sps:$4 sm:$0xff]   ;;  %v7548_v0 = vld [vmem:[#allocation20 + $0xbf8] ss:$76 sps:$4 sm:$0xff]  }
 0x5c0   :  { %5345 = vmatprep.subr.bf16.mxu1 %v7472_v1  ;;  %v7553_v1 = vld [vmem:[#allocation20 + $0xc8c] ss:$76 sps:$4 sm:$0xff]  }
 0x5c2   :  { %5260 = vmatpush1.bf16.msra.mxu0 %v7467_v2  ;;  %v7556_v2 = vld [vmem:[#allocation20 + $0xc94] ss:$76 sps:$4 sm:$0xff]  }
 0x5c3   :  { %5346 = vmatpush1.bf16.msra.mxu1 %v7470_v3  ;;  %5261 = vmatprep.subr.bf16.mxu0 %v7475_v4  ;;  %v7551_v3 = vld [vmem:[#allocation20 + $0xc88] ss:$76 sps:$4 sm:$0xff]   ;;  %v7554_v4 = vld [vmem:[#allocation20 + $0xc90] ss:$76 sps:$4 sm:$0xff]  }
 0x5c4   :  { %5347 = vmatprep.subr.bf16.mxu1 %v7478_v5  ;;  %v7559_v5 = vld [vmem:[#allocation20 + $0xd24] ss:$76 sps:$4 sm:$0xff]  }
 0x5c6   :  { %5262 = vmatpush1.bf16.msra.mxu0 %v7473_v6  ;;  %v7562_v6 = vld [vmem:[#allocation20 + $0xd2c] ss:$76 sps:$4 sm:$0xff]  }
 0x5c7   :  { %5348 = vmatpush1.bf16.msra.mxu1 %v7476_v7  ;;  %5263 = vmatprep.subr.bf16.mxu0 %v7481_v8  ;;  %v7557_v7 = vld [vmem:[#allocation20 + $0xd20] ss:$76 sps:$4 sm:$0xff]   ;;  %v7560_v8 = vld [vmem:[#allocation20 + $0xd28] ss:$76 sps:$4 sm:$0xff]  }
 0x5c8   :  { %5349 = vmatprep.subr.bf16.mxu1 %v7484_v9  ;;  %v7565_v9 = vld [vmem:[#allocation20 + $0xdbc] ss:$76 sps:$4 sm:$0xff]  }
 0x5ca   :  { %5264 = vmatpush1.bf16.msra.mxu0 %v7479_v10  ;;  %v7568_v10 = vld [vmem:[#allocation20 + $0xdc4] ss:$76 sps:$4 sm:$0xff]  }
 0x5cb   :  { %5350 = vmatpush1.bf16.msra.mxu1 %v7482_v11  ;;  %5265 = vmatprep.subr.bf16.mxu0 %v7487_v12  ;;  %v7563_v11 = vld [vmem:[#allocation20 + $0xdb8] ss:$76 sps:$4 sm:$0xff]   ;;  %v7566_v12 = vld [vmem:[#allocation20 + $0xdc0] ss:$76 sps:$4 sm:$0xff]  }
 0x5cc   :  { %5351 = vmatprep.subr.bf16.mxu1 %v7490_v13  ;;  %v7571_v13 = vld [vmem:[#allocation20 + $0xe54] ss:$76 sps:$4 sm:$0xff]  }
 0x5ce   :  { %5266 = vmatpush1.bf16.msra.mxu0 %v7485_v14  ;;  %v7574_v14 = vld [vmem:[#allocation20 + $0xe5c] ss:$76 sps:$4 sm:$0xff]  }
 0x5cf   :  { %5352 = vmatpush1.bf16.msra.mxu1 %v7488_v15  ;;  %5267 = vmatprep.subr.bf16.mxu0 %v7493_v16  ;;  %v7569_v15 = vld [vmem:[#allocation20 + $0xe50] ss:$76 sps:$4 sm:$0xff]   ;;  %v7572_v16 = vld [vmem:[#allocation20 + $0xe58] ss:$76 sps:$4 sm:$0xff]  }
 0x5d0   :  { %5353 = vmatprep.subr.bf16.mxu1 %v7496_v17  ;;  %v7577_v17 = vld [vmem:[#allocation20 + $0xeec] ss:$76 sps:$4 sm:$0xff]  }
 0x5d2   :  { %5268 = vmatpush1.bf16.msra.mxu0 %v7491_v23  ;;  %v7580_v23 = vld [vmem:[#allocation20 + $0xef4] ss:$76 sps:$4 sm:$0xff]  }
 0x5d3   :  { %5354 = vmatpush1.bf16.msra.mxu1 %v7494_v24  ;;  %5269 = vmatprep.subr.bf16.mxu0 %v7499_v27  ;;  %v7575_v24 = vld [vmem:[#allocation20 + $0xee8] ss:$76 sps:$4 sm:$0xff]   ;;  %v7578_v27 = vld [vmem:[#allocation20 + $0xef0] ss:$76 sps:$4 sm:$0xff]  }
 0x5d4   :  { %5355 = vmatprep.subr.bf16.mxu1 %v7502_v28  ;;  %v7583_v28 = vld [vmem:[#allocation20 + $0xf84] ss:$76 sps:$4 sm:$0xff]  }
 0x5d6   :  { %5270 = vmatpush1.bf16.msra.mxu0 %v7497_v29  ;;  %v7586_v29 = vld [vmem:[#allocation20 + $0xf8c] ss:$76 sps:$4 sm:$0xff]  }
 0x5d7   :  { %5356 = vmatpush1.bf16.msra.mxu1 %v7500_v30  ;;  %5271 = vmatprep.subr.bf16.mxu0 %v7505_v31  ;;  %v7581_v30 = vld [vmem:[#allocation20 + $0xf80] ss:$76 sps:$4 sm:$0xff]   ;;  %v7584_v31 = vld [vmem:[#allocation20 + $0xf88] ss:$76 sps:$4 sm:$0xff]  }
 0x5d8   :  { %5357 = vmatprep.subr.bf16.mxu1 %v7508_v32  ;;  %v7589_v32 = vld [vmem:[#allocation20 + $0x101c] ss:$76 sps:$4 sm:$0xff]  }
 0x5da   :  { %5272 = vmatpush1.bf16.msra.mxu0 %v7503_v33  ;;  %v7592_v33 = vld [vmem:[#allocation20 + $0x1024] ss:$76 sps:$4 sm:$0xff]  }
 0x5db   :  { %5358 = vmatpush1.bf16.msra.mxu1 %v7506_v34  ;;  %5273 = vmatprep.subr.bf16.mxu0 %v7511_v35  ;;  %v7587_v34 = vld [vmem:[#allocation20 + $0x1018] ss:$76 sps:$4 sm:$0xff]   ;;  %v7590_v35 = vld [vmem:[#allocation20 + $0x1020] ss:$76 sps:$4 sm:$0xff]  }
 0x5dc   :  { %5359 = vmatprep.subr.bf16.mxu1 %v7514_v36  ;;  %v7595_v36 = vld [vmem:[#allocation20 + $0x10b4] ss:$76 sps:$4 sm:$0xff]  }
 0x5de   :  { %5274 = vmatpush1.bf16.msra.mxu0 %v7509_v37  ;;  %v7598_v37 = vld [vmem:[#allocation20 + $0x10bc] ss:$76 sps:$4 sm:$0xff]  }
 0x5df   :  { %5360 = vmatpush1.bf16.msra.mxu1 %v7512_v38  ;;  %5275 = vmatprep.subr.bf16.mxu0 %v7517_v39  ;;  %v7593_v38 = vld [vmem:[#allocation20 + $0x10b0] ss:$76 sps:$4 sm:$0xff]   ;;  %v7596_v39 = vld [vmem:[#allocation20 + $0x10b8] ss:$76 sps:$4 sm:$0xff]  }
 0x5e0   :  { %5361 = vmatprep.subr.bf16.mxu1 %v7520_v40  ;;  %v7601_v40 = vld [vmem:[#allocation20 + $0x114c] ss:$76 sps:$4 sm:$0xff]  }
 0x5e2   :  { %5276 = vmatpush1.bf16.msra.mxu0 %v7515_v41  ;;  %v7604_v41 = vld [vmem:[#allocation20 + $0x1154] ss:$76 sps:$4 sm:$0xff]  }
 0x5e3   :  { %5362 = vmatpush1.bf16.msra.mxu1 %v7518_v42  ;;  %5288 = vmatprep.subr.bf16.mxu0 %v7523_v43  ;;  %v7599_v42 = vld [vmem:[#allocation20 + $0x1148] ss:$76 sps:$4 sm:$0xff]   ;;  %v7602_v43 = vld [vmem:[#allocation20 + $0x1150] ss:$76 sps:$4 sm:$0xff]  }
 0x5e4   :  { %5374 = vmatprep.subr.bf16.mxu1 %v7526_v44  ;;  %v7607_v44 = vld [vmem:[#allocation20 + $0x11e4] ss:$76 sps:$4 sm:$0xff]  }
 0x5e5   :  { %5278 = vmatmul.mubr.bf16.vlgmr.msra.gmra.mrb[12].mxu0 %v8860_v20 }
 0x5e6   :  { %5364 = vmatmul.mubr.bf16.vlgmr.msra.gmra.mrb[20].mxu1 %v8860_v20  ;;  %5289 = vmatpush1.bf16.msra.mxu0 %v7521_v46  ;;  %v7610_v46 = vld [vmem:[#allocation20 + $0x11ec] ss:$76 sps:$4 sm:$0xff]  }
 0x5e7   :  { %5320 = vmatprep.mubr.bf16.mxu0 %v8866_v26  ;;  %5375 = vmatpush1.bf16.msra.mxu1 %v7524_v48  ;;  %v7605_v48 = vld [vmem:[#allocation20 + $0x11e0] ss:$76 sps:$4 sm:$0xff]  }
 0x5e8   :  { %5406 = vmatprep.mubr.bf16.mxu1 %v8866_v26  ;;  %5290 = vmatprep.subr.bf16.mxu0 %v7529_v49  ;;  %v7608_v49 = vld [vmem:[#allocation20 + $0x11e8] ss:$76 sps:$4 sm:$0xff]  }
 0x5e9   :  { %5376 = vmatprep.subr.bf16.mxu1 %v7532_v50  ;;  %v7613_v50 = vld [vmem:[#allocation20 + $0x127c] ss:$76 sps:$4 sm:$0xff]  }
 0x5ea   :  { %5291 = vmatpush1.bf16.msra.mxu0 %v7527_v51  ;;  %v7616_v51 = vld [vmem:[#allocation20 + $0x1284] ss:$76 sps:$4 sm:$0xff]  }
 0x5eb   :  { %5377 = vmatpush1.bf16.msra.mxu1 %v7530_v52  ;;  %5292 = vmatprep.subr.bf16.mxu0 %v7535_v53  ;;  %v7611_v52 = vld [vmem:[#allocation20 + $0x1278] ss:$76 sps:$4 sm:$0xff]   ;;  %v7614_v53 = vld [vmem:[#allocation20 + $0x1280] ss:$76 sps:$4 sm:$0xff]  }
 0x5ec   :  { %5378 = vmatprep.subr.bf16.mxu1 %v7538_v54  ;;  %v7619_v54 = vld [vmem:[#allocation20 + $0x24] ss:$76 sps:$4 sm:$0xff]  }
 0x5ee   :  { %5293 = vmatpush1.bf16.msra.mxu0 %v7533_v55  ;;  %v7622_v55 = vld [vmem:[#allocation20 + $0x2c] ss:$76 sps:$4 sm:$0xff]  }
 0x5ef   :  { %5379 = vmatpush1.bf16.msra.mxu1 %v7536_v56  ;;  %5294 = vmatprep.subr.bf16.mxu0 %v7541_v57  ;;  %v7617_v56 = vld [vmem:[#allocation20 + $0x20] ss:$76 sps:$4 sm:$0xff]   ;;  %v7620_v57 = vld [vmem:[#allocation20 + $0x28] ss:$76 sps:$4 sm:$0xff]  }
 0x5f0   :  { %5380 = vmatprep.subr.bf16.mxu1 %v7544_v58  ;;  %v7625_v58 = vld [vmem:[#allocation20 + $0xbc] ss:$76 sps:$4 sm:$0xff]  }
 0x5f2   :  { %5295 = vmatpush1.bf16.msra.mxu0 %v7539_v59  ;;  %v7628_v59 = vld [vmem:[#allocation20 + $0xc4] ss:$76 sps:$4 sm:$0xff]  }
 0x5f3   :  { %5381 = vmatpush1.bf16.msra.mxu1 %v7542_v60  ;;  %5296 = vmatprep.subr.bf16.mxu0 %v7547_v61  ;;  %v7623_v60 = vld [vmem:[#allocation20 + $0xb8] ss:$76 sps:$4 sm:$0xff]   ;;  %v7626_v61 = vld [vmem:[#allocation20 + $0xc0] ss:$76 sps:$4 sm:$0xff]  }
 0x5f4   :  { %5382 = vmatprep.subr.bf16.mxu1 %v7550_v62  ;;  %v7631_v62 = vld [vmem:[#allocation20 + $0x154] ss:$76 sps:$4 sm:$0xff]  }
 0x5f6   :  { %5297 = vmatpush1.bf16.msra.mxu0 %v7545_v63  ;;  %v7634_v63 = vld [vmem:[#allocation20 + $0x15c] ss:$76 sps:$4 sm:$0xff]  }
 0x5f7   :  { %5383 = vmatpush1.bf16.msra.mxu1 %v7548_v0  ;;  %5298 = vmatprep.subr.bf16.mxu0 %v7553_v1  ;;  %v7629_v0 = vld [vmem:[#allocation20 + $0x150] ss:$76 sps:$4 sm:$0xff]   ;;  %v7632_v1 = vld [vmem:[#allocation20 + $0x158] ss:$76 sps:$4 sm:$0xff]  }
 0x5f8   :  { %5384 = vmatprep.subr.bf16.mxu1 %v7556_v2  ;;  %v7637_v2 = vld [vmem:[#allocation20 + $0x1ec] ss:$76 sps:$4 sm:$0xff]  }
 0x5fa   :  { %5299 = vmatpush1.bf16.msra.mxu0 %v7551_v3  ;;  %v7640_v3 = vld [vmem:[#allocation20 + $0x1f4] ss:$76 sps:$4 sm:$0xff]  }
 0x5fb   :  { %5385 = vmatpush1.bf16.msra.mxu1 %v7554_v4  ;;  %5300 = vmatprep.subr.bf16.mxu0 %v7559_v5  ;;  %v7635_v4 = vld [vmem:[#allocation20 + $0x1e8] ss:$76 sps:$4 sm:$0xff]   ;;  %v7638_v5 = vld [vmem:[#allocation20 + $0x1f0] ss:$76 sps:$4 sm:$0xff]  }
 0x5fc   :  { %5386 = vmatprep.subr.bf16.mxu1 %v7562_v6  ;;  %v7643_v6 = vld [vmem:[#allocation20 + $0x284] ss:$76 sps:$4 sm:$0xff]  }
 0x5fe   :  { %5301 = vmatpush1.bf16.msra.mxu0 %v7557_v7  ;;  %v7646_v7 = vld [vmem:[#allocation20 + $0x28c] ss:$76 sps:$4 sm:$0xff]  }
 0x5ff   :  { %5387 = vmatpush1.bf16.msra.mxu1 %v7560_v8  ;;  %5302 = vmatprep.subr.bf16.mxu0 %v7565_v9  ;;  %v7641_v8 = vld [vmem:[#allocation20 + $0x280] ss:$76 sps:$4 sm:$0xff]   ;;  %v7644_v9 = vld [vmem:[#allocation20 + $0x288] ss:$76 sps:$4 sm:$0xff]  }
 0x600   :  { %5388 = vmatprep.subr.bf16.mxu1 %v7568_v10  ;;  %v7649_v10 = vld [vmem:[#allocation20 + $0x31c] ss:$76 sps:$4 sm:$0xff]  }
 0x602   :  { %5303 = vmatpush1.bf16.msra.mxu0 %v7563_v11  ;;  %v7652_v11 = vld [vmem:[#allocation20 + $0x324] ss:$76 sps:$4 sm:$0xff]  }
 0x603   :  { %5389 = vmatpush1.bf16.msra.mxu1 %v7566_v12  ;;  %5304 = vmatprep.subr.bf16.mxu0 %v7571_v13  ;;  %v7647_v12 = vld [vmem:[#allocation20 + $0x318] ss:$76 sps:$4 sm:$0xff]   ;;  %v7650_v13 = vld [vmem:[#allocation20 + $0x320] ss:$76 sps:$4 sm:$0xff]  }
 0x604   :  { %5390 = vmatprep.subr.bf16.mxu1 %v7574_v14  ;;  %v7655_v14 = vld [vmem:[#allocation20 + $0x3b4] ss:$76 sps:$4 sm:$0xff]  }
 0x606   :  { %5305 = vmatpush1.bf16.msra.mxu0 %v7569_v15  ;;  %v7658_v15 = vld [vmem:[#allocation20 + $0x3bc] ss:$76 sps:$4 sm:$0xff]  }
 0x607   :  { %5391 = vmatpush1.bf16.msra.mxu1 %v7572_v16  ;;  %5306 = vmatprep.subr.bf16.mxu0 %v7577_v17  ;;  %v7653_v16 = vld [vmem:[#allocation20 + $0x3b0] ss:$76 sps:$4 sm:$0xff]   ;;  %v7656_v17 = vld [vmem:[#allocation20 + $0x3b8] ss:$76 sps:$4 sm:$0xff]  }
 0x608   :  { %5392 = vmatprep.subr.bf16.mxu1 %v7580_v23  ;;  %v7661_v23 = vld [vmem:[#allocation20 + $0x44c] ss:$76 sps:$4 sm:$0xff]  }
 0x60a   :  { %5307 = vmatpush1.bf16.msra.mxu0 %v7575_v24  ;;  %v7664_v24 = vld [vmem:[#allocation20 + $0x454] ss:$76 sps:$4 sm:$0xff]  }
 0x60b   :  { %5393 = vmatpush1.bf16.msra.mxu1 %v7578_v27  ;;  %5308 = vmatprep.subr.bf16.mxu0 %v7583_v28  ;;  %v7659_v27 = vld [vmem:[#allocation20 + $0x448] ss:$76 sps:$4 sm:$0xff]   ;;  %v7662_v28 = vld [vmem:[#allocation20 + $0x450] ss:$76 sps:$4 sm:$0xff]  }
 0x60c   :  { %5394 = vmatprep.subr.bf16.mxu1 %v7586_v29  ;;  %v7667_v29 = vld [vmem:[#allocation20 + $0x4e4] ss:$76 sps:$4 sm:$0xff]  }
 0x60e   :  { %5309 = vmatpush1.bf16.msra.mxu0 %v7581_v30  ;;  %v7670_v30 = vld [vmem:[#allocation20 + $0x4ec] ss:$76 sps:$4 sm:$0xff]  }
 0x60f   :  { %5395 = vmatpush1.bf16.msra.mxu1 %v7584_v31  ;;  %5310 = vmatprep.subr.bf16.mxu0 %v7589_v32  ;;  %v7665_v31 = vld [vmem:[#allocation20 + $0x4e0] ss:$76 sps:$4 sm:$0xff]   ;;  %v7668_v32 = vld [vmem:[#allocation20 + $0x4e8] ss:$76 sps:$4 sm:$0xff]  }
 0x610   :  { %5396 = vmatprep.subr.bf16.mxu1 %v7592_v33  ;;  %v7673_v33 = vld [vmem:[#allocation20 + $0x57c] ss:$76 sps:$4 sm:$0xff]  }
 0x612   :  { %5311 = vmatpush1.bf16.msra.mxu0 %v7587_v34  ;;  %v7676_v34 = vld [vmem:[#allocation20 + $0x584] ss:$76 sps:$4 sm:$0xff]  }
 0x613   :  { %5397 = vmatpush1.bf16.msra.mxu1 %v7590_v35  ;;  %5312 = vmatprep.subr.bf16.mxu0 %v7595_v36  ;;  %v7671_v35 = vld [vmem:[#allocation20 + $0x578] ss:$76 sps:$4 sm:$0xff]   ;;  %v7674_v36 = vld [vmem:[#allocation20 + $0x580] ss:$76 sps:$4 sm:$0xff]  }
 0x614   :  { %5398 = vmatprep.subr.bf16.mxu1 %v7598_v37  ;;  %v7679_v37 = vld [vmem:[#allocation20 + $0x614] ss:$76 sps:$4 sm:$0xff]  }
 0x616   :  { %5313 = vmatpush1.bf16.msra.mxu0 %v7593_v38  ;;  %v7682_v38 = vld [vmem:[#allocation20 + $0x61c] ss:$76 sps:$4 sm:$0xff]  }
 0x617   :  { %5399 = vmatpush1.bf16.msra.mxu1 %v7596_v39  ;;  %5314 = vmatprep.subr.bf16.mxu0 %v7601_v40  ;;  %v7677_v39 = vld [vmem:[#allocation20 + $0x610] ss:$76 sps:$4 sm:$0xff]   ;;  %v7680_v40 = vld [vmem:[#allocation20 + $0x618] ss:$76 sps:$4 sm:$0xff]  }
 0x618   :  { %5400 = vmatprep.subr.bf16.mxu1 %v7604_v41  ;;  %v7685_v41 = vld [vmem:[#allocation20 + $0x6ac] ss:$76 sps:$4 sm:$0xff]  }
 0x61a   :  { %5315 = vmatpush1.bf16.msra.mxu0 %v7599_v42  ;;  %v7688_v42 = vld [vmem:[#allocation20 + $0x6b4] ss:$76 sps:$4 sm:$0xff]  }
 0x61b   :  { %5401 = vmatpush1.bf16.msra.mxu1 %v7602_v43  ;;  %5316 = vmatprep.subr.bf16.mxu0 %v7607_v44  ;;  %v7683_v43 = vld [vmem:[#allocation20 + $0x6a8] ss:$76 sps:$4 sm:$0xff]   ;;  %v7686_v44 = vld [vmem:[#allocation20 + $0x6b0] ss:$76 sps:$4 sm:$0xff]  }
 0x61c   :  { %5402 = vmatprep.subr.bf16.mxu1 %v7610_v46  ;;  %v7691_v46 = vld [vmem:[#allocation20 + $0x744] ss:$76 sps:$4 sm:$0xff]  }
 0x61e   :  { %5317 = vmatpush1.bf16.msra.mxu0 %v7605_v48  ;;  %v7694_v48 = vld [vmem:[#allocation20 + $0x74c] ss:$76 sps:$4 sm:$0xff]  }
 0x61f   :  { %5403 = vmatpush1.bf16.msra.mxu1 %v7608_v49  ;;  %5318 = vmatprep.subr.bf16.mxu0 %v7613_v50  ;;  %v7689_v49 = vld [vmem:[#allocation20 + $0x740] ss:$76 sps:$4 sm:$0xff]   ;;  %v7692_v50 = vld [vmem:[#allocation20 + $0x748] ss:$76 sps:$4 sm:$0xff]  }
 0x620   :  { %5404 = vmatprep.subr.bf16.mxu1 %v7616_v51  ;;  %v7697_v51 = vld [vmem:[#allocation20 + $0x7dc] ss:$76 sps:$4 sm:$0xff]  }
 0x622   :  { %5319 = vmatpush1.bf16.msra.mxu0 %v7611_v52  ;;  %v7700_v52 = vld [vmem:[#allocation20 + $0x7e4] ss:$76 sps:$4 sm:$0xff]  }
 0x623   :  { %5405 = vmatpush1.bf16.msra.mxu1 %v7614_v53  ;;  %5417 = vmatprep.subr.bf16.mxu0 %v7619_v54  ;;  %v7695_v53 = vld [vmem:[#allocation20 + $0x7d8] ss:$76 sps:$4 sm:$0xff]   ;;  %v7698_v54 = vld [vmem:[#allocation20 + $0x7e0] ss:$76 sps:$4 sm:$0xff]  }
 0x624   :  { %5503 = vmatprep.subr.bf16.mxu1 %v7622_v55  ;;  %v7703_v55 = vld [vmem:[#allocation20 + $0x874] ss:$76 sps:$4 sm:$0xff]  }
 0x625   :  { %5321 = vmatmul.mubr.bf16.vlgmr.msra.gmra.mrb[12].mxu0 %v8862_v22 }
 0x626   :  { %5407 = vmatmul.mubr.bf16.vlgmr.msra.gmra.mrb[20].mxu1 %v8862_v22  ;;  %5418 = vmatpush1.bf16.msra.mxu0 %v7617_v56  ;;  %v7706_v56 = vld [vmem:[#allocation20 + $0x87c] ss:$76 sps:$4 sm:$0xff]  }
 0x627   :  { %5449 = vmatprep.mubr.bf16.mxu0 %v8864_v25  ;;  %5504 = vmatpush1.bf16.msra.mxu1 %v7620_v57  ;;  %v7701_v57 = vld [vmem:[#allocation20 + $0x870] ss:$76 sps:$4 sm:$0xff]  }
 0x628   :  { %5535 = vmatprep.mubr.bf16.mxu1 %v8864_v25  ;;  %5419 = vmatprep.subr.bf16.mxu0 %v7625_v58  ;;  %v7704_v58 = vld [vmem:[#allocation20 + $0x878] ss:$76 sps:$4 sm:$0xff]  }
 0x629   :  { %5505 = vmatprep.subr.bf16.mxu1 %v7628_v59  ;;  %v7709_v59 = vld [vmem:[#allocation20 + $0x90c] ss:$76 sps:$4 sm:$0xff]  }
 0x62a   :  { %5420 = vmatpush1.bf16.msra.mxu0 %v7623_v60  ;;  %v7712_v60 = vld [vmem:[#allocation20 + $0x914] ss:$76 sps:$4 sm:$0xff]  }
 0x62b   :  { %5506 = vmatpush1.bf16.msra.mxu1 %v7626_v61  ;;  %5421 = vmatprep.subr.bf16.mxu0 %v7631_v62  ;;  %v7707_v61 = vld [vmem:[#allocation20 + $0x908] ss:$76 sps:$4 sm:$0xff]   ;;  %v7710_v62 = vld [vmem:[#allocation20 + $0x910] ss:$76 sps:$4 sm:$0xff]  }
 0x62c   :  { %5507 = vmatprep.subr.bf16.mxu1 %v7634_v63  ;;  %v7715_v63 = vld [vmem:[#allocation20 + $0x9a4] ss:$76 sps:$4 sm:$0xff]  }
 0x62e   :  { %5422 = vmatpush1.bf16.msra.mxu0 %v7629_v0  ;;  %v7718_v0 = vld [vmem:[#allocation20 + $0x9ac] ss:$76 sps:$4 sm:$0xff]  }
 0x62f   :  { %5508 = vmatpush1.bf16.msra.mxu1 %v7632_v1  ;;  %5423 = vmatprep.subr.bf16.mxu0 %v7637_v2  ;;  %v7713_v1 = vld [vmem:[#allocation20 + $0x9a0] ss:$76 sps:$4 sm:$0xff]   ;;  %v7716_v2 = vld [vmem:[#allocation20 + $0x9a8] ss:$76 sps:$4 sm:$0xff]  }
 0x630   :  { %5509 = vmatprep.subr.bf16.mxu1 %v7640_v3  ;;  %v7721_v3 = vld [vmem:[#allocation20 + $0xa3c] ss:$76 sps:$4 sm:$0xff]  }
 0x632   :  { %5424 = vmatpush1.bf16.msra.mxu0 %v7635_v4  ;;  %v7724_v4 = vld [vmem:[#allocation20 + $0xa44] ss:$76 sps:$4 sm:$0xff]  }
 0x633   :  { %5510 = vmatpush1.bf16.msra.mxu1 %v7638_v5  ;;  %5425 = vmatprep.subr.bf16.mxu0 %v7643_v6  ;;  %v7719_v5 = vld [vmem:[#allocation20 + $0xa38] ss:$76 sps:$4 sm:$0xff]   ;;  %v7722_v6 = vld [vmem:[#allocation20 + $0xa40] ss:$76 sps:$4 sm:$0xff]  }
 0x634   :  { %5511 = vmatprep.subr.bf16.mxu1 %v7646_v7  ;;  %v7727_v7 = vld [vmem:[#allocation20 + $0xad4] ss:$76 sps:$4 sm:$0xff]  }
 0x636   :  { %5426 = vmatpush1.bf16.msra.mxu0 %v7641_v8  ;;  %v7730_v8 = vld [vmem:[#allocation20 + $0xadc] ss:$76 sps:$4 sm:$0xff]  }
 0x637   :  { %5512 = vmatpush1.bf16.msra.mxu1 %v7644_v9  ;;  %5427 = vmatprep.subr.bf16.mxu0 %v7649_v10  ;;  %v7725_v9 = vld [vmem:[#allocation20 + $0xad0] ss:$76 sps:$4 sm:$0xff]   ;;  %v7728_v10 = vld [vmem:[#allocation20 + $0xad8] ss:$76 sps:$4 sm:$0xff]  }
 0x638   :  { %5513 = vmatprep.subr.bf16.mxu1 %v7652_v11  ;;  %v7733_v11 = vld [vmem:[#allocation20 + $0xb6c] ss:$76 sps:$4 sm:$0xff]  }
 0x63a   :  { %5428 = vmatpush1.bf16.msra.mxu0 %v7647_v12  ;;  %v7736_v12 = vld [vmem:[#allocation20 + $0xb74] ss:$76 sps:$4 sm:$0xff]  }
 0x63b   :  { %5514 = vmatpush1.bf16.msra.mxu1 %v7650_v13  ;;  %5429 = vmatprep.subr.bf16.mxu0 %v7655_v14  ;;  %v7731_v13 = vld [vmem:[#allocation20 + $0xb68] ss:$76 sps:$4 sm:$0xff]   ;;  %v7734_v14 = vld [vmem:[#allocation20 + $0xb70] ss:$76 sps:$4 sm:$0xff]  }
 0x63c   :  { %5515 = vmatprep.subr.bf16.mxu1 %v7658_v15  ;;  %v7739_v15 = vld [vmem:[#allocation20 + $0xc04] ss:$76 sps:$4 sm:$0xff]  }
 0x63e   :  { %5430 = vmatpush1.bf16.msra.mxu0 %v7653_v16  ;;  %v7742_v16 = vld [vmem:[#allocation20 + $0xc0c] ss:$76 sps:$4 sm:$0xff]  }
 0x63f   :  { %5516 = vmatpush1.bf16.msra.mxu1 %v7656_v17  ;;  %5431 = vmatprep.subr.bf16.mxu0 %v7661_v23  ;;  %v7737_v17 = vld [vmem:[#allocation20 + $0xc00] ss:$76 sps:$4 sm:$0xff]  }
 0x640   :  { %5517 = vmatprep.subr.bf16.mxu1 %v7664_v24  ;;  %v8890_v23 = vld [vmem:[#allocation22] sm:$0xff]  ;;  %v7740_v24 = vld [vmem:[#allocation20 + $0xc08] ss:$76 sps:$4 sm:$0xff]  }
 0x642   :  { %5432 = vmatpush1.bf16.msra.mxu0 %v7659_v27  ;;  %v7745_v27 = vld [vmem:[#allocation20 + $0xc9c] ss:$76 sps:$4 sm:$0xff]  }
 0x643   :  { %5518 = vmatpush1.bf16.msra.mxu1 %v7662_v28  ;;  %5433 = vmatprep.subr.bf16.mxu0 %v7667_v29  ;;  %v7748_v28 = vld [vmem:[#allocation20 + $0xca4] ss:$76 sps:$4 sm:$0xff]   ;;  %v1909_v29 = vrot.slane %v8890_v23, %v8841_v19 }
 0x644   :  { %5519 = vmatprep.subr.bf16.mxu1 %v7670_v30  ;;  %v1917_v30 = vrot.slane %v8890_v23, %v8849_v45 }
 0x646   :  { %5434 = vmatpush1.bf16.msra.mxu0 %v7665_v31  ;;  %v1913_v31 = vrot.slane %v8890_v23, %v8844_v21 }
 0x647   :  { %5520 = vmatpush1.bf16.msra.mxu1 %v7668_v32  ;;  %5435 = vmatprep.subr.bf16.mxu0 %v7673_v33  ;;  %v8900_v32 = vrot.slane %v8890_v23, %v8852_v47  ;;  %v7743_v33 = vld [vmem:[#allocation20 + $0xc98] ss:$76 sps:$4 sm:$0xff]  }
 0x648   :  { %5521 = vmatprep.subr.bf16.mxu1 %v7676_v34  ;;  %v7746_v34 = vld [vmem:[#allocation20 + $0xca0] ss:$76 sps:$4 sm:$0xff]  }
 0x64a   :  { %5436 = vmatpush1.bf16.msra.mxu0 %v7671_v35  ;;  %v7751_v35 = vld [vmem:[#allocation20 + $0xd34] ss:$76 sps:$4 sm:$0xff]  }
 0x64b   :  { %5522 = vmatpush1.bf16.msra.mxu1 %v7674_v36  ;;  %5437 = vmatprep.subr.bf16.mxu0 %v7679_v37 }
 0x64c   :  { %5523 = vmatprep.subr.bf16.mxu1 %v7682_v38  ;;  %v7754_v38 = vld [vmem:[#allocation20 + $0xd3c] ss:$76 sps:$4 sm:$0xff]  }
 0x64e   :  { %5438 = vmatpush1.bf16.msra.mxu0 %v7677_v39 }
 0x64f   :  { %5524 = vmatpush1.bf16.msra.mxu1 %v7680_v40  ;;  %5439 = vmatprep.subr.bf16.mxu0 %v7685_v41 }
 0x650   :  { %5525 = vmatprep.subr.bf16.mxu1 %v7688_v42 }
 0x652   :  { %5440 = vmatpush1.bf16.msra.mxu0 %v7683_v43  ;;  %v7749_v43 = vld [vmem:[#allocation20 + $0xd30] ss:$76 sps:$4 sm:$0xff]  }
 0x653   :  { %5526 = vmatpush1.bf16.msra.mxu1 %v7686_v44  ;;  %5441 = vmatprep.subr.bf16.mxu0 %v7691_v46  ;;  %v7752_v44 = vld [vmem:[#allocation20 + $0xd38] ss:$76 sps:$4 sm:$0xff]  }
 0x654   :  { %5527 = vmatprep.subr.bf16.mxu1 %v7694_v48 }
 0x656   :  { %5442 = vmatpush1.bf16.msra.mxu0 %v7689_v49 }
 0x657   :  { %5528 = vmatpush1.bf16.msra.mxu1 %v7692_v50  ;;  %5443 = vmatprep.subr.bf16.mxu0 %v7697_v51  ;;  %v7757_v51 = vld [vmem:[#allocation20 + $0xdcc] ss:$76 sps:$4 sm:$0xff]  }
 0x658   :  { %5529 = vmatprep.subr.bf16.mxu1 %v7700_v52  ;;  %v7760_v52 = vld [vmem:[#allocation20 + $0xdd4] ss:$76 sps:$4 sm:$0xff]  }
 0x65a   :  { %5444 = vmatpush1.bf16.msra.mxu0 %v7695_v53 }
 0x65b   :  { %5530 = vmatpush1.bf16.msra.mxu1 %v7698_v54  ;;  %5445 = vmatprep.subr.bf16.mxu0 %v7703_v55 }
 0x65c   :  { %5531 = vmatprep.subr.bf16.mxu1 %v7706_v56 }
 0x65e   :  { %5446 = vmatpush1.bf16.msra.mxu0 %v7701_v57 }
 0x65f   :  { %5532 = vmatpush1.bf16.msra.mxu1 %v7704_v58  ;;  %5447 = vmatprep.subr.bf16.mxu0 %v7709_v59 }
 0x660   :  { %5533 = vmatprep.subr.bf16.mxu1 %v7712_v60 }
 0x662   :  { %5448 = vmatpush1.bf16.msra.mxu0 %v7707_v61 }
 0x663   :  { %5534 = vmatpush1.bf16.msra.mxu1 %v7710_v62  ;;  %5460 = vmatprep.subr.bf16.mxu0 %v7715_v63 }
 0x664   :  { %5546 = vmatprep.subr.bf16.mxu1 %v7718_v0 }
 0x665   :  { %5450 = vmatmul.mubr.bf16.vlgmr.msra.gmra.mrb[16].mxu0 %v8860_v20 }
 0x666   :  { %5536 = vmatmul.mubr.bf16.vlgmr.msra.gmra.mrb[24].mxu1 %v8860_v20  ;;  %5461 = vmatpush1.bf16.msra.mxu0 %v7713_v1 }
 0x667   :  { %5492 = vmatprep.mubr.bf16.mxu0 %v8866_v26  ;;  %5547 = vmatpush1.bf16.msra.mxu1 %v7716_v2  ;;  %v7755_v2 = vld [vmem:[#allocation20 + $0xdc8] ss:$76 sps:$4 sm:$0xff]  }
 0x668   :  { %5578 = vmatprep.mubr.bf16.mxu1 %v8866_v26  ;;  %5462 = vmatprep.subr.bf16.mxu0 %v7721_v3  ;;  %v7758_v3 = vld [vmem:[#allocation20 + $0xdd0] ss:$76 sps:$4 sm:$0xff]  }
 0x669   :  { %5548 = vmatprep.subr.bf16.mxu1 %v7724_v4  ;;  %v7763_v4 = vld [vmem:[#allocation20 + $0xe64] ss:$76 sps:$4 sm:$0xff]  }
 0x66a   :  { %5463 = vmatpush1.bf16.msra.mxu0 %v7719_v5 }
 0x66b   :  { %5549 = vmatpush1.bf16.msra.mxu1 %v7722_v6  ;;  %5464 = vmatprep.subr.bf16.mxu0 %v7727_v7  ;;  %v7766_v6 = vld [vmem:[#allocation20 + $0xe6c] ss:$76 sps:$4 sm:$0xff]  }
 0x66c   :  { %5550 = vmatprep.subr.bf16.mxu1 %v7730_v8 }
 0x66e   :  { %5465 = vmatpush1.bf16.msra.mxu0 %v7725_v9 }
 0x66f   :  { %5551 = vmatpush1.bf16.msra.mxu1 %v7728_v10  ;;  %5466 = vmatprep.subr.bf16.mxu0 %v7733_v11 }
 0x670   :  { %5552 = vmatprep.subr.bf16.mxu1 %v7736_v12 }
 0x672   :  { %5467 = vmatpush1.bf16.msra.mxu0 %v7731_v13  ;;  %v7761_v13 = vld [vmem:[#allocation20 + $0xe60] ss:$76 sps:$4 sm:$0xff]  }
 0x673   :  { %5553 = vmatpush1.bf16.msra.mxu1 %v7734_v14  ;;  %5468 = vmatprep.subr.bf16.mxu0 %v7739_v15  ;;  %v7764_v14 = vld [vmem:[#allocation20 + $0xe68] ss:$76 sps:$4 sm:$0xff]  }
 0x674   :  { %5554 = vmatprep.subr.bf16.mxu1 %v7742_v16  ;;  %v7769_v16 = vld [vmem:[#allocation20 + $0xefc] ss:$76 sps:$4 sm:$0xff]  }
 0x676   :  { %5469 = vmatpush1.bf16.msra.mxu0 %v7737_v17  ;;  %v7772_v17 = vld [vmem:[#allocation20 + $0xf04] ss:$76 sps:$4 sm:$0xff]  }
 0x677   :  { %5555 = vmatpush1.bf16.msra.mxu1 %v7740_v24  ;;  %5470 = vmatprep.subr.bf16.mxu0 %v7745_v27  ;;  %v7767_v27 = vld [vmem:[#allocation20 + $0xef8] ss:$76 sps:$4 sm:$0xff]  }
 0x678   :  { %v5150_v36 = vpop.f32.mrb[8].mxu0  ;;  %v5236_v37 = vpop.f32.mrb[16].mxu1  ;;  %5556 = vmatprep.subr.bf16.mxu1 %v7748_v28  ;;  %v7770_v28 = vld [vmem:[#allocation20 + $0xf00] ss:$76 sps:$4 sm:$0xff]  }
 0x679   :  { %v6989_v39 = vadd.f32 %v5150_v36, %v1909_v29  ;;  %v6993_v40 = vadd.f32 %v5236_v37, %v1917_v30  ;;  %v5152_v41 = vpop.f32.mrb[9].mxu0  ;;  %v5238_v42 = vpop.f32.mrb[17].mxu1  ;;  %v7776_v36 = vld [vmem:[#allocation20 + $0xf98] ss:$76 sps:$4 sm:$0xff]  }
 0x67a   :  { %v6990_v46 = vadd.f32 %v5152_v41, %v1913_v31  ;;  %v6994_v48 = vadd.f32 %v5238_v42, %v8900_v32  ;;  %v5154_v49 = vpop.f32.mrb[10].mxu0  ;;  %v5240_v50 = vpop.f32.mrb[18].mxu1  ;;  %5471 = vmatpush1.bf16.msra.mxu0 %v7743_v33  ;;  %v7781_v37 = vld [vmem:[#allocation20 + $0x102c] ss:$76 sps:$4 sm:$0xff]   ;;  %v7779_v42 = vld [vmem:[#allocation20 + $0x1028] ss:$76 sps:$4 sm:$0xff]  }
 0x67b   :  { %vm5929_vm3 = vcmp.gt.f32.partialorder %v6989_v39, 0.0  ;;  %v5967_v53 = vmul.f32 0.2, %v6989_v39  ;;  %vm5931_vm4 = vcmp.gt.f32.partialorder %v6993_v40, 0.0  ;;  %v5969_v54 = vmul.f32 0.2, %v6993_v40  ;;  %5557 = vmatpush1.bf16.msra.mxu1 %v7746_v34  ;;  %5472 = vmatprep.subr.bf16.mxu0 %v7751_v35 }
 0x67c   :  { %vm5930_vm5 = vcmp.gt.f32.partialorder %v6990_v46, 0.0  ;;  %v5968_v55 = vmul.f32 0.2, %v6990_v46  ;;  %vm5932_vm6 = vcmp.gt.f32.partialorder %v6994_v48, 0.0  ;;  %v5970_v56 = vmul.f32 0.2, %v6994_v48  ;;  %5558 = vmatprep.subr.bf16.mxu1 %v7754_v38 }
 0x67d   :  { %v6005_v57 = vsel %vm5929_vm3, %v6989_v39, %v5967_v53  ;;  %v6007_v58 = vsel %vm5931_vm4, %v6993_v40, %v5969_v54  ;;  %v6991_v59 = vadd.f32 %v5154_v49, %v1909_v29  ;;  %v6995_v60 = vadd.f32 %v5240_v50, %v1917_v30  ;;  %v5156_v61 = vpop.f32.mrb[11].mxu0  ;;  %v5242_v62 = vpop.f32.mrb[19].mxu1  ;;  %v7775_v29 = vld [vmem:[#allocation20 + $0xf94] ss:$76 sps:$4 sm:$0xff]   ;;  %v7773_v34 = vld [vmem:[#allocation20 + $0xf90] ss:$76 sps:$4 sm:$0xff]  }
 0x67e   :  { %8129 = vtanh.f32 %v6005_v57  ;;  %v6006_v63 = vsel %vm5930_vm5, %v6990_v46, %v5968_v55  ;;  %v6008_v0 = vsel %vm5932_vm6, %v6994_v48, %v5970_v56  ;;  %v6992_v1 = vadd.f32 %v5156_v61, %v1913_v31  ;;  %5473 = vmatpush1.bf16.msra.mxu0 %v7749_v43  ;;  %v7778_v31 = vld [vmem:[#allocation20 + $0xf9c] ss:$76 sps:$4 sm:$0xff]   ;;  %v7784_v39 = vld [vmem:[#allocation20 + $0x1034] ss:$76 sps:$4 sm:$0xff]   ;;  %v7790_v48 = vld [vmem:[#allocation20 + $0x10cc] ss:$76 sps:$4 sm:$0xff]  }
 0x67f   :  { %8131 = vtanh.f32 %v6007_v58  ;;  %vm5948_vm7 = vcmp.gt.f32.partialorder %v6991_v59, 0.0  ;;  %v5986_v5 = vmul.f32 0.2, %v6991_v59  ;;  %vm5950_vm8 = vcmp.gt.f32.partialorder %v6995_v60, 0.0  ;;  %5559 = vmatpush1.bf16.msra.mxu1 %v7752_v44  ;;  %5474 = vmatprep.subr.bf16.mxu0 %v7757_v51  ;;  %v7782_v43 = vld [vmem:[#allocation20 + $0x1030] ss:$76 sps:$4 sm:$0xff]  }
 0x680   :  { %8133 = vtanh.f32 %v6006_v63  ;;  %v5988_v7 = vmul.f32 0.2, %v6995_v60  ;;  %vm5949_vm9 = vcmp.gt.f32.partialorder %v6992_v1, 0.0  ;;  %v5987_v8 = vmul.f32 0.2, %v6992_v1  ;;  %5560 = vmatprep.subr.bf16.mxu1 %v7760_v52 }
 0x681   :  { %8135 = vtanh.f32 %v6008_v0  ;;  %v6024_v9 = vsel %vm5948_vm7, %v6991_v59, %v5986_v5  ;;  %v6996_v10 = vadd.f32 %v5242_v62, %v8900_v32  ;;  %v7787_v44 = vld [vmem:[#allocation20 + $0x10c4] ss:$76 sps:$4 sm:$0xff]   ;;  %v7785_v49 = vld [vmem:[#allocation20 + $0x10c0] ss:$76 sps:$4 sm:$0xff]   ;;  %v7788_v50 = vld [vmem:[#allocation20 + $0x10c8] ss:$76 sps:$4 sm:$0xff]  }
 0x682   :  { %8137 = vtanh.f32 %v6024_v9  ;;  %v6026_v11 = vsel %vm5950_vm8, %v6995_v60, %v5988_v7  ;;  %v6025_v12 = vsel %vm5949_vm9, %v6992_v1, %v5987_v8  ;;  %5475 = vmatpush1.bf16.msra.mxu0 %v7755_v2  ;;  %v7793_v51 = vld [vmem:[#allocation20 + $0x115c] ss:$76 sps:$4 sm:$0xff]   ;;  %v7796_v52 = vld [vmem:[#allocation20 + $0x1164] ss:$76 sps:$4 sm:$0xff]   ;;  %v7794_v54 = vld [vmem:[#allocation20 + $0x1160] ss:$76 sps:$4 sm:$0xff]  }
 0x683   :  { %8139 = vtanh.f32 %v6026_v11  ;;  %vm5951_vm10 = vcmp.gt.f32.partialorder %v6996_v10, 0.0  ;;  %v5989_v15 = vmul.f32 0.2, %v6996_v10  ;;  %5561 = vmatpush1.bf16.msra.mxu1 %v7758_v3  ;;  %5476 = vmatprep.subr.bf16.mxu0 %v7763_v4  ;;  %v7791_v53 = vld [vmem:[#allocation20 + $0x1158] ss:$76 sps:$4 sm:$0xff]  }
 0x684   :  { %8141 = vtanh.f32 %v6025_v12  ;;  %5562 = vmatprep.subr.bf16.mxu1 %v7766_v6  ;;  %v7799_v55 = vld [vmem:[#allocation20 + $0x11f4] ss:$76 sps:$4 sm:$0xff]   ;;  %v7802_v56 = vld [vmem:[#allocation20 + $0x11fc] ss:$76 sps:$4 sm:$0xff]   ;;  %v7800_v58 = vld [vmem:[#allocation20 + $0x11f8] ss:$76 sps:$4 sm:$0xff]  }
 0x685   :  { %v6027_v24 = vsel %vm5951_vm10, %v6996_v10, %v5989_v15  ;;  %v7797_v57 = vld [vmem:[#allocation20 + $0x11f0] ss:$76 sps:$4 sm:$0xff]   ;;  %v7805_v59 = vld [vmem:[#allocation20 + $0x128c] ss:$76 sps:$4 sm:$0xff]   ;;  %v7808_v60 = vld [vmem:[#allocation20 + $0x1294] ss:$76 sps:$4 sm:$0xff]  }
 0x686   :  { %8143 = vtanh.f32 %v6027_v24  ;;  %5477 = vmatpush1.bf16.msra.mxu0 %v7761_v13  ;;  %v7803_v61 = vld [vmem:[#allocation20 + $0x1288] ss:$76 sps:$4 sm:$0xff]   ;;  %v7806_v62 = vld [vmem:[#allocation20 + $0x1290] ss:$76 sps:$4 sm:$0xff]   ;;  %v7812_v2 = vld [vmem:[#allocation20 + $0x38] ss:$76 sps:$4 sm:$0xff]  }
 0x687   :  { %5563 = vmatpush1.bf16.msra.mxu1 %v7764_v14  ;;  %5478 = vmatprep.subr.bf16.mxu0 %v7769_v16  ;;  %v7811_v63 = vld [vmem:[#allocation20 + $0x34] ss:$76 sps:$4 sm:$0xff]   ;;  %v7814_v0 = vld [vmem:[#allocation20 + $0x3c] ss:$76 sps:$4 sm:$0xff]   ;;  %v7817_v3 = vld [vmem:[#allocation20 + $0xcc] ss:$76 sps:$4 sm:$0xff]  }
 0x688   :  { %v8130_v30 = vpop.eup %8129  ;;  %5564 = vmatprep.subr.bf16.mxu1 %v7772_v17  ;;  %v7809_v1 = vld [vmem:[#allocation20 + $0x30] ss:$76 sps:$4 sm:$0xff]   ;;  %v7820_v4 = vld [vmem:[#allocation20 + $0xd4] ss:$76 sps:$4 sm:$0xff]   ;;  %v7826_v8 = vld [vmem:[#allocation20 + $0x16c] ss:$76 sps:$4 sm:$0xff]  }
 0x689   :  { %v8132_v32 = vpop.eup %8131  ;;  %6081 = vst [vmem:[#allocation23] sm:$0xff] %v8130_v30  ;;  %v7815_v5 = vld [vmem:[#allocation20 + $0xc8] ss:$76 sps:$4 sm:$0xff]   ;;  %v7818_v6 = vld [vmem:[#allocation20 + $0xd0] ss:$76 sps:$4 sm:$0xff]  }
 0x68a   :  { %v8134_v33 = vpop.eup %8133  ;;  %6083 = vst [vmem:[#allocation23 + $0x10] sm:$0xff] %v8132_v32  ;;  %5479 = vmatpush1.bf16.msra.mxu0 %v7767_v27  ;;  %v7823_v7 = vld [vmem:[#allocation20 + $0x164] ss:$76 sps:$4 sm:$0xff]   ;;  %v7821_v9 = vld [vmem:[#allocation20 + $0x160] ss:$76 sps:$4 sm:$0xff]  }
 0x68b   :  { %v8136_v35 = vpop.eup %8135  ;;  %6082 = vst [vmem:[#allocation23 + $0x8] sm:$0xff] %v8134_v33  ;;  %5565 = vmatpush1.bf16.msra.mxu1 %v7770_v28  ;;  %5480 = vmatprep.subr.bf16.mxu0 %v7775_v29  ;;  %v7824_v10 = vld [vmem:[#allocation20 + $0x168] ss:$76 sps:$4 sm:$0xff]   ;;  %v7832_v12 = vld [vmem:[#allocation20 + $0x204] ss:$76 sps:$4 sm:$0xff]  }
 0x68c   :  { %v8138_v38 = vpop.eup %8137  ;;  %6084 = vst [vmem:[#allocation23 + $0x18] sm:$0xff] %v8136_v35  ;;  %5566 = vmatprep.subr.bf16.mxu1 %v7778_v31  ;;  %v7829_v11 = vld [vmem:[#allocation20 + $0x1fc] ss:$76 sps:$4 sm:$0xff]   ;;  %v7827_v13 = vld [vmem:[#allocation20 + $0x1f8] ss:$76 sps:$4 sm:$0xff]  }
 0x68d   :  { %v8140_v40 = vpop.eup %8139  ;;  %6100 = vst [vmem:[#allocation23 + $0x98] sm:$0xff] %v8138_v38  ;;  %v7830_v14 = vld [vmem:[#allocation20 + $0x200] ss:$76 sps:$4 sm:$0xff]   ;;  %v7838_v16 = vld [vmem:[#allocation20 + $0x29c] ss:$76 sps:$4 sm:$0xff]  }
 0x68e   :  { %v8142_v41 = vpop.eup %8141  ;;  %6102 = vst [vmem:[#allocation23 + $0xa8] sm:$0xff] %v8140_v40  ;;  %5481 = vmatpush1.bf16.msra.mxu0 %v7773_v34  ;;  %v7835_v15 = vld [vmem:[#allocation20 + $0x294] ss:$76 sps:$4 sm:$0xff]   ;;  %v7833_v17 = vld [vmem:[#allocation20 + $0x290] ss:$76 sps:$4 sm:$0xff]  }
 0x68f   :  { %6101 = vst [vmem:[#allocation23 + $0xa0] sm:$0xff] %v8142_v41  ;;  %5567 = vmatpush1.bf16.msra.mxu1 %v7776_v36  ;;  %5482 = vmatprep.subr.bf16.mxu0 %v7781_v37  ;;  %v7836_v24 = vld [vmem:[#allocation20 + $0x298] ss:$76 sps:$4 sm:$0xff]   ;;  %v7844_v28 = vld [vmem:[#allocation20 + $0x334] ss:$76 sps:$4 sm:$0xff]  }
 0x690   :  { %v8144_v46 = vpop.eup %8143  ;;  %5568 = vmatprep.subr.bf16.mxu1 %v7784_v39  ;;  %v7841_v27 = vld [vmem:[#allocation20 + $0x32c] ss:$76 sps:$4 sm:$0xff]   ;;  %v7839_v29 = vld [vmem:[#allocation20 + $0x328] ss:$76 sps:$4 sm:$0xff]   ;;  %v7842_v30 = vld [vmem:[#allocation20 + $0x330] ss:$76 sps:$4 sm:$0xff]  }
 0x691   :  { %6103 = vst [vmem:[#allocation23 + $0xb0] sm:$0xff] %v8144_v46  ;;  %v7847_v31 = vld [vmem:[#allocation20 + $0x3c4] ss:$76 sps:$4 sm:$0xff]   ;;  %v7850_v32 = vld [vmem:[#allocation20 + $0x3cc] ss:$76 sps:$4 sm:$0xff]  }
 0x692   :  { %5483 = vmatpush1.bf16.msra.mxu0 %v7779_v42  ;;  %v7845_v33 = vld [vmem:[#allocation20 + $0x3c0] ss:$76 sps:$4 sm:$0xff]   ;;  %v7848_v34 = vld [vmem:[#allocation20 + $0x3c8] ss:$76 sps:$4 sm:$0xff]   ;;  %v7856_v36 = vld [vmem:[#allocation20 + $0x464] ss:$76 sps:$4 sm:$0xff]  }
 0x693   :  { %5569 = vmatpush1.bf16.msra.mxu1 %v7782_v43  ;;  %5484 = vmatprep.subr.bf16.mxu0 %v7787_v44  ;;  %v7853_v35 = vld [vmem:[#allocation20 + $0x45c] ss:$76 sps:$4 sm:$0xff]   ;;  %v7851_v37 = vld [vmem:[#allocation20 + $0x458] ss:$76 sps:$4 sm:$0xff]   ;;  %v7854_v38 = vld [vmem:[#allocation20 + $0x460] ss:$76 sps:$4 sm:$0xff]  }
 0x694   :  { %5570 = vmatprep.subr.bf16.mxu1 %v7790_v48  ;;  %v7859_v39 = vld [vmem:[#allocation20 + $0x4f4] ss:$76 sps:$4 sm:$0xff]   ;;  %v7862_v40 = vld [vmem:[#allocation20 + $0x4fc] ss:$76 sps:$4 sm:$0xff]   ;;  %v7860_v42 = vld [vmem:[#allocation20 + $0x4f8] ss:$76 sps:$4 sm:$0xff]  }
 0x695   :  { %v7857_v41 = vld [vmem:[#allocation20 + $0x4f0] ss:$76 sps:$4 sm:$0xff]   ;;  %v7865_v43 = vld [vmem:[#allocation20 + $0x58c] ss:$76 sps:$4 sm:$0xff]   ;;  %v7868_v44 = vld [vmem:[#allocation20 + $0x594] ss:$76 sps:$4 sm:$0xff]  }
 0x696   :  { %5485 = vmatpush1.bf16.msra.mxu0 %v7785_v49  ;;  %v7863_v46 = vld [vmem:[#allocation20 + $0x588] ss:$76 sps:$4 sm:$0xff]   ;;  %v7866_v48 = vld [vmem:[#allocation20 + $0x590] ss:$76 sps:$4 sm:$0xff]  }
 0x697   :  { %5571 = vmatpush1.bf16.msra.mxu1 %v7788_v50  ;;  %5486 = vmatprep.subr.bf16.mxu0 %v7793_v51  ;;  %v7871_v49 = vld [vmem:[#allocation20 + $0x624] ss:$76 sps:$4 sm:$0xff]   ;;  %v7874_v50 = vld [vmem:[#allocation20 + $0x62c] ss:$76 sps:$4 sm:$0xff]  }
 0x698   :  { %5572 = vmatprep.subr.bf16.mxu1 %v7796_v52  ;;  %v7869_v51 = vld [vmem:[#allocation20 + $0x620] ss:$76 sps:$4 sm:$0xff]   ;;  %v7872_v52 = vld [vmem:[#allocation20 + $0x628] ss:$76 sps:$4 sm:$0xff]  }
 0x69a   :  { %5487 = vmatpush1.bf16.msra.mxu0 %v7791_v53  ;;  %v7877_v53 = vld [vmem:[#allocation20 + $0x6bc] ss:$76 sps:$4 sm:$0xff]  }
 0x69b   :  { %5573 = vmatpush1.bf16.msra.mxu1 %v7794_v54  ;;  %5488 = vmatprep.subr.bf16.mxu0 %v7799_v55  ;;  %v7880_v54 = vld [vmem:[#allocation20 + $0x6c4] ss:$76 sps:$4 sm:$0xff]  }
 0x69c   :  { %5574 = vmatprep.subr.bf16.mxu1 %v7802_v56  ;;  %v7875_v55 = vld [vmem:[#allocation20 + $0x6b8] ss:$76 sps:$4 sm:$0xff]   ;;  %v7878_v56 = vld [vmem:[#allocation20 + $0x6c0] ss:$76 sps:$4 sm:$0xff]  }
 0x69e   :  { %5489 = vmatpush1.bf16.msra.mxu0 %v7797_v57  ;;  %v7883_v57 = vld [vmem:[#allocation20 + $0x754] ss:$76 sps:$4 sm:$0xff]  }
 0x69f   :  { %5575 = vmatpush1.bf16.msra.mxu1 %v7800_v58  ;;  %5490 = vmatprep.subr.bf16.mxu0 %v7805_v59  ;;  %v7886_v58 = vld [vmem:[#allocation20 + $0x75c] ss:$76 sps:$4 sm:$0xff]  }
 0x6a0   :  { %5576 = vmatprep.subr.bf16.mxu1 %v7808_v60  ;;  %v7881_v59 = vld [vmem:[#allocation20 + $0x750] ss:$76 sps:$4 sm:$0xff]   ;;  %v7884_v60 = vld [vmem:[#allocation20 + $0x758] ss:$76 sps:$4 sm:$0xff]  }
 0x6a2   :  { %5491 = vmatpush1.bf16.msra.mxu0 %v7803_v61  ;;  %v7889_v61 = vld [vmem:[#allocation20 + $0x7ec] ss:$76 sps:$4 sm:$0xff]  }
 0x6a3   :  { %5577 = vmatpush1.bf16.msra.mxu1 %v7806_v62  ;;  %5589 = vmatprep.subr.bf16.mxu0 %v7811_v63  ;;  %v7892_v62 = vld [vmem:[#allocation20 + $0x7f4] ss:$76 sps:$4 sm:$0xff]  }
 0x6a4   :  { %5675 = vmatprep.subr.bf16.mxu1 %v7814_v0  ;;  %v7887_v63 = vld [vmem:[#allocation20 + $0x7e8] ss:$76 sps:$4 sm:$0xff]   ;;  %v7890_v0 = vld [vmem:[#allocation20 + $0x7f0] ss:$76 sps:$4 sm:$0xff]  }
 0x6a5   :  { %5493 = vmatmul.mubr.bf16.vlgmr.msra.gmra.mrb[16].mxu0 %v8862_v22 }
 0x6a6   :  { %5579 = vmatmul.mubr.bf16.vlgmr.msra.gmra.mrb[24].mxu1 %v8862_v22  ;;  %5590 = vmatpush1.bf16.msra.mxu0 %v7809_v1  ;;  %v7895_v1 = vld [vmem:[#allocation20 + $0x884] ss:$76 sps:$4 sm:$0xff]  }
 0x6a7   :  { %5621 = vmatprep.mubr.bf16.mxu0 %v8864_v25  ;;  %5676 = vmatpush1.bf16.msra.mxu1 %v7812_v2  ;;  %v7898_v2 = vld [vmem:[#allocation20 + $0x88c] ss:$76 sps:$4 sm:$0xff]  }
 0x6a8   :  { %5707 = vmatprep.mubr.bf16.mxu1 %v8864_v25  ;;  %5591 = vmatprep.subr.bf16.mxu0 %v7817_v3  ;;  %v7893_v3 = vld [vmem:[#allocation20 + $0x880] ss:$76 sps:$4 sm:$0xff]  }
 0x6a9   :  { %5677 = vmatprep.subr.bf16.mxu1 %v7820_v4  ;;  %v7896_v4 = vld [vmem:[#allocation20 + $0x888] ss:$76 sps:$4 sm:$0xff]  }
 0x6aa   :  { %5592 = vmatpush1.bf16.msra.mxu0 %v7815_v5  ;;  %v7901_v5 = vld [vmem:[#allocation20 + $0x91c] ss:$76 sps:$4 sm:$0xff]  }
 0x6ab   :  { %5678 = vmatpush1.bf16.msra.mxu1 %v7818_v6  ;;  %5593 = vmatprep.subr.bf16.mxu0 %v7823_v7  ;;  %v7904_v6 = vld [vmem:[#allocation20 + $0x924] ss:$76 sps:$4 sm:$0xff]  }
 0x6ac   :  { %5679 = vmatprep.subr.bf16.mxu1 %v7826_v8  ;;  %v7899_v7 = vld [vmem:[#allocation20 + $0x918] ss:$76 sps:$4 sm:$0xff]   ;;  %v7902_v8 = vld [vmem:[#allocation20 + $0x920] ss:$76 sps:$4 sm:$0xff]  }
 0x6ae   :  { %5594 = vmatpush1.bf16.msra.mxu0 %v7821_v9  ;;  %v7907_v9 = vld [vmem:[#allocation20 + $0x9b4] ss:$76 sps:$4 sm:$0xff]  }
 0x6af   :  { %5680 = vmatpush1.bf16.msra.mxu1 %v7824_v10  ;;  %5595 = vmatprep.subr.bf16.mxu0 %v7829_v11  ;;  %v7910_v10 = vld [vmem:[#allocation20 + $0x9bc] ss:$76 sps:$4 sm:$0xff]  }
 0x6b0   :  { %5681 = vmatprep.subr.bf16.mxu1 %v7832_v12  ;;  %v7905_v11 = vld [vmem:[#allocation20 + $0x9b0] ss:$76 sps:$4 sm:$0xff]   ;;  %v7908_v12 = vld [vmem:[#allocation20 + $0x9b8] ss:$76 sps:$4 sm:$0xff]  }
 0x6b2   :  { %5596 = vmatpush1.bf16.msra.mxu0 %v7827_v13  ;;  %v7913_v13 = vld [vmem:[#allocation20 + $0xa4c] ss:$76 sps:$4 sm:$0xff]  }
 0x6b3   :  { %5682 = vmatpush1.bf16.msra.mxu1 %v7830_v14  ;;  %5597 = vmatprep.subr.bf16.mxu0 %v7835_v15  ;;  %v7916_v14 = vld [vmem:[#allocation20 + $0xa54] ss:$76 sps:$4 sm:$0xff]  }
 0x6b4   :  { %5683 = vmatprep.subr.bf16.mxu1 %v7838_v16  ;;  %v7911_v15 = vld [vmem:[#allocation20 + $0xa48] ss:$76 sps:$4 sm:$0xff]   ;;  %v7914_v16 = vld [vmem:[#allocation20 + $0xa50] ss:$76 sps:$4 sm:$0xff]  }
 0x6b6   :  { %5598 = vmatpush1.bf16.msra.mxu0 %v7833_v17  ;;  %v7919_v17 = vld [vmem:[#allocation20 + $0xae4] ss:$76 sps:$4 sm:$0xff]  }
 0x6b7   :  { %5684 = vmatpush1.bf16.msra.mxu1 %v7836_v24  ;;  %5599 = vmatprep.subr.bf16.mxu0 %v7841_v27  ;;  %v7922_v24 = vld [vmem:[#allocation20 + $0xaec] ss:$76 sps:$4 sm:$0xff]  }
 0x6b8   :  { %5685 = vmatprep.subr.bf16.mxu1 %v7844_v28  ;;  %v7917_v27 = vld [vmem:[#allocation20 + $0xae0] ss:$76 sps:$4 sm:$0xff]   ;;  %v7920_v28 = vld [vmem:[#allocation20 + $0xae8] ss:$76 sps:$4 sm:$0xff]  }
 0x6ba   :  { %5600 = vmatpush1.bf16.msra.mxu0 %v7839_v29  ;;  %v7925_v29 = vld [vmem:[#allocation20 + $0xb7c] ss:$76 sps:$4 sm:$0xff]  }
 0x6bb   :  { %5686 = vmatpush1.bf16.msra.mxu1 %v7842_v30  ;;  %5601 = vmatprep.subr.bf16.mxu0 %v7847_v31  ;;  %v7928_v30 = vld [vmem:[#allocation20 + $0xb84] ss:$76 sps:$4 sm:$0xff]  }
 0x6bc   :  { %5687 = vmatprep.subr.bf16.mxu1 %v7850_v32  ;;  %v7923_v31 = vld [vmem:[#allocation20 + $0xb78] ss:$76 sps:$4 sm:$0xff]   ;;  %v7926_v32 = vld [vmem:[#allocation20 + $0xb80] ss:$76 sps:$4 sm:$0xff]  }
 0x6be   :  { %5602 = vmatpush1.bf16.msra.mxu0 %v7845_v33  ;;  %v7931_v33 = vld [vmem:[#allocation20 + $0xc14] ss:$76 sps:$4 sm:$0xff]  }
 0x6bf   :  { %5688 = vmatpush1.bf16.msra.mxu1 %v7848_v34  ;;  %5603 = vmatprep.subr.bf16.mxu0 %v7853_v35  ;;  %v7934_v34 = vld [vmem:[#allocation20 + $0xc1c] ss:$76 sps:$4 sm:$0xff]   ;;  %v1924_v35 = vsub.s32 4, %v8838_v18 }
 0x6c0   :  { %5689 = vmatprep.subr.bf16.mxu1 %v7856_v36  ;;  %v7929_v36 = vld [vmem:[#allocation20 + $0xc10] ss:$76 sps:$4 sm:$0xff]  }
 0x6c2   :  { %5604 = vmatpush1.bf16.msra.mxu0 %v7851_v37  ;;  %v1932_v37 = vsub.s32 6, %v8838_v18 }
 0x6c3   :  { %5690 = vmatpush1.bf16.msra.mxu1 %v7854_v38  ;;  %5605 = vmatprep.subr.bf16.mxu0 %v7859_v39  ;;  %v1928_v38 = vsub.s32 5, %v8838_v18  ;;  %v7932_v39 = vld [vmem:[#allocation20 + $0xc18] ss:$76 sps:$4 sm:$0xff]  }
 0x6c4   :  { %5691 = vmatprep.subr.bf16.mxu1 %v7862_v40  ;;  %v1936_v40 = vsub.s32 7, %v8838_v18 }
 0x6c6   :  { %5606 = vmatpush1.bf16.msra.mxu0 %v7857_v41  ;;  %v7937_v41 = vld [vmem:[#allocation20 + $0xcac] ss:$76 sps:$4 sm:$0xff]  }
 0x6c7   :  { %5692 = vmatpush1.bf16.msra.mxu1 %v7860_v42  ;;  %5607 = vmatprep.subr.bf16.mxu0 %v7865_v43  ;;  %v7940_v42 = vld [vmem:[#allocation20 + $0xcb4] ss:$76 sps:$4 sm:$0xff]   ;;  %v1925_v43 = vrot.slane %v8890_v23, %v1924_v35 }
 0x6c8   :  { %5693 = vmatprep.subr.bf16.mxu1 %v7868_v44  ;;  %v1933_v44 = vrot.slane %v8890_v23, %v1932_v37 }
 0x6ca   :  { %5608 = vmatpush1.bf16.msra.mxu0 %v7863_v46  ;;  %v1929_v46 = vrot.slane %v8890_v23, %v1928_v38 }
 0x6cb   :  { %5694 = vmatpush1.bf16.msra.mxu1 %v7866_v48  ;;  %5609 = vmatprep.subr.bf16.mxu0 %v7871_v49  ;;  %v7935_v48 = vld [vmem:[#allocation20 + $0xca8] ss:$76 sps:$4 sm:$0xff]   ;;  %v1937_v49 = vrot.slane %v8890_v23, %v1936_v40 }
 0x6cc   :  { %5695 = vmatprep.subr.bf16.mxu1 %v7874_v50  ;;  %v7938_v50 = vld [vmem:[#allocation20 + $0xcb0] ss:$76 sps:$4 sm:$0xff]  }
 0x6ce   :  { %5610 = vmatpush1.bf16.msra.mxu0 %v7869_v51  ;;  %v7943_v51 = vld [vmem:[#allocation20 + $0xd44] ss:$76 sps:$4 sm:$0xff]  }
 0x6cf   :  { %5696 = vmatpush1.bf16.msra.mxu1 %v7872_v52  ;;  %5611 = vmatprep.subr.bf16.mxu0 %v7877_v53  ;;  %v7946_v53 = vld [vmem:[#allocation20 + $0xd4c] ss:$76 sps:$4 sm:$0xff]  }
 0x6d0   :  { %5697 = vmatprep.subr.bf16.mxu1 %v7880_v54 }
 0x6d2   :  { %5612 = vmatpush1.bf16.msra.mxu0 %v7875_v55 }
 0x6d3   :  { %5698 = vmatpush1.bf16.msra.mxu1 %v7878_v56  ;;  %5613 = vmatprep.subr.bf16.mxu0 %v7883_v57  ;;  %v7941_v57 = vld [vmem:[#allocation20 + $0xd40] ss:$76 sps:$4 sm:$0xff]  }
 0x6d4   :  { %5699 = vmatprep.subr.bf16.mxu1 %v7886_v58  ;;  %v7944_v58 = vld [vmem:[#allocation20 + $0xd48] ss:$76 sps:$4 sm:$0xff]  }
 0x6d6   :  { %5614 = vmatpush1.bf16.msra.mxu0 %v7881_v59 }
 0x6d7   :  { %5700 = vmatpush1.bf16.msra.mxu1 %v7884_v60  ;;  %5615 = vmatprep.subr.bf16.mxu0 %v7889_v61 }
 0x6d8   :  { %5701 = vmatprep.subr.bf16.mxu1 %v7892_v62 }
 0x6da   :  { %5616 = vmatpush1.bf16.msra.mxu0 %v7887_v63  ;;  %v7949_v63 = vld [vmem:[#allocation20 + $0xddc] ss:$76 sps:$4 sm:$0xff]  }
 0x6db   :  { %5702 = vmatpush1.bf16.msra.mxu1 %v7890_v0  ;;  %5617 = vmatprep.subr.bf16.mxu0 %v7895_v1  ;;  %v7952_v0 = vld [vmem:[#allocation20 + $0xde4] ss:$76 sps:$4 sm:$0xff]  }
 0x6dc   :  { %5703 = vmatprep.subr.bf16.mxu1 %v7898_v2 }
 0x6de   :  { %5618 = vmatpush1.bf16.msra.mxu0 %v7893_v3 }
 0x6df   :  { %5704 = vmatpush1.bf16.msra.mxu1 %v7896_v4  ;;  %5619 = vmatprep.subr.bf16.mxu0 %v7901_v5 }
 0x6e0   :  { %5705 = vmatprep.subr.bf16.mxu1 %v7904_v6 }
 0x6e2   :  { %5620 = vmatpush1.bf16.msra.mxu0 %v7899_v7 }
 0x6e3   :  { %5706 = vmatpush1.bf16.msra.mxu1 %v7902_v8  ;;  %5632 = vmatprep.subr.bf16.mxu0 %v7907_v9 }
 0x6e4   :  { %5718 = vmatprep.subr.bf16.mxu1 %v7910_v10 }
 0x6e5   :  { %5622 = vmatmul.mubr.bf16.vlgmr.msra.gmra.mrb[20].mxu0 %v8860_v20 }
 0x6e6   :  { %5708 = vmatmul.mubr.bf16.vlgmr.msra.gmra.mrb[28].mxu1 %v8860_v20  ;;  %5633 = vmatpush1.bf16.msra.mxu0 %v7905_v11 }
 0x6e7   :  { %5664 = vmatprep.mubr.bf16.mxu0 %v8866_v26  ;;  %5719 = vmatpush1.bf16.msra.mxu1 %v7908_v12 }
 0x6e8   :  { %5750 = vmatprep.mubr.bf16.mxu1 %v8866_v26  ;;  %5634 = vmatprep.subr.bf16.mxu0 %v7913_v13  ;;  %v7947_v13 = vld [vmem:[#allocation20 + $0xdd8] ss:$76 sps:$4 sm:$0xff]  }
 0x6e9   :  { %5720 = vmatprep.subr.bf16.mxu1 %v7916_v14 }
 0x6ea   :  { %5635 = vmatpush1.bf16.msra.mxu0 %v7911_v15 }
 0x6eb   :  { %5721 = vmatpush1.bf16.msra.mxu1 %v7914_v16  ;;  %5636 = vmatprep.subr.bf16.mxu0 %v7919_v17  ;;  %v7950_v17 = vld [vmem:[#allocation20 + $0xde0] ss:$76 sps:$4 sm:$0xff]  }
 0x6ec   :  { %5722 = vmatprep.subr.bf16.mxu1 %v7922_v24  ;;  %v7955_v24 = vld [vmem:[#allocation20 + $0xe74] ss:$76 sps:$4 sm:$0xff]  }
 0x6ee   :  { %5637 = vmatpush1.bf16.msra.mxu0 %v7917_v27 }
 0x6ef   :  { %5723 = vmatpush1.bf16.msra.mxu1 %v7920_v28  ;;  %5638 = vmatprep.subr.bf16.mxu0 %v7925_v29  ;;  %v7958_v29 = vld [vmem:[#allocation20 + $0xe7c] ss:$76 sps:$4 sm:$0xff]  }
 0x6f0   :  { %5724 = vmatprep.subr.bf16.mxu1 %v7928_v30 }
 0x6f2   :  { %5639 = vmatpush1.bf16.msra.mxu0 %v7923_v31  ;;  %v7953_v31 = vld [vmem:[#allocation20 + $0xe70] ss:$76 sps:$4 sm:$0xff]  }
 0x6f3   :  { %5725 = vmatpush1.bf16.msra.mxu1 %v7926_v32  ;;  %5640 = vmatprep.subr.bf16.mxu0 %v7931_v33 }
 0x6f4   :  { %5726 = vmatprep.subr.bf16.mxu1 %v7934_v34 }
 0x6f6   :  { %5641 = vmatpush1.bf16.msra.mxu0 %v7929_v36  ;;  %v7956_v36 = vld [vmem:[#allocation20 + $0xe78] ss:$76 sps:$4 sm:$0xff]  }
 0x6f7   :  { %5727 = vmatpush1.bf16.msra.mxu1 %v7932_v39  ;;  %5642 = vmatprep.subr.bf16.mxu0 %v7937_v41  ;;  %v7961_v39 = vld [vmem:[#allocation20 + $0xf0c] ss:$76 sps:$4 sm:$0xff]  }
 0x6f8   :  { %v5322_v52 = vpop.f32.mrb[12].mxu0  ;;  %5728 = vmatprep.subr.bf16.mxu1 %v7940_v42 }
 0x6f9   :  { %v6997_v54 = vadd.f32 %v5322_v52, %v1925_v43  ;;  %v5408_v55 = vpop.f32.mrb[20].mxu1  ;;  %v5324_v56 = vpop.f32.mrb[13].mxu0 }
 0x6fa   :  { %v7001_v59 = vadd.f32 %v5408_v55, %v1933_v44  ;;  %v6998_v60 = vadd.f32 %v5324_v56, %v1929_v46  ;;  %v5410_v61 = vpop.f32.mrb[21].mxu1  ;;  %v5326_v62 = vpop.f32.mrb[14].mxu0  ;;  %5643 = vmatpush1.bf16.msra.mxu0 %v7935_v48  ;;  %v7967_v48 = vld [vmem:[#allocation20 + $0xfa4] ss:$76 sps:$4 sm:$0xff]   ;;  %v7968_v55 = vld [vmem:[#allocation20 + $0xfa8] ss:$76 sps:$4 sm:$0xff]  }
 0x6fb   :  { %vm5933_vm11 = vcmp.gt.f32.partialorder %v6997_v54, 0.0  ;;  %v5971_v23 = vmul.f32 0.2, %v6997_v54  ;;  %v7002_v1 = vadd.f32 %v5410_v61, %v1937_v49  ;;  %v6999_v2 = vadd.f32 %v5326_v62, %v1925_v43  ;;  %v5412_v3 = vpop.f32.mrb[22].mxu1  ;;  %5729 = vmatpush1.bf16.msra.mxu1 %v7938_v50  ;;  %v5328_v4 = vpop.f32.mrb[15].mxu0  ;;  %5644 = vmatprep.subr.bf16.mxu0 %v7943_v51 }
 0x6fc   :  { %vm5935_vm12 = vcmp.gt.f32.partialorder %v7001_v59, 0.0  ;;  %v5973_v5 = vmul.f32 0.2, %v7001_v59  ;;  %vm5934_vm13 = vcmp.gt.f32.partialorder %v6998_v60, 0.0  ;;  %v5972_v6 = vmul.f32 0.2, %v6998_v60  ;;  %5730 = vmatprep.subr.bf16.mxu1 %v7946_v53 }
 0x6fd   :  { %v6009_v7 = vsel %vm5933_vm11, %v6997_v54, %v5971_v23  ;;  %vm5936_vm14 = vcmp.gt.f32.partialorder %v7002_v1, 0.0  ;;  %v5974_v8 = vmul.f32 0.2, %v7002_v1  ;;  %vm5952_vm15 = vcmp.gt.f32.partialorder %v6999_v2, 0.0  ;;  %v5414_v9 = vpop.f32.mrb[23].mxu1 }
 0x6fe   :  { %8145 = vtanh.f32 %v6009_v7  ;;  %v6011_v10 = vsel %vm5935_vm12, %v7001_v59, %v5973_v5  ;;  %v6010_v11 = vsel %vm5934_vm13, %v6998_v60, %v5972_v6  ;;  %v5990_v12 = vmul.f32 0.2, %v6999_v2  ;;  %5645 = vmatpush1.bf16.msra.mxu0 %v7941_v57  ;;  %v7964_v43 = vld [vmem:[#allocation20 + $0xf14] ss:$76 sps:$4 sm:$0xff]   ;;  %v7970_v50 = vld [vmem:[#allocation20 + $0xfac] ss:$76 sps:$4 sm:$0xff]  }
 0x6ff   :  { %8147 = vtanh.f32 %v6011_v10  ;;  %v6012_v14 = vsel %vm5936_vm14, %v7002_v1, %v5974_v8  ;;  %v7003_v15 = vadd.f32 %v5412_v3, %v1933_v44  ;;  %v7000_v16 = vadd.f32 %v5328_v4, %v1929_v46  ;;  %5731 = vmatpush1.bf16.msra.mxu1 %v7944_v58  ;;  %5646 = vmatprep.subr.bf16.mxu0 %v7949_v63  ;;  %v7959_v44 = vld [vmem:[#allocation20 + $0xf08] ss:$76 sps:$4 sm:$0xff]   ;;  %v7962_v46 = vld [vmem:[#allocation20 + $0xf10] ss:$76 sps:$4 sm:$0xff]   ;;  %v7965_v53 = vld [vmem:[#allocation20 + $0xfa0] ss:$76 sps:$4 sm:$0xff]  }
 0x700   :  { %8149 = vtanh.f32 %v6010_v11  ;;  %v6028_v27 = vsel %vm5952_vm15, %v6999_v2, %v5990_v12  ;;  %v7004_v28 = vadd.f32 %v5414_v9, %v1937_v49  ;;  %5732 = vmatprep.subr.bf16.mxu1 %v7952_v0  ;;  %v7973_v56 = vld [vmem:[#allocation20 + $0x103c] ss:$76 sps:$4 sm:$0xff]   ;;  %v7976_v58 = vld [vmem:[#allocation20 + $0x1044] ss:$76 sps:$4 sm:$0xff]   ;;  %v7974_v62 = vld [vmem:[#allocation20 + $0x1040] ss:$76 sps:$4 sm:$0xff]  }
 0x701   :  { %8151 = vtanh.f32 %v6012_v14  ;;  %vm5954_vm0 = vcmp.gt.f32.partialorder %v7003_v15, 0.0  ;;  %v5992_v30 = vmul.f32 0.2, %v7003_v15  ;;  %vm5953_vm1 = vcmp.gt.f32.partialorder %v7000_v16, 0.0  ;;  %v7971_v60 = vld [vmem:[#allocation20 + $0x1038] ss:$76 sps:$4 sm:$0xff]  }
 0x702   :  { %8153 = vtanh.f32 %v6028_v27  ;;  %v5991_v32 = vmul.f32 0.2, %v7000_v16  ;;  %vm5955_vm2 = vcmp.gt.f32.partialorder %v7004_v28, 0.0  ;;  %v5993_v33 = vmul.f32 0.2, %v7004_v28  ;;  %5647 = vmatpush1.bf16.msra.mxu0 %v7947_v13 }
 0x703   :  { %v6030_v34 = vsel %vm5954_vm0, %v7003_v15, %v5992_v30  ;;  %5733 = vmatpush1.bf16.msra.mxu1 %v7950_v17  ;;  %5648 = vmatprep.subr.bf16.mxu0 %v7955_v24  ;;  %v7979_v63 = vld [vmem:[#allocation20 + $0x10d4] ss:$76 sps:$4 sm:$0xff]   ;;  %v7982_v23 = vld [vmem:[#allocation20 + $0x10dc] ss:$76 sps:$4 sm:$0xff]   ;;  %v7980_v2 = vld [vmem:[#allocation20 + $0x10d8] ss:$76 sps:$4 sm:$0xff]  }
 0x704   :  { %8155 = vtanh.f32 %v6030_v34  ;;  %v6029_v41 = vsel %vm5953_vm1, %v7000_v16, %v5991_v32  ;;  %v6031_v42 = vsel %vm5955_vm2, %v7004_v28, %v5993_v33  ;;  %5734 = vmatprep.subr.bf16.mxu1 %v7958_v29  ;;  %v7977_v1 = vld [vmem:[#allocation20 + $0x10d0] ss:$76 sps:$4 sm:$0xff]   ;;  %v7985_v3 = vld [vmem:[#allocation20 + $0x116c] ss:$76 sps:$4 sm:$0xff]   ;;  %v7988_v4 = vld [vmem:[#allocation20 + $0x1174] ss:$76 sps:$4 sm:$0xff]  }
 0x705   :  { %8157 = vtanh.f32 %v6029_v41  ;;  %v7983_v5 = vld [vmem:[#allocation20 + $0x1168] ss:$76 sps:$4 sm:$0xff]   ;;  %v7986_v6 = vld [vmem:[#allocation20 + $0x1170] ss:$76 sps:$4 sm:$0xff]   ;;  %v7994_v8 = vld [vmem:[#allocation20 + $0x120c] ss:$76 sps:$4 sm:$0xff]  }
 0x706   :  { %8159 = vtanh.f32 %v6031_v42  ;;  %5649 = vmatpush1.bf16.msra.mxu0 %v7953_v31  ;;  %v7991_v7 = vld [vmem:[#allocation20 + $0x1204] ss:$76 sps:$4 sm:$0xff]   ;;  %v7989_v9 = vld [vmem:[#allocation20 + $0x1200] ss:$76 sps:$4 sm:$0xff]   ;;  %v7992_v10 = vld [vmem:[#allocation20 + $0x1208] ss:$76 sps:$4 sm:$0xff]  }
 0x707   :  { %5735 = vmatpush1.bf16.msra.mxu1 %v7956_v36  ;;  %5650 = vmatprep.subr.bf16.mxu0 %v7961_v39  ;;  %v7997_v11 = vld [vmem:[#allocation20 + $0x129c] ss:$76 sps:$4 sm:$0xff]   ;;  %v8000_v12 = vld [vmem:[#allocation20 + $0x12a4] ss:$76 sps:$4 sm:$0xff]   ;;  %v7998_v14 = vld [vmem:[#allocation20 + $0x12a0] ss:$76 sps:$4 sm:$0xff]  }
 0x708   :  { %v8146_v49 = vpop.eup %8145  ;;  %5736 = vmatprep.subr.bf16.mxu1 %v7964_v43  ;;  %v7995_v13 = vld [vmem:[#allocation20 + $0x1298] ss:$76 sps:$4 sm:$0xff]   ;;  %v8004_v16 = vld [vmem:[#allocation20 + $0x508] ss:$76 sps:$4 sm:$0xff]   ;;  %v8001_v17 = vld [vmem:[#allocation20 + $0x40] ss:$76 sps:$4 sm:$0xff]  }
 0x709   :  { %v8148_v51 = vpop.eup %8147  ;;  %6085 = vst [vmem:[#allocation23 + $0x20] sm:$0xff] %v8146_v49  ;;  %v8003_v15 = vld [vmem:[#allocation20 + $0x44] ss:$76 sps:$4 sm:$0xff]   ;;  %v8005_v24 = vld [vmem:[#allocation20 + $0x48] ss:$76 sps:$4 sm:$0xff]  }
 0x70a   :  { %v8150_v52 = vpop.eup %8149  ;;  %6087 = vst [vmem:[#allocation23 + $0x30] sm:$0xff] %v8148_v51  ;;  %5651 = vmatpush1.bf16.msra.mxu0 %v7959_v44  ;;  %v8008_v27 = vld [vmem:[#allocation20 + $0xdc] ss:$76 sps:$4 sm:$0xff]   ;;  %v8009_v28 = vld [vmem:[#allocation20 + $0x5a0] ss:$76 sps:$4 sm:$0xff]  }
 0x70b   :  { %v8152_v54 = vpop.eup %8151  ;;  %6086 = vst [vmem:[#allocation23 + $0x28] sm:$0xff] %v8150_v52  ;;  %5737 = vmatpush1.bf16.msra.mxu1 %v7962_v46  ;;  %5652 = vmatprep.subr.bf16.mxu0 %v7967_v48  ;;  %v8006_v29 = vld [vmem:[#allocation20 + $0xd8] ss:$76 sps:$4 sm:$0xff]   ;;  %v8010_v30 = vld [vmem:[#allocation20 + $0xe0] ss:$76 sps:$4 sm:$0xff]  }
 0x70c   :  { %v8154_v57 = vpop.eup %8153  ;;  %6088 = vst [vmem:[#allocation23 + $0x38] sm:$0xff] %v8152_v54  ;;  %5738 = vmatprep.subr.bf16.mxu1 %v7970_v50  ;;  %v8013_v31 = vld [vmem:[#allocation20 + $0x174] ss:$76 sps:$4 sm:$0xff]   ;;  %v8014_v32 = vld [vmem:[#allocation20 + $0x638] ss:$76 sps:$4 sm:$0xff]  }
 0x70d   :  { %6104 = vst [vmem:[#allocation23 + $0xb8] sm:$0xff] %v8154_v57  ;;  %v8011_v33 = vld [vmem:[#allocation20 + $0x170] ss:$76 sps:$4 sm:$0xff]   ;;  %v8015_v34 = vld [vmem:[#allocation20 + $0x178] ss:$76 sps:$4 sm:$0xff]  }
 0x70e   :  { %v8156_v59 = vpop.eup %8155  ;;  %5653 = vmatpush1.bf16.msra.mxu0 %v7965_v53  ;;  %v8018_v36 = vld [vmem:[#allocation20 + $0x20c] ss:$76 sps:$4 sm:$0xff]   ;;  %v8019_v39 = vld [vmem:[#allocation20 + $0x6d0] ss:$76 sps:$4 sm:$0xff]   ;;  %v8016_v41 = vld [vmem:[#allocation20 + $0x208] ss:$76 sps:$4 sm:$0xff]  }
 0x70f   :  { %v8158_v61 = vpop.eup %8157  ;;  %6106 = vst [vmem:[#allocation23 + $0xc8] sm:$0xff] %v8156_v59  ;;  %5739 = vmatpush1.bf16.msra.mxu1 %v7968_v55  ;;  %5654 = vmatprep.subr.bf16.mxu0 %v7973_v56  ;;  %v8020_v42 = vld [vmem:[#allocation20 + $0x210] ss:$76 sps:$4 sm:$0xff]   ;;  %v8024_v44 = vld [vmem:[#allocation20 + $0x768] ss:$76 sps:$4 sm:$0xff]  }
 0x710   :  { %v8160_v0 = vpop.eup %8159  ;;  %6105 = vst [vmem:[#allocation23 + $0xc0] sm:$0xff] %v8158_v61  ;;  %5740 = vmatprep.subr.bf16.mxu1 %v7976_v58  ;;  %v8023_v43 = vld [vmem:[#allocation20 + $0x2a4] ss:$76 sps:$4 sm:$0xff]   ;;  %v8025_v46 = vld [vmem:[#allocation20 + $0x2a8] ss:$76 sps:$4 sm:$0xff]  }
 0x711   :  { %6107 = vst [vmem:[#allocation23 + $0xd0] sm:$0xff] %v8160_v0  ;;  %v8028_v48 = vld [vmem:[#allocation20 + $0x33c] ss:$76 sps:$4 sm:$0xff]   ;;  %v8029_v49 = vld [vmem:[#allocation20 + $0x800] ss:$76 sps:$4 sm:$0xff]  }
 0x712   :  { %5655 = vmatpush1.bf16.msra.mxu0 %v7971_v60  ;;  %v8026_v50 = vld [vmem:[#allocation20 + $0x338] ss:$76 sps:$4 sm:$0xff]   ;;  %v8030_v51 = vld [vmem:[#allocation20 + $0x340] ss:$76 sps:$4 sm:$0xff]   ;;  %v8031_v54 = vld [vmem:[#allocation20 + $0x3d0] ss:$76 sps:$4 sm:$0xff]  }
 0x713   :  { %5741 = vmatpush1.bf16.msra.mxu1 %v7974_v62  ;;  %5656 = vmatprep.subr.bf16.mxu0 %v7979_v63  ;;  %v8033_v52 = vld [vmem:[#allocation20 + $0x3d4] ss:$76 sps:$4 sm:$0xff]   ;;  %v8034_v53 = vld [vmem:[#allocation20 + $0x898] ss:$76 sps:$4 sm:$0xff]   ;;  %v8039_v57 = vld [vmem:[#allocation20 + $0x930] ss:$76 sps:$4 sm:$0xff]  }
 0x714   :  { %5742 = vmatprep.subr.bf16.mxu1 %v7982_v23  ;;  %v8035_v55 = vld [vmem:[#allocation20 + $0x3d8] ss:$76 sps:$4 sm:$0xff]   ;;  %v8036_v58 = vld [vmem:[#allocation20 + $0x468] ss:$76 sps:$4 sm:$0xff]   ;;  %v8040_v59 = vld [vmem:[#allocation20 + $0x470] ss:$76 sps:$4 sm:$0xff]  }
 0x715   :  { %v8038_v56 = vld [vmem:[#allocation20 + $0x46c] ss:$76 sps:$4 sm:$0xff]   ;;  %v8043_v60 = vld [vmem:[#allocation20 + $0x504] ss:$76 sps:$4 sm:$0xff]   ;;  %v8044_v61 = vld [vmem:[#allocation20 + $0xe88] ss:$76 sps:$4 sm:$0xff]  }
 0x716   :  { %5657 = vmatpush1.bf16.msra.mxu0 %v7977_v1  ;;  %v8041_v62 = vld [vmem:[#allocation20 + $0x500] ss:$76 sps:$4 sm:$0xff]   ;;  %v8045_v63 = vld [vmem:[#allocation20 + $0x9c8] ss:$76 sps:$4 sm:$0xff]   ;;  %v8046_v1 = vld [vmem:[#allocation20 + $0x598] ss:$76 sps:$4 sm:$0xff]  }
 0x717   :  { %5743 = vmatpush1.bf16.msra.mxu1 %v7980_v2  ;;  %5658 = vmatprep.subr.bf16.mxu0 %v7985_v3  ;;  %v8048_v0 = vld [vmem:[#allocation20 + $0x59c] ss:$76 sps:$4 sm:$0xff]   ;;  %v8049_v23 = vld [vmem:[#allocation20 + $0xf20] ss:$76 sps:$4 sm:$0xff]  }
 0x718   :  { %5744 = vmatprep.subr.bf16.mxu1 %v7988_v4  ;;  %v8050_v2 = vld [vmem:[#allocation20 + $0xa60] ss:$76 sps:$4 sm:$0xff]   ;;  %v8054_v4 = vld [vmem:[#allocation20 + $0xfb8] ss:$76 sps:$4 sm:$0xff]  }
 0x719   :  { %v8053_v3 = vld [vmem:[#allocation20 + $0x634] ss:$76 sps:$4 sm:$0xff]  }
 0x71a   :  { %5659 = vmatpush1.bf16.msra.mxu0 %v7983_v5  ;;  %v8051_v5 = vld [vmem:[#allocation20 + $0x630] ss:$76 sps:$4 sm:$0xff]  }
 0x71b   :  { %5745 = vmatpush1.bf16.msra.mxu1 %v7986_v6  ;;  %5660 = vmatprep.subr.bf16.mxu0 %v7991_v7  ;;  %v8055_v6 = vld [vmem:[#allocation20 + $0xaf8] ss:$76 sps:$4 sm:$0xff]  }
 0x71c   :  { %5746 = vmatprep.subr.bf16.mxu1 %v7994_v8  ;;  %v8058_v7 = vld [vmem:[#allocation20 + $0x6cc] ss:$76 sps:$4 sm:$0xff]   ;;  %v8059_v8 = vld [vmem:[#allocation20 + $0x1050] ss:$76 sps:$4 sm:$0xff]  }
 0x71e   :  { %5661 = vmatpush1.bf16.msra.mxu0 %v7989_v9  ;;  %v8056_v9 = vld [vmem:[#allocation20 + $0x6c8] ss:$76 sps:$4 sm:$0xff]  }
 0x71f   :  { %5747 = vmatpush1.bf16.msra.mxu1 %v7992_v10  ;;  %5662 = vmatprep.subr.bf16.mxu0 %v7997_v11  ;;  %v8060_v10 = vld [vmem:[#allocation20 + $0xb90] ss:$76 sps:$4 sm:$0xff]  }
 0x720   :  { %5748 = vmatprep.subr.bf16.mxu1 %v8000_v12  ;;  %v8063_v11 = vld [vmem:[#allocation20 + $0x764] ss:$76 sps:$4 sm:$0xff]   ;;  %v8064_v12 = vld [vmem:[#allocation20 + $0x10e8] ss:$76 sps:$4 sm:$0xff]  }
 0x722   :  { %5663 = vmatpush1.bf16.msra.mxu0 %v7995_v13  ;;  %v8061_v13 = vld [vmem:[#allocation20 + $0x760] ss:$76 sps:$4 sm:$0xff]  }
 0x723   :  { %5749 = vmatpush1.bf16.msra.mxu1 %v7998_v14  ;;  %5761 = vmatprep.subr.bf16.mxu0 %v8003_v15  ;;  %v8065_v14 = vld [vmem:[#allocation20 + $0xc28] ss:$76 sps:$4 sm:$0xff]  }
 0x724   :  { %6885 = vmatprep.subr.bf16.mxu1 %v8004_v16  ;;  %v8068_v15 = vld [vmem:[#allocation20 + $0x7fc] ss:$76 sps:$4 sm:$0xff]   ;;  %v8069_v16 = vld [vmem:[#allocation20 + $0x1180] ss:$76 sps:$4 sm:$0xff]  }
 0x725   :  { %5665 = vmatmul.mubr.bf16.vlgmr.msra.gmra.mrb[20].mxu0 %v8862_v22 }
 0x726   :  { %5751 = vmatmul.mubr.bf16.vlgmr.msra.gmra.mrb[28].mxu1 %v8862_v22  ;;  %5762 = vmatpush1.bf16.msra.mxu0 %v8001_v17  ;;  %v8066_v17 = vld [vmem:[#allocation20 + $0x7f8] ss:$76 sps:$4 sm:$0xff]  }
 0x727   :  { %5793 = vmatprep.mubr.bf16.mxu0 %v8864_v25  ;;  %6886 = vmatpush3.bf16.msra.mxu1 %v8005_v24  ;;  %v8070_v24 = vld [vmem:[#allocation20 + $0xcc0] ss:$76 sps:$4 sm:$0xff]  }
 0x728   :  { %5879 = vmatprep.mubr.bf16.mxu1 %v8864_v25  ;;  %5763 = vmatprep.subr.bf16.mxu0 %v8008_v27  ;;  %v8021_v25 = vld [vmem:[#allocation20 + $0x2a0] ss:$76 sps:$4 sm:$0xff]  }
 0x729   :  { %6887 = vmatprep.subr.bf16.mxu1 %v8009_v28  ;;  %v8073_v27 = vld [vmem:[#allocation20 + $0x894] ss:$76 sps:$4 sm:$0xff]   ;;  %v8074_v28 = vld [vmem:[#allocation20 + $0x1218] ss:$76 sps:$4 sm:$0xff]  }
 0x72a   :  { %5764 = vmatpush1.bf16.msra.mxu0 %v8006_v29  ;;  %v8071_v29 = vld [vmem:[#allocation20 + $0x890] ss:$76 sps:$4 sm:$0xff]  }
 0x72b   :  { %6888 = vmatpush3.bf16.msra.mxu1 %v8010_v30  ;;  %5765 = vmatprep.subr.bf16.mxu0 %v8013_v31  ;;  %v8075_v30 = vld [vmem:[#allocation20 + $0xd58] ss:$76 sps:$4 sm:$0xff]  }
 0x72c   :  { %6889 = vmatprep.subr.bf16.mxu1 %v8014_v32  ;;  %v8078_v31 = vld [vmem:[#allocation20 + $0x92c] ss:$76 sps:$4 sm:$0xff]   ;;  %v8079_v32 = vld [vmem:[#allocation20 + $0x12b0] ss:$76 sps:$4 sm:$0xff]  }
 0x72e   :  { %5766 = vmatpush1.bf16.msra.mxu0 %v8011_v33  ;;  %v8076_v33 = vld [vmem:[#allocation20 + $0x928] ss:$76 sps:$4 sm:$0xff]  }
 0x72f   :  { %6890 = vmatpush3.bf16.msra.mxu1 %v8015_v34  ;;  %5767 = vmatprep.subr.bf16.mxu0 %v8018_v36  ;;  %v8080_v34 = vld [vmem:[#allocation20 + $0xdf0] ss:$76 sps:$4 sm:$0xff]  }
 0x730   :  { %6891 = vmatprep.subr.bf16.mxu1 %v8019_v39  ;;  %v8083_v36 = vld [vmem:[#allocation20 + $0x9c4] ss:$76 sps:$4 sm:$0xff]   ;;  %v8081_v39 = vld [vmem:[#allocation20 + $0x9c0] ss:$76 sps:$4 sm:$0xff]  }
 0x732   :  { %5768 = vmatpush1.bf16.msra.mxu0 %v8016_v41  ;;  %v8086_v41 = vld [vmem:[#allocation20 + $0xa5c] ss:$76 sps:$4 sm:$0xff]  }
 0x733   :  { %6892 = vmatpush3.bf16.msra.mxu1 %v8020_v42  ;;  %5769 = vmatprep.subr.bf16.mxu0 %v8023_v43  ;;  %v8084_v42 = vld [vmem:[#allocation20 + $0xa58] ss:$76 sps:$4 sm:$0xff]   ;;  %v8089_v43 = vld [vmem:[#allocation20 + $0xaf4] ss:$76 sps:$4 sm:$0xff]  }
 0x734   :  { %6893 = vmatprep.subr.bf16.mxu1 %v8024_v44  ;;  %v8087_v44 = vld [vmem:[#allocation20 + $0xaf0] ss:$76 sps:$4 sm:$0xff]  }
 0x736   :  { %5770 = vmatpush1.bf16.msra.mxu0 %v8021_v25  ;;  %v8092_v25 = vld [vmem:[#allocation20 + $0xb8c] ss:$76 sps:$4 sm:$0xff]  }
 0x737   :  { %6894 = vmatpush3.bf16.msra.mxu1 %v8025_v46  ;;  %5771 = vmatprep.subr.bf16.mxu0 %v8028_v48  ;;  %v8090_v46 = vld [vmem:[#allocation20 + $0xb88] ss:$76 sps:$4 sm:$0xff]   ;;  %v8095_v48 = vld [vmem:[#allocation20 + $0xc24] ss:$76 sps:$4 sm:$0xff]  }
 0x738   :  { %6895 = vmatprep.subr.bf16.mxu1 %v8029_v49  ;;  %v8093_v49 = vld [vmem:[#allocation20 + $0xc20] ss:$76 sps:$4 sm:$0xff]  }
 0x73a   :  { %5772 = vmatpush1.bf16.msra.mxu0 %v8026_v50  ;;  %v8938_v50 = vld [vmem:[#allocation22 + $0x8] sm:$0xff] }
 0x73b   :  { %6896 = vmatpush3.bf16.msra.mxu1 %v8030_v51  ;;  %5773 = vmatprep.subr.bf16.mxu0 %v8033_v52  ;;  %v1941_v51 = vrot.slane %v8938_v50, %v8841_v19  ;;  %v1945_v52 = vrot.slane %v8938_v50, %v8844_v21 }
 0x73c   :  { %6897 = vmatprep.subr.bf16.mxu1 %v8034_v53  ;;  %v8096_v53 = vld [vmem:[#allocation20 + $0xcb8] ss:$76 sps:$4 sm:$0xff]  }
 0x73e   :  { %5774 = vmatpush1.bf16.msra.mxu0 %v8031_v54  ;;  %v1953_v54 = vrot.slane %v8938_v50, %v8852_v47 }
 0x73f   :  { %6898 = vmatpush3.bf16.msra.mxu1 %v8035_v55  ;;  %5775 = vmatprep.subr.bf16.mxu0 %v8038_v56  ;;  %v8101_v55 = vld [vmem:[#allocation20 + $0xd54] ss:$76 sps:$4 sm:$0xff]  }
 0x740   :  { %6899 = vmatprep.subr.bf16.mxu1 %v8039_v57 }
 0x742   :  { %5776 = vmatpush1.bf16.msra.mxu0 %v8036_v58 }
 0x743   :  { %6900 = vmatpush3.bf16.msra.mxu1 %v8040_v59  ;;  %5777 = vmatprep.subr.bf16.mxu0 %v8043_v60 }
 0x744   :  { %6907 = vmatprep.subr.bf16.mxu1 %v8044_v61 }
 0x746   :  { %5880 = vmatmul.mubr.bf16.vlgmr.msra.gmra.mrb[32].mxu1 %v8860_v20  ;;  %5778 = vmatpush1.bf16.msra.mxu0 %v8041_v62 }
 0x747   :  { %6908 = vmatpush3.bf16.msra.mxu1 %v8045_v63  ;;  %5920 = vmatprep.mubr.bf16.mxu1 %v8866_v26 }
 0x748   :  { %5779 = vmatprep.subr.bf16.mxu0 %v8048_v0  ;;  %6909 = vmatprep.subr.bf16.mxu1 %v8049_v23  ;;  %v8099_v0 = vld [vmem:[#allocation20 + $0xd50] ss:$76 sps:$4 sm:$0xff]   ;;  %v8104_v23 = vld [vmem:[#allocation20 + $0xdec] ss:$76 sps:$4 sm:$0xff]  }
 0x74a   :  { %5780 = vmatpush1.bf16.msra.mxu0 %v8046_v1 }
 0x74b   :  { %6910 = vmatpush3.bf16.msra.mxu1 %v8050_v2  ;;  %5781 = vmatprep.subr.bf16.mxu0 %v8053_v3 }
 0x74c   :  { %6911 = vmatprep.subr.bf16.mxu1 %v8054_v4 }
 0x74e   :  { %5782 = vmatpush1.bf16.msra.mxu0 %v8051_v5 }
 0x74f   :  { %6912 = vmatpush3.bf16.msra.mxu1 %v8055_v6  ;;  %5783 = vmatprep.subr.bf16.mxu0 %v8058_v7 }
 0x750   :  { %6913 = vmatprep.subr.bf16.mxu1 %v8059_v8 }
 0x752   :  { %5784 = vmatpush1.bf16.msra.mxu0 %v8056_v9 }
 0x753   :  { %6914 = vmatpush3.bf16.msra.mxu1 %v8060_v10  ;;  %5785 = vmatprep.subr.bf16.mxu0 %v8063_v11 }
 0x754   :  { %6915 = vmatprep.subr.bf16.mxu1 %v8064_v12 }
 0x756   :  { %5786 = vmatpush1.bf16.msra.mxu0 %v8061_v13  ;;  %v8102_v13 = vld [vmem:[#allocation20 + $0xde8] ss:$76 sps:$4 sm:$0xff]  }
 0x757   :  { %6916 = vmatpush3.bf16.msra.mxu1 %v8065_v14  ;;  %5787 = vmatprep.subr.bf16.mxu0 %v8068_v15 }
 0x758   :  { %6917 = vmatprep.subr.bf16.mxu1 %v8069_v16 }
 0x75a   :  { %5788 = vmatpush1.bf16.msra.mxu0 %v8066_v17  ;;  %v8107_v17 = vld [vmem:[#allocation20 + $0xe84] ss:$76 sps:$4 sm:$0xff]  }
 0x75b   :  { %6918 = vmatpush3.bf16.msra.mxu1 %v8070_v24  ;;  %5789 = vmatprep.subr.bf16.mxu0 %v8073_v27 }
 0x75c   :  { %6919 = vmatprep.subr.bf16.mxu1 %v8074_v28 }
 0x75e   :  { %5790 = vmatpush1.bf16.msra.mxu0 %v8071_v29  ;;  %v8105_v29 = vld [vmem:[#allocation20 + $0xe80] ss:$76 sps:$4 sm:$0xff]  }
 0x75f   :  { %6920 = vmatpush3.bf16.msra.mxu1 %v8075_v30  ;;  %5791 = vmatprep.subr.bf16.mxu0 %v8078_v31 }
 0x760   :  { %6921 = vmatprep.subr.bf16.mxu1 %v8079_v32 }
 0x762   :  { %5792 = vmatpush1.bf16.msra.mxu0 %v8076_v33  ;;  %v8110_v33 = vld [vmem:[#allocation20 + $0xf1c] ss:$76 sps:$4 sm:$0xff]  }
 0x763   :  { %6922 = vmatpush3.bf16.msra.mxu1 %v8080_v34  ;;  %5804 = vmatprep.subr.bf16.mxu0 %v8083_v36 }
 0x765   :  { %5794 = vmatmul.mubr.bf16.vlgmr.msra.gmra.mrb[24].mxu0 %v8860_v20  ;;  %v8098_v20 = vld [vmem:[#allocation20 + $0xcbc] ss:$76 sps:$4 sm:$0xff]  }
 0x766   :  { %5921 = vmatmul.mubr.bf16.vlgmr.msra.gmra.mrb[36].mxu1 %v8862_v22  ;;  %5805 = vmatpush1.bf16.msra.mxu0 %v8081_v39  ;;  %v8108_v39 = vld [vmem:[#allocation20 + $0xf18] ss:$76 sps:$4 sm:$0xff]  }
 0x767   :  { %5836 = vmatprep.mubr.bf16.mxu0 %v8866_v26  ;;  %5806 = vmatprep.subr.bf16.mxu0 %v8086_v41  ;;  %v1949_v26 = vrot.slane %v8938_v50, %v8849_v45  ;;  %v8113_v41 = vld [vmem:[#allocation20 + $0xfb4] ss:$76 sps:$4 sm:$0xff]  }
 0x76a   :  { %5807 = vmatpush1.bf16.msra.mxu0 %v8084_v42 }
 0x76b   :  { %5808 = vmatprep.subr.bf16.mxu0 %v8089_v43 }
 0x76e   :  { %5809 = vmatpush1.bf16.msra.mxu0 %v8087_v44 }
 0x76f   :  { %5810 = vmatprep.subr.bf16.mxu0 %v8092_v25  ;;  %v8111_v25 = vld [vmem:[#allocation20 + $0xfb0] ss:$76 sps:$4 sm:$0xff]  }
 0x772   :  { %5811 = vmatpush1.bf16.msra.mxu0 %v8090_v46 }
 0x773   :  { %5812 = vmatprep.subr.bf16.mxu0 %v8095_v48  ;;  %v8116_v48 = vld [vmem:[#allocation20 + $0x104c] ss:$76 sps:$4 sm:$0xff]  }
 0x776   :  { %5813 = vmatpush1.bf16.msra.mxu0 %v8093_v49 }
 0x777   :  { %5814 = vmatprep.subr.bf16.mxu0 %v8098_v20 }
 0x778   :  { %v5494_v56 = vpop.f32.mrb[16].mxu0 }
 0x779   :  { %v7005_v57 = vadd.f32 %v5494_v56, %v1941_v51  ;;  %v5580_v58 = vpop.f32.mrb[24].mxu1  ;;  %v5496_v59 = vpop.f32.mrb[17].mxu0  ;;  %v8120_v56 = vld [vmem:[#allocation20 + $0x1178] ss:$76 sps:$4 sm:$0xff]  }
 0x77a   :  { %v7009_v60 = vadd.f32 %v5580_v58, %v1949_v26  ;;  %v7006_v61 = vadd.f32 %v5496_v59, %v1945_v52  ;;  %v5582_v62 = vpop.f32.mrb[25].mxu1  ;;  %v5498_v63 = vpop.f32.mrb[18].mxu0  ;;  %5815 = vmatpush1.bf16.msra.mxu0 %v8096_v53  ;;  %v8123_v58 = vld [vmem:[#allocation20 + $0x1210] ss:$76 sps:$4 sm:$0xff]   ;;  %v8128_v59 = vld [vmem:[#allocation20 + $0x12ac] ss:$76 sps:$4 sm:$0xff]  }
 0x77b   :  { %vm5937_vm3 = vcmp.gt.f32.partialorder %v7005_v57, 0.0  ;;  %v5975_v1 = vmul.f32 0.2, %v7005_v57  ;;  %v7010_v2 = vadd.f32 %v5582_v62, %v1953_v54  ;;  %v7007_v3 = vadd.f32 %v5498_v63, %v1941_v51  ;;  %v5584_v4 = vpop.f32.mrb[26].mxu1  ;;  %v5500_v5 = vpop.f32.mrb[19].mxu0  ;;  %5816 = vmatprep.subr.bf16.mxu0 %v8101_v55 }
 0x77c   :  { %vm5939_vm4 = vcmp.gt.f32.partialorder %v7009_v60, 0.0  ;;  %v5977_v47 = vmul.f32 0.2, %v7009_v60  ;;  %vm5938_vm5 = vcmp.gt.f32.partialorder %v7006_v61, 0.0  ;;  %v5976_v6 = vmul.f32 0.2, %v7006_v61 }
 0x77d   :  { %v6013_v7 = vsel %vm5937_vm3, %v7005_v57, %v5975_v1  ;;  %vm5940_vm6 = vcmp.gt.f32.partialorder %v7010_v2, 0.0  ;;  %v5978_v8 = vmul.f32 0.2, %v7010_v2  ;;  %vm5956_vm7 = vcmp.gt.f32.partialorder %v7007_v3, 0.0  ;;  %v5586_v9 = vpop.f32.mrb[27].mxu1 }
 0x77e   :  { %8161 = vtanh.f32 %v6013_v7  ;;  %v6015_v10 = vsel %vm5939_vm4, %v7009_v60, %v5977_v47  ;;  %v6014_v11 = vsel %vm5938_vm5, %v7006_v61, %v5976_v6  ;;  %v5994_v12 = vmul.f32 0.2, %v7007_v3  ;;  %5817 = vmatpush1.bf16.msra.mxu0 %v8099_v0  ;;  %v8114_v51 = vld [vmem:[#allocation20 + $0x1048] ss:$76 sps:$4 sm:$0xff]  }
 0x77f   :  { %8163 = vtanh.f32 %v6015_v10  ;;  %v6016_v14 = vsel %vm5940_vm6, %v7010_v2, %v5978_v8  ;;  %v7011_v15 = vadd.f32 %v5584_v4, %v1949_v26  ;;  %v7008_v16 = vadd.f32 %v5500_v5, %v1945_v52  ;;  %5818 = vmatprep.subr.bf16.mxu0 %v8104_v23  ;;  %v8119_v52 = vld [vmem:[#allocation20 + $0x10e4] ss:$76 sps:$4 sm:$0xff]   ;;  %v8122_v55 = vld [vmem:[#allocation20 + $0x117c] ss:$76 sps:$4 sm:$0xff]   ;;  %v8125_v57 = vld [vmem:[#allocation20 + $0x1214] ss:$76 sps:$4 sm:$0xff]  }
 0x780   :  { %8165 = vtanh.f32 %v6014_v11  ;;  %v6032_v24 = vsel %vm5956_vm7, %v7007_v3, %v5994_v12  ;;  %v7012_v27 = vadd.f32 %v5586_v9, %v1953_v54  ;;  %v8117_v54 = vld [vmem:[#allocation20 + $0x10e0] ss:$76 sps:$4 sm:$0xff]   ;;  %v8126_v60 = vld [vmem:[#allocation20 + $0x12a8] ss:$76 sps:$4 sm:$0xff]   ;;  %v1957_v61 = vrot.slane %v8938_v50, %v1924_v35 }
 0x781   :  { %8167 = vtanh.f32 %v6016_v14  ;;  %vm5958_vm8 = vcmp.gt.f32.partialorder %v7011_v15, 0.0  ;;  %v5996_v28 = vmul.f32 0.2, %v7011_v15  ;;  %vm5957_vm9 = vcmp.gt.f32.partialorder %v7008_v16, 0.0 }
 0x782   :  { %8169 = vtanh.f32 %v6032_v24  ;;  %v5995_v30 = vmul.f32 0.2, %v7008_v16  ;;  %vm5959_vm10 = vcmp.gt.f32.partialorder %v7012_v27, 0.0  ;;  %v5997_v31 = vmul.f32 0.2, %v7012_v27  ;;  %5819 = vmatpush1.bf16.msra.mxu0 %v8102_v13 }
 0x783   :  { %v6034_v32 = vsel %vm5958_vm8, %v7011_v15, %v5996_v28  ;;  %5820 = vmatprep.subr.bf16.mxu0 %v8107_v17  ;;  %v1965_v62 = vrot.slane %v8938_v50, %v1932_v37  ;;  %v1961_v63 = vrot.slane %v8938_v50, %v1928_v38  ;;  %v1969_v0 = vrot.slane %v8938_v50, %v1936_v40 }
 0x784   :  { %8171 = vtanh.f32 %v6034_v32  ;;  %v6033_v34 = vsel %vm5957_vm9, %v7008_v16, %v5995_v30  ;;  %v6035_v36 = vsel %vm5959_vm10, %v7012_v27, %v5997_v31 }
 0x785   :  { %8173 = vtanh.f32 %v6033_v34 }
 0x786   :  { %8175 = vtanh.f32 %v6035_v36  ;;  %5821 = vmatpush1.bf16.msra.mxu0 %v8105_v29 }
 0x787   :  { %5822 = vmatprep.subr.bf16.mxu0 %v8110_v33 }
 0x788   :  { %v8162_v42 = vpop.eup %8161 }
 0x789   :  { %v8164_v43 = vpop.eup %8163  ;;  %6089 = vst [vmem:[#allocation23 + $0x40] sm:$0xff] %v8162_v42 }
 0x78a   :  { %v8166_v44 = vpop.eup %8165  ;;  %6091 = vst [vmem:[#allocation23 + $0x50] sm:$0xff] %v8164_v43  ;;  %5823 = vmatpush1.bf16.msra.mxu0 %v8108_v39 }
 0x78b   :  { %v8168_v46 = vpop.eup %8167  ;;  %6090 = vst [vmem:[#allocation23 + $0x48] sm:$0xff] %v8166_v44  ;;  %5824 = vmatprep.subr.bf16.mxu0 %v8113_v41 }
 0x78c   :  { %v8170_v49 = vpop.eup %8169  ;;  %6092 = vst [vmem:[#allocation23 + $0x58] sm:$0xff] %v8168_v46 }
 0x78d   :  { %6108 = vst [vmem:[#allocation23 + $0xd8] sm:$0xff] %v8170_v49 }
 0x78e   :  { %v8172_v20 = vpop.eup %8171  ;;  %5825 = vmatpush1.bf16.msra.mxu0 %v8111_v25 }
 0x78f   :  { %v8174_v26 = vpop.eup %8173  ;;  %6110 = vst [vmem:[#allocation23 + $0xe8] sm:$0xff] %v8172_v20  ;;  %5826 = vmatprep.subr.bf16.mxu0 %v8116_v48 }
 0x790   :  { %v8176_v53 = vpop.eup %8175  ;;  %6109 = vst [vmem:[#allocation23 + $0xe0] sm:$0xff] %v8174_v26 }
 0x791   :  { %6111 = vst [vmem:[#allocation23 + $0xf0] sm:$0xff] %v8176_v53 }
 0x792   :  { %5827 = vmatpush1.bf16.msra.mxu0 %v8114_v51  ;;  %v1902_v51 = vld [vmem:[#allocation22 + $0x10] sm:$0x7] }
 0x793   :  { %5828 = vmatprep.subr.bf16.mxu0 %v8119_v52  ;;  %v1981_v26 = vrot.slane %v1902_v51, %v8849_v45 }
 0x796   :  { %5829 = vmatpush1.bf16.msra.mxu0 %v8117_v54 }
 0x797   :  { %5830 = vmatprep.subr.bf16.mxu0 %v8122_v55 }
 0x79a   :  { %5831 = vmatpush1.bf16.msra.mxu0 %v8120_v56 }
 0x79b   :  { %5832 = vmatprep.subr.bf16.mxu0 %v8125_v57 }
 0x79e   :  { %5833 = vmatpush1.bf16.msra.mxu0 %v8123_v58 }
 0x79f   :  { %5834 = vmatprep.subr.bf16.mxu0 %v8128_v59 }
 0x7a2   :  { %5835 = vmatpush1.bf16.msra.mxu0 %v8126_v60 }
 0x7a5   :  { %5837 = vmatmul.mubr.bf16.vlgmr.msra.gmra.mrb[24].mxu0 %v8862_v22 }
 0x7f8   :  { %v5666_v23 = vpop.f32.mrb[20].mxu0 }
 0x7f9   :  { %v7013_v1 = vadd.f32 %v5666_v23, %v1957_v61  ;;  %v5752_v2 = vpop.f32.mrb[28].mxu1  ;;  %v5668_v22 = vpop.f32.mrb[21].mxu0 }
 0x7fa   :  { %v7017_v3 = vadd.f32 %v5752_v2, %v1965_v62  ;;  %v7014_v4 = vadd.f32 %v5668_v22, %v1961_v63  ;;  %v5754_v5 = vpop.f32.mrb[29].mxu1  ;;  %v5670_v35 = vpop.f32.mrb[22].mxu0  ;;  %v1973_v2 = vrot.slane %v1902_v51, %v8841_v19  ;;  %v1977_v22 = vrot.slane %v1902_v51, %v8844_v21 }
 0x7fb   :  { %vm5941_vm11 = vcmp.gt.f32.partialorder %v7013_v1, 0.0  ;;  %v5979_v47 = vmul.f32 0.2, %v7013_v1  ;;  %v7018_v6 = vadd.f32 %v5754_v5, %v1969_v0  ;;  %v7015_v37 = vadd.f32 %v5670_v35, %v1957_v61  ;;  %v5756_v7 = vpop.f32.mrb[30].mxu1  ;;  %v5672_v8 = vpop.f32.mrb[23].mxu0 }
 0x7fc   :  { %vm5943_vm12 = vcmp.gt.f32.partialorder %v7017_v3, 0.0  ;;  %v5981_v38 = vmul.f32 0.2, %v7017_v3  ;;  %vm5942_vm13 = vcmp.gt.f32.partialorder %v7014_v4, 0.0  ;;  %v5980_v18 = vmul.f32 0.2, %v7014_v4 }
 0x7fd   :  { %v6017_v9 = vsel %vm5941_vm11, %v7013_v1, %v5979_v47  ;;  %vm5944_vm14 = vcmp.gt.f32.partialorder %v7018_v6, 0.0  ;;  %v5982_v40 = vmul.f32 0.2, %v7018_v6  ;;  %vm5960_vm15 = vcmp.gt.f32.partialorder %v7015_v37, 0.0  ;;  %v5758_v50 = vpop.f32.mrb[31].mxu1 }
 0x7fe   :  { %8177 = vtanh.f32 %v6017_v9  ;;  %v6019_v10 = vsel %vm5943_vm12, %v7017_v3, %v5981_v38  ;;  %v6018_v11 = vsel %vm5942_vm13, %v7014_v4, %v5980_v18  ;;  %v5998_v12 = vmul.f32 0.2, %v7015_v37 }
 0x7ff   :  { %8179 = vtanh.f32 %v6019_v10  ;;  %v6020_v13 = vsel %vm5944_vm14, %v7018_v6, %v5982_v40  ;;  %v7019_v14 = vadd.f32 %v5756_v7, %v1965_v62  ;;  %v7016_v15 = vadd.f32 %v5672_v8, %v1961_v63 }
 0x800   :  { %8181 = vtanh.f32 %v6018_v11  ;;  %v6036_v16 = vsel %vm5960_vm15, %v7015_v37, %v5998_v12  ;;  %v7020_v17 = vadd.f32 %v5758_v50, %v1969_v0 }
 0x801   :  { %8183 = vtanh.f32 %v6020_v13  ;;  %vm5962_vm0 = vcmp.gt.f32.partialorder %v7019_v14, 0.0  ;;  %v6000_v24 = vmul.f32 0.2, %v7019_v14  ;;  %vm5961_vm1 = vcmp.gt.f32.partialorder %v7016_v15, 0.0 }
 0x802   :  { %8185 = vtanh.f32 %v6036_v16  ;;  %v5999_v27 = vmul.f32 0.2, %v7016_v15  ;;  %vm5963_vm2 = vcmp.gt.f32.partialorder %v7020_v17, 0.0  ;;  %v6001_v28 = vmul.f32 0.2, %v7020_v17 }
 0x803   :  { %v6038_v29 = vsel %vm5962_vm0, %v7019_v14, %v6000_v24 }
 0x804   :  { %8187 = vtanh.f32 %v6038_v29  ;;  %v6037_v30 = vsel %vm5961_vm1, %v7016_v15, %v5999_v27  ;;  %v6039_v31 = vsel %vm5963_vm2, %v7020_v17, %v6001_v28 }
 0x805   :  { %8189 = vtanh.f32 %v6037_v30 }
 0x806   :  { %8191 = vtanh.f32 %v6039_v31 }
 0x808   :  { %v8178_v32 = vpop.eup %8177 }
 0x809   :  { %v8180_v33 = vpop.eup %8179  ;;  %6093 = vst [vmem:[#allocation23 + $0x60] sm:$0xff] %v8178_v32 }
 0x80a   :  { %v8182_v34 = vpop.eup %8181  ;;  %6095 = vst [vmem:[#allocation23 + $0x70] sm:$0xff] %v8180_v33 }
 0x80b   :  { %v8184_v36 = vpop.eup %8183  ;;  %6094 = vst [vmem:[#allocation23 + $0x68] sm:$0xff] %v8182_v34 }
 0x80c   :  { %v8186_v39 = vpop.eup %8185  ;;  %6096 = vst [vmem:[#allocation23 + $0x78] sm:$0xff] %v8184_v36 }
 0x80d   :  { %6112 = vst [vmem:[#allocation23 + $0xf8] sm:$0xff] %v8186_v39 }
 0x80e   :  { %v8188_v41 = vpop.eup %8187 }
 0x80f   :  { %v8190_v42 = vpop.eup %8189  ;;  %6114 = vst [vmem:[#allocation23 + $0x108] sm:$0xff] %v8188_v41 }
 0x810   :  { %v8192_v43 = vpop.eup %8191  ;;  %6113 = vst [vmem:[#allocation23 + $0x100] sm:$0xff] %v8190_v42 }
 0x811   :  { %6115 = vst [vmem:[#allocation23 + $0x110] sm:$0xff] %v8192_v43 }
 0x819   :  { %v6901_v44 = vpop.f32.mrb[32].mxu1 }
 0x81a   :  { %v6902_v25 = vpop.f32.mrb[33].mxu1 }
 0x81b   :  { %v6903_v46 = vadd.f32 %v6902_v25, %v6901_v44  ;;  %v6904_v48 = vpop.f32.mrb[34].mxu1 }
 0x81c   :  { %v6905_v49 = vpop.f32.mrb[35].mxu1 }
 0x81d   :  { %v6906_v20 = vadd.f32 %v6905_v49, %v6904_v48  ;;  %v5882_v54 = vadd.f32 %v6903_v46, %v1981_v26 }
 0x81f   :  { %v5885_v58 = vadd.f32 %v6906_v20, %v1981_v26 }
 0x839   :  { %v6923_v52 = vpop.f32.mrb[36].mxu1 }
 0x83a   :  { %v6924_v53 = vpop.f32.mrb[37].mxu1 }
 0x83b   :  { %v6925_v55 = vadd.f32 %v6924_v53, %v6923_v52  ;;  %v6926_v56 = vpop.f32.mrb[38].mxu1 }
 0x83c   :  { %v6927_v57 = vpop.f32.mrb[39].mxu1 }
 0x83d   :  { %v5923_v59 = vadd.f32 %v6925_v55, %v5882_v54  ;;  %v6928_v60 = vadd.f32 %v6927_v57, %v6926_v56 }
 0x83f   :  { %vm5947_vm3 = vcmp.gt.f32.partialorder %v5923_v59, 0.0  ;;  %v5985_v61 = vmul.f32 0.2, %v5923_v59  ;;  %v5926_v62 = vadd.f32 %v6928_v60, %v5885_v58 }
 0x841   :  { %v6023_v63 = vsel %vm5947_vm3, %v5923_v59, %v5985_v61  ;;  %vm5966_vm4 = vcmp.gt.f32.partialorder %v5926_v62, 0.0  ;;  %v6004_v0 = vmul.f32 0.2, %v5926_v62 }
 0x842   :  { %8193 = vtanh.f32 %v6023_v63 }
 0x843   :  { %v6042_v23 = vsel %vm5966_vm4, %v5926_v62, %v6004_v0 }
 0x844   :  { %8195 = vtanh.f32 %v6042_v23 }
 0x84c   :  { %v8194_v1 = vpop.eup %8193 }
 0x84d   :  { %6099 = vst [vmem:[#allocation23 + $0x90] sm:$0xff] %v8194_v1 }
 0x84e   :  { %v8196_v45 = vpop.eup %8195 }
 0x84f   :  { %6118 = vst [vmem:[#allocation23 + $0x128] sm:$0xff] %v8196_v45 }
 0x878   :  { %v5838_v3 = vpop.f32.mrb[24].mxu0 }
 0x879   :  { %v7021_v4 = vadd.f32 %v5838_v3, %v1973_v2  ;;  %v5840_v5 = vpop.f32.mrb[25].mxu0 }
 0x87a   :  { %v7022_v35 = vadd.f32 %v5840_v5, %v1977_v22  ;;  %v5842_v47 = vpop.f32.mrb[26].mxu0 }
 0x87b   :  { %vm5945_vm5 = vcmp.gt.f32.partialorder %v7021_v4, 0.0  ;;  %v5983_v6 = vmul.f32 0.2, %v7021_v4  ;;  %v7023_v37 = vadd.f32 %v5842_v47, %v1973_v2  ;;  %v5844_v7 = vpop.f32.mrb[27].mxu0 }
 0x87c   :  { %vm5946_vm6 = vcmp.gt.f32.partialorder %v7022_v35, 0.0  ;;  %v5984_v8 = vmul.f32 0.2, %v7022_v35  ;;  %v7024_v38 = vadd.f32 %v5844_v7, %v1977_v22 }
 0x87d   :  { %v6021_v18 = vsel %vm5945_vm5, %v7021_v4, %v5983_v6  ;;  %vm5964_vm7 = vcmp.gt.f32.partialorder %v7023_v37, 0.0  ;;  %v6002_v9 = vmul.f32 0.2, %v7023_v37 }
 0x87e   :  { %8197 = vtanh.f32 %v6021_v18  ;;  %v6022_v40 = vsel %vm5946_vm6, %v7022_v35, %v5984_v8  ;;  %vm5965_vm8 = vcmp.gt.f32.partialorder %v7024_v38, 0.0  ;;  %v6003_v19 = vmul.f32 0.2, %v7024_v38 }
 0x87f   :  { %8199 = vtanh.f32 %v6022_v40  ;;  %v6040_v21 = vsel %vm5964_vm7, %v7023_v37, %v6002_v9 }
 0x880   :  { %8201 = vtanh.f32 %v6040_v21  ;;  %v6041_v50 = vsel %vm5965_vm8, %v7024_v38, %v6003_v19 }
 0x881   :  { %8203 = vtanh.f32 %v6041_v50 }
 0x888   :  { %v8198_v10 = vpop.eup %8197 }
 0x889   :  { %v8200_v11 = vpop.eup %8199  ;;  %6097 = vst [vmem:[#allocation23 + $0x80] sm:$0xff] %v8198_v10 }
 0x88a   :  { %v8202_v12 = vpop.eup %8201  ;;  %6098 = vst [vmem:[#allocation23 + $0x88] sm:$0xff] %v8200_v11 }
 0x88b   :  { %v8204_v13 = vpop.eup %8203  ;;  %6116 = vst [vmem:[#allocation23 + $0x118] sm:$0xff] %v8202_v12 }
 0x88c   :  { %6117 = vst [vmem:[#allocation23 + $0x120] sm:$0xff] %v8204_v13 }
 0x88d   :  { %8502 = shalt.err (!%p8499_p10)
}
 0x88e   :  { %s8503_s24 = scalar_lea.hbm %s8989_s13, 4864 }
 0x88f   :  { %p8504_p11 = scmp.ne.s32.totalorder %s8989_s13, %s8503_s24  ;;  %p8507_p12 = scmp.lt.u32.totalorder %s8503_s24, %s8989_s13 }
 0x891   :  { %p8509_p13 = pnand %p8507_p12, %p8504_p11 }
 0x893   :  { %8512 = shalt.err (!%p8509_p13)
}
 0x894   :  { %s8554_s16 = smov 2432   ;;  %s8555_s9 = smov 152  }
 0x895   :  { %6130 = dma.vmem_to_hbm [thread:$0]  %s6125_s11, 4864, %s8989_s13, [#allocation4], %s8554_s16, %s8554_s16, %s8555_s9  }
 0x896   :  { %8527 = dma.done.wait [#allocation4], 4864  }
 0x897   :  { %8528 = vsyncadd [#allocation4], 4294962432 }
 0x898   :  { %6134 = vsyncpa [#allocation3], 1 }
 0x899   :  { %6135 = vsyncpa [#allocation6], 1 }
 0x89a   :  { %6136 = vsyncpa [#allocation9], 1 }
 0x89b   :  { %6137 = vsyncpa [#allocation12], 1 }
 0x89c   :  { %6138 = vsyncpa [#allocation15], 1 }
 0x89d   :  { %6139 = vsyncpa [#allocation18], 1 }
 0x89e   :  { %6140 = vsyncpa [#allocation21], 1 }
 0x89f   :  { %6141 = vsyncpa [#allocation4], 1 }

</bundles_post_ra>
